<compile_context>
chip_gen: v7x
topology: tpu7x:2x2x1
jax: 0.10.0
libtpu: 0.0.40
codegen_flags: <defaults>
</compile_context>

<pallas_src>
import functools
import math

import jax
import jax.numpy as jnp
from jax import lax
from jax.experimental import pallas as pl
from jax.experimental.pallas import tpu as pltpu

ALPHA = 0.2      # LeakyReLU negative slope of the GAT layers
V = 1.0          # Student-t degrees of freedom in get_Q
_NEG_INF = -9e15


# --------------------------------------------------------------------------
# VMEM budget / tile-size selection (generation aware)
# --------------------------------------------------------------------------
def _vmem_capacity_bytes():
    try:
        return int(pltpu.get_tpu_info().vmem_capacity_bytes)
    except Exception:
        return 64 * 1024 * 1024   # conservative: v7x per-TC VMEM


def _usable_vmem_bytes():
    cap = _vmem_capacity_bytes()
    # ~48 MiB on v7x (64 MiB), ~100 MiB on v5e/v6e (128 MiB); keep headroom.
    return max(min(int(cap * 0.78), cap - 8 * 1024 * 1024), 24 * 1024 * 1024)


def _tm_from_budget(N, H, E, K, usable):
    f32 = 4
    D = max(H, E)
    # grid-invariant residents (counted double-buffered, see NOTE above)
    resident = 2 * N * max(2 * D + 4, 2 * (H + E) + 8)
    # per-tile-row bytes: streamed inputs + outputs (double-buffered) + temps
    per_row_att = N * (2 * 2 + 2 * 2 + 3 * f32) + 2 * 2 * D * f32 + 32
    per_row_dec = N * (2 * f32 * 2 + 2 * f32) + 2 * f32 * (H + E + K) + 32
    per_row = max(per_row_att, per_row_dec)
    avail = usable - resident - (4 << 20)     # compiler scratch headroom
    return max(8, avail // per_row)


def _pick_tm(N, tm_max):
    """Largest multiple-of-8 divisor of N that fits the budget, keeps >= 2
    row blocks (v7x megacore), and is capped at 512."""
    cap = min(int(tm_max), 512, N)
    if N >= 16:
        cap = min(cap, max(N // 2, 8))
    cands = [t for t in range(8, cap + 1, 8) if N % t == 0]
    return max(cands) if cands else N


# --------------------------------------------------------------------------
# Kernel 1: row-tiled projection.
#   h      = inp @ W                      (tm, D)
#   scores = inp @ [W a_self | W a_neigh] (tm, 2)   (attention vecs folded in)
# --------------------------------------------------------------------------
def gat_project_kernel(inp_ref, w_ref, wsn_ref, h_ref, sc_ref):
    inp = inp_ref[...]
    h_ref[...] = jnp.dot(inp, w_ref[...], preferred_element_type=jnp.float32)
    sc_ref[...] = jnp.dot(inp, wsn_ref[...], preferred_element_type=jnp.float32)


def gat_project(inp, W, w_sn, tm, vmem_bytes):
    N, F = inp.shape
    D = W.shape[1]
    return pl.pallas_call(
        gat_project_kernel,
        grid=(N // tm,),
        in_specs=[
            pl.BlockSpec((tm, F), lambda i: (i, 0)),   # inp row tile (streamed)
            pl.BlockSpec((F, D), lambda i: (0, 0)),    # W (resident)
            pl.BlockSpec((F, 2), lambda i: (0, 0)),    # folded attention vecs
        ],
        out_specs=(pl.BlockSpec((tm, D), lambda i: (i, 0)),
                   pl.BlockSpec((tm, 2), lambda i: (i, 0))),
        out_shape=(jax.ShapeDtypeStruct((N, D), jnp.float32),
                   jax.ShapeDtypeStruct((N, 2), jnp.float32)),
        compiler_params=pltpu.CompilerParams(
            dimension_semantics=("parallel",),
            vmem_limit_bytes=vmem_bytes),
    )(inp, W, w_sn)


# --------------------------------------------------------------------------
# Kernel 2: row-tiled GAT attention + ELU + L2 normalization.
#   resident : h (N, D) bf16, neighbour-score row (1, N) f32
#   blocked  : self-score column (tm, 1) f32
#   streamed : adj / M row tiles (tm, N) bf16
#   outputs  : [h_out (tm, D)] (layer 1 only), z_out (tm, D)
# --------------------------------------------------------------------------
def gat_attention_kernel(aself_ref, an_ref, h_ref, adj_ref, m_ref, *out_refs,
                         write_h):
    dense = aself_ref[...] + an_ref[...]                 # (tm,1)+(1,N)->(tm,N)
    dense = dense * m_ref[...].astype(jnp.float32)
    dense = jnp.maximum(dense, ALPHA * dense)            # LeakyReLU (alpha<1)
    logits = jnp.where(adj_ref[...] > 0, dense, _NEG_INF)
    logits = logits - jnp.max(logits, axis=1, keepdims=True)
    e = jnp.exp(logits)
    inv_s = pl.reciprocal(jnp.sum(e, axis=1, keepdims=True), approx=True)
    # normalize AFTER the matmul: (tm,D) scale instead of a (tm,N) divide
    h_prime = jnp.dot(e.astype(jnp.bfloat16), h_ref[...],
                      preferred_element_type=jnp.float32) * inv_s
    # ELU; clamp the exp argument so the discarded branch stays finite
    h_out = jnp.where(h_prime > 0, h_prime,
                      jnp.exp(jnp.minimum(h_prime, 0.0)) - 1.0)
    # F.normalize(h, p=2, dim=1)
    ssq = jnp.sum(h_out * h_out, axis=1, keepdims=True)
    z_out = h_out * lax.rsqrt(jnp.maximum(ssq, 1e-24))

    if write_h:
        hout_ref, zout_ref = out_refs
        hout_ref[...] = h_out
        zout_ref[...] = z_out
    else:
        (zout_ref,) = out_refs
        zout_ref[...] = z_out


def gat_attention(h_bf, aself_col, an_row, adj_bf, m_bf, tm, vmem_bytes,
                  write_h):
    N, D = h_bf.shape
    if write_h:
        out_specs = (pl.BlockSpec((tm, D), lambda i: (i, 0)),
                     pl.BlockSpec((tm, D), lambda i: (i, 0)))
        out_shape = (jax.ShapeDtypeStruct((N, D), jnp.float32),
                     jax.ShapeDtypeStruct((N, D), jnp.float32))
    else:
        out_specs = pl.BlockSpec((tm, D), lambda i: (i, 0))
        out_shape = jax.ShapeDtypeStruct((N, D), jnp.float32)
    return pl.pallas_call(
        functools.partial(gat_attention_kernel, write_h=write_h),
        grid=(N // tm,),
        in_specs=[
            pl.BlockSpec((tm, 1), lambda i: (i, 0)),   # self-score column tile
            pl.BlockSpec((1, N), lambda i: (0, 0)),    # neighbour-score row
            pl.BlockSpec((N, D), lambda i: (0, 0)),    # h (bf16, resident)
            pl.BlockSpec((tm, N), lambda i: (i, 0)),   # adj tile (bf16 stream)
            pl.BlockSpec((tm, N), lambda i: (i, 0)),   # M tile   (bf16 stream)
        ],
        out_specs=out_specs,
        out_shape=out_shape,
        compiler_params=pltpu.CompilerParams(
            dimension_semantics=("parallel",),
            vmem_limit_bytes=vmem_bytes),
    )(aself_col, an_row, h_bf, adj_bf, m_bf)


# --------------------------------------------------------------------------
# Kernel 3: row-tiled dot-product decoders + Student-t soft assignment.
#   blocked  : z1_blk (tm, H) f32, z_blk (tm, E) f32
#   resident : z1^T (H, N) bf16, z^T (E, N) bf16, cluster^T (E, K) f32,
#              c_sq (1, K) f32 (hoisted)
#   outputs  : A1 (tm, N), A2 (tm, N), q (tm, K)
# --------------------------------------------------------------------------
def decoder_q_kernel(z1_blk_ref, z_blk_ref, z1t_ref, zt_ref, clt_ref, csq_ref,
                     a1_ref, a2_ref, q_ref):
    z1_blk = z1_blk_ref[...]
    z_blk = z_blk_ref[...]

    # sigmoid(z_blk @ z^T): resident operand pre-transposed -> plain MXU matmul
    a1_ref[...] = jax.nn.sigmoid(jnp.dot(
        z1_blk.astype(jnp.bfloat16), z1t_ref[...],
        preferred_element_type=jnp.float32))
    a2_ref[...] = jax.nn.sigmoid(jnp.dot(
        z_blk.astype(jnp.bfloat16), zt_ref[...],
        preferred_element_type=jnp.float32))

    # get_Q: ||z - c||^2 = ||z||^2 + ||c||^2 - 2 z.c  (c terms hoisted)
    z_sq = jnp.sum(z_blk * z_blk, axis=1, keepdims=True)          # (tm, 1)
    zc = jnp.dot(z_blk, clt_ref[...], preferred_element_type=jnp.float32)
    dist = jnp.maximum(z_sq + csq_ref[...] - 2.0 * zc, 0.0)       # (tm, K)

    q = 1.0 / (1.0 + dist / V)
    exponent = (V + 1.0) / 2.0
    if exponent != 1.0:            # no-op for v == 1 (avoids EUP pow)
        q = jnp.power(q, exponent)
    q_ref[...] = q / jnp.sum(q, axis=1, keepdims=True)


def decoder_q(z1, z, z1t_bf, zt_bf, cluster_t, c_sq, tm, vmem_bytes):
    N, H = z1.shape
    E = z.shape[1]
    K = cluster_t.shape[1]
    return pl.pallas_call(
        decoder_q_kernel,
        grid=(N // tm,),
        in_specs=[
            pl.BlockSpec((tm, H), lambda i: (i, 0)),   # z1 row tile
            pl.BlockSpec((tm, E), lambda i: (i, 0)),   # z  row tile
            pl.BlockSpec((H, N), lambda i: (0, 0)),    # z1^T (bf16, resident)
            pl.BlockSpec((E, N), lambda i: (0, 0)),    # z^T  (bf16, resident)
            pl.BlockSpec((E, K), lambda i: (0, 0)),    # cluster^T
            pl.BlockSpec((1, K), lambda i: (0, 0)),    # sum(cluster^2)
        ],
        out_specs=(pl.BlockSpec((tm, N), lambda i: (i, 0)),
                   pl.BlockSpec((tm, N), lambda i: (i, 0)),
                   pl.BlockSpec((tm, K), lambda i: (i, 0))),
        out_shape=(jax.ShapeDtypeStruct((N, N), jnp.float32),
                   jax.ShapeDtypeStruct((N, N), jnp.float32),
                   jax.ShapeDtypeStruct((N, K), jnp.float32)),
        compiler_params=pltpu.CompilerParams(
            dimension_semantics=("parallel",),
            vmem_limit_bytes=vmem_bytes),
    )(z1, z, z1t_bf, zt_bf, cluster_t, c_sq)


# --------------------------------------------------------------------------
# Forward wrapper (DAEGC.forward)
# --------------------------------------------------------------------------
def daegc_forward(x, adj, M, params, *, tm=None):
    N = x.shape[0]
    H = params["W1"].shape[1]
    E = params["W2"].shape[1]
    K = params["cluster"].shape[0]

    usable = _usable_vmem_bytes()
    if tm is None:
        tm = _pick_tm(N, _tm_from_budget(N, H, E, K, usable))
    assert N % tm == 0, "row tile must divide N"
    assert tm == N or tm % 8 == 0, "row tile must be a multiple of 8"

    # Low-precision streamed copies (adj binary -> exact in bf16).
    adj_bf = adj.astype(jnp.bfloat16)
    m_bf = M.astype(jnp.bfloat16)

    # Fold the attention vectors into the projection:
    #   attn_self = (x @ W) @ a_self = x @ (W @ a_self)   (same for neighbour)
    w_sn1 = jnp.concatenate([params["W1"] @ params["a_self1"],
                             params["W1"] @ params["a_neigh1"]], axis=1)
    w_sn2 = jnp.concatenate([params["W2"] @ params["a_self2"],
                             params["W2"] @ params["a_neigh2"]], axis=1)

    # GAT layer 1
    h1p, sc1 = gat_project(x, params["W1"], w_sn1, tm, usable)
    h1, z1 = gat_attention(h1p.astype(jnp.bfloat16),
                           sc1[:, 0:1], sc1[:, 1].reshape(1, N),
                           adj_bf, m_bf, tm, usable, write_h=True)

    # GAT layer 2 (un-normalized h2 is never consumed -> skip writing it)
    h2p, sc2 = gat_project(h1, params["W2"], w_sn2, tm, usable)
    z = gat_attention(h2p.astype(jnp.bfloat16),
                      sc2[:, 0:1], sc2[:, 1].reshape(1, N),
                      adj_bf, m_bf, tm, usable, write_h=False)

    # Decoders + Student-t q: transpose / hoist iteration-invariant operands.
    cluster = params["cluster"]
    cluster_t = cluster.T                                         # (E, K)
    c_sq = jnp.sum(cluster * cluster, axis=1).reshape(1, K)       # (1, K)
    A1_pred, A2_pred, q = decoder_q(
        z1, z, z1.T.astype(jnp.bfloat16), z.T.astype(jnp.bfloat16),
        cluster_t, c_sq, tm, usable)
    return A1_pred, A2_pred, z, q


# --------------------------------------------------------------------------
# Deterministic parameter init (mirrors GATLayer / DAEGC param shapes)
# --------------------------------------------------------------------------
def _xavier_uniform(key, shape, gain):
    fan_in, fan_out = shape
    a = gain * math.sqrt(6.0 / (fan_in + fan_out))
    return jax.random.uniform(key, shape, jnp.float32, minval=-a, maxval=a)


def _xavier_normal(key, shape, gain=1.0):
    fan_in, fan_out = shape
    std = gain * math.sqrt(2.0 / (fan_in + fan_out))
    return std * jax.random.normal(key, shape, jnp.float32)


if __name__ == "__main__":
    # small shapes consistent with the module
    N = 256                # number of graph nodes
    NUM_FEATURES = 64
    HIDDEN = 64
    EMBEDDING = 32
    NUM_CLUSTERS = 8

    key = jax.random.PRNGKey(0)
    keys = jax.random.split(key, 10)

    # inputs
    x = jax.random.normal(keys[0], (N, NUM_FEATURES), jnp.float32)
    adj_rand = jax.random.uniform(keys[1], (N, N), jnp.float32)
    adj = (adj_rand > 0.9).astype(jnp.float32)
    adj = jnp.clip(adj + adj.T + jnp.eye(N, dtype=jnp.float32), 0.0, 1.0)
    M = jax.random.uniform(keys[2], (N, N), jnp.float32)

    gain = 1.414
    params = {
        "W1": _xavier_uniform(keys[3], (NUM_FEATURES, HIDDEN), gain),
        "a_self1": _xavier_uniform(keys[4], (HIDDEN, 1), gain),
        "a_neigh1": _xavier_uniform(keys[5], (HIDDEN, 1), gain),
        "W2": _xavier_uniform(keys[6], (HIDDEN, EMBEDDING), gain),
        "a_self2": _xavier_uniform(keys[7], (EMBEDDING, 1), gain),
        "a_neigh2": _xavier_uniform(keys[8], (EMBEDDING, 1), gain),
        "cluster": _xavier_normal(keys[9], (NUM_CLUSTERS, EMBEDDING)),
    }

    # jit the wrapper so the small XLA glue (casts / transposes / concats)
    # fuses around the pallas_calls; tm auto-picked from the VMEM budget
    # (=> tm=128, grid=(2,) here, exercising the tiled / pipelined path).
    fwd = jax.jit(daegc_forward)
    A1_pred, A2_pred, z, q = fwd(x, adj, M, params)
    jax.block_until_ready((A1_pred, A2_pred, z, q))

    assert A1_pred.shape == (N, N)
    assert A2_pred.shape == (N, N)
    assert z.shape == (N, EMBEDDING)
    assert q.shape == (N, NUM_CLUSTERS)
    assert bool(jnp.isfinite(A1_pred).all())
    assert bool(jnp.isfinite(A2_pred).all())
    assert bool(jnp.isfinite(z).all())
    assert bool(jnp.isfinite(q).all())
    assert bool(jnp.allclose(jnp.sum(q, axis=1), 1.0, atol=1e-3))
    print("KERNEL_OK")
</pallas_src>

<mosaic_0001>
module attributes {stable_mosaic.version = 11 : i64} {
  func.func @gat_project_kernel(%arg0: i32, %arg1: memref<128x64xf32, #tpu.memory_space<vmem>>, %arg2: memref<64x64xf32, #tpu.memory_space<vmem>>, %arg3: memref<64x2xf32, #tpu.memory_space<vmem>>, %arg4: memref<128x64xf32, #tpu.memory_space<vmem>>, %arg5: memref<128x2xf32, #tpu.memory_space<vmem>>) attributes {dimension_semantics = [#tpu.dimension_semantics<parallel>], iteration_bounds = array<i64: 2>, scalar_prefetch = 0 : i64, scratch_operands = 0 : i64, tpu.core_type = #tpu.core_type<tc>, window_params = [{transform_indices = @transform_0, window_bounds = array<i64: 128, 64>}, {pipeline_mode = #tpu.pipeline_mode<synchronous>, transform_indices = @transform_1, window_bounds = array<i64: 64, 64>}, {pipeline_mode = #tpu.pipeline_mode<synchronous>, transform_indices = @transform_2, window_bounds = array<i64: 64, 2>}, {transform_indices = @transform_3, window_bounds = array<i64: 128, 64>}, {transform_indices = @transform_4, window_bounds = array<i64: 128, 2>}]} {
    %c0 = arith.constant 0 : index
    %c0_0 = arith.constant 0 : index
    %0 = vector.load %arg1[%c0, %c0_0] : memref<128x64xf32, #tpu.memory_space<vmem>>, vector<128x64xf32>
    %c0_1 = arith.constant 0 : index
    %c0_2 = arith.constant 0 : index
    %1 = vector.load %arg2[%c0_1, %c0_2] : memref<64x64xf32, #tpu.memory_space<vmem>>, vector<64x64xf32>
    %cst = arith.constant dense<0.000000e+00> : vector<128x64xf32>
    %2 = tpu.matmul %0, %1, %cst {dimension_numbers = #tpu.dot_dimension_numbers<[1], [0], [0], [1], [0, 0, 1, 1], [], []>} : vector<128x64xf32>, vector<64x64xf32>, vector<128x64xf32> -> vector<128x64xf32>
    %c0_3 = arith.constant 0 : index
    %c0_4 = arith.constant 0 : index
    %3 = vector.load %arg4[%c0_3, %c0_4] : memref<128x64xf32, #tpu.memory_space<vmem>>, vector<128x64xf32>
    tpu.vector_store %arg4[%c0_3, %c0_4], %2 {strides = array<i32>} : memref<128x64xf32, #tpu.memory_space<vmem>>, vector<128x64xf32>,
    %c0_5 = arith.constant 0 : index
    %c0_6 = arith.constant 0 : index
    %4 = vector.load %arg3[%c0_5, %c0_6] : memref<64x2xf32, #tpu.memory_space<vmem>>, vector<64x2xf32>
    %cst_7 = arith.constant dense<0.000000e+00> : vector<128x2xf32>
    %5 = tpu.matmul %0, %4, %cst_7 {dimension_numbers = #tpu.dot_dimension_numbers<[1], [0], [0], [1], [0, 0, 1, 1], [], []>} : vector<128x64xf32>, vector<64x2xf32>, vector<128x2xf32> -> vector<128x2xf32>
    %c0_8 = arith.constant 0 : index
    %c0_9 = arith.constant 0 : index
    %6 = vector.load %arg5[%c0_8, %c0_9] : memref<128x2xf32, #tpu.memory_space<vmem>>, vector<128x2xf32>
    tpu.vector_store %arg5[%c0_8, %c0_9], %5 {strides = array<i32>} : memref<128x2xf32, #tpu.memory_space<vmem>>, vector<128x2xf32>,
    return
  }
  func.func @transform_0(%arg0: i32) -> (i32, i32) {
    %c0_i32 = arith.constant 0 : i32
    %c0_i32_0 = arith.constant 0 : i32
    return %arg0, %c0_i32 : i32, i32
  }
  func.func @transform_1(%arg0: i32) -> (i32, i32) {
    %c0_i32 = arith.constant 0 : i32
    %c0_i32_0 = arith.constant 0 : i32
    %c0_i32_1 = arith.constant 0 : i32
    return %c0_i32, %c0_i32_0 : i32, i32
  }
  func.func @transform_2(%arg0: i32) -> (i32, i32) {
    %c0_i32 = arith.constant 0 : i32
    %c0_i32_0 = arith.constant 0 : i32
    %c0_i32_1 = arith.constant 0 : i32
    return %c0_i32, %c0_i32_0 : i32, i32
  }
  func.func @transform_3(%arg0: i32) -> (i32, i32) {
    %c0_i32 = arith.constant 0 : i32
    %c0_i32_0 = arith.constant 0 : i32
    return %arg0, %c0_i32 : i32, i32
  }
  func.func @transform_4(%arg0: i32) -> (i32, i32) {
    %c0_i32 = arith.constant 0 : i32
    %c0_i32_0 = arith.constant 0 : i32
    return %arg0, %c0_i32 : i32, i32
  }
}

module attributes {stable_mosaic.version = 11 : i64} {
  func.func @gat_attention_kernel(%arg0: i32, %arg1: memref<128x1xf32, #tpu.memory_space<vmem>>, %arg2: memref<1x256xf32, #tpu.memory_space<vmem>>, %arg3: memref<256x64xbf16, #tpu.memory_space<vmem>>, %arg4: memref<128x256xbf16, #tpu.memory_space<vmem>>, %arg5: memref<128x256xbf16, #tpu.memory_space<vmem>>, %arg6: memref<128x64xf32, #tpu.memory_space<vmem>>, %arg7: memref<128x64xf32, #tpu.memory_space<vmem>>) attributes {dimension_semantics = [#tpu.dimension_semantics<parallel>], iteration_bounds = array<i64: 2>, scalar_prefetch = 0 : i64, scratch_operands = 0 : i64, tpu.core_type = #tpu.core_type<tc>, window_params = [{transform_indices = @transform_0, window_bounds = array<i64: 128, 1>}, {pipeline_mode = #tpu.pipeline_mode<synchronous>, transform_indices = @transform_1, window_bounds = array<i64: 1, 256>}, {pipeline_mode = #tpu.pipeline_mode<synchronous>, transform_indices = @transform_2, window_bounds = array<i64: 256, 64>}, {transform_indices = @transform_3, window_bounds = array<i64: 128, 256>}, {transform_indices = @transform_4, window_bounds = array<i64: 128, 256>}, {transform_indices = @transform_5, window_bounds = array<i64: 128, 64>}, {transform_indices = @transform_6, window_bounds = array<i64: 128, 64>}]} {
    %c0 = arith.constant 0 : index
    %c0_0 = arith.constant 0 : index
    %0 = vector.load %arg1[%c0, %c0_0] : memref<128x1xf32, #tpu.memory_space<vmem>>, vector<128x1xf32>
    %c0_1 = arith.constant 0 : index
    %c0_2 = arith.constant 0 : index
    %1 = vector.load %arg2[%c0_1, %c0_2] : memref<1x256xf32, #tpu.memory_space<vmem>>, vector<1x256xf32>
    %2 = vector.broadcast %0 : vector<128x1xf32> to vector<128x256xf32>
    %3 = vector.broadcast %1 : vector<1x256xf32> to vector<128x256xf32>
    %4 = arith.addf %2, %3 : vector<128x256xf32>
    %c0_3 = arith.constant 0 : index
    %c0_4 = arith.constant 0 : index
    %5 = vector.load %arg5[%c0_3, %c0_4] : memref<128x256xbf16, #tpu.memory_space<vmem>>, vector<128x256xbf16>
    %6 = arith.extf %5 : vector<128x256xbf16> to vector<128x256xf32>
    %7 = arith.mulf %4, %6 : vector<128x256xf32>
    %cst = arith.constant 2.000000e-01 : f32
    %8 = vector.broadcast %cst : f32 to vector<128x256xf32>
    %9 = arith.mulf %8, %7 : vector<128x256xf32>
    %10 = arith.maximumf %7, %9 : vector<128x256xf32>
    %c0_5 = arith.constant 0 : index
    %c0_6 = arith.constant 0 : index
    %11 = vector.load %arg4[%c0_5, %c0_6] : memref<128x256xbf16, #tpu.memory_space<vmem>>, vector<128x256xbf16>
    %cst_7 = arith.constant 0.000000e+00 : bf16
    %12 = vector.broadcast %cst_7 : bf16 to vector<128x256xbf16>
    %13 = arith.cmpf ogt, %11, %12 : vector<128x256xbf16>
    %cst_8 = arith.constant -9.000000e+15 : f32
    %14 = vector.broadcast %cst_8 : f32 to vector<128x256xf32>
    %15 = arith.select %13, %10, %14 : vector<128x256xi1>, vector<128x256xf32>
    %cst_9 = arith.constant dense<0xFF800000> : vector<128xf32>
    %16 = vector.multi_reduction <maximumf>, %15, %cst_9 [1] : vector<128x256xf32> to vector<128xf32>
    %17 = vector.shape_cast %16 : vector<128xf32> to vector<128x1xf32>
    %18 = vector.broadcast %17 : vector<128x1xf32> to vector<128x256xf32>
    %19 = arith.subf %15, %18 : vector<128x256xf32>
    %20 = math.exp %19 : vector<128x256xf32>
    %cst_10 = arith.constant dense<0.000000e+00> : vector<128xf32>
    %21 = vector.multi_reduction <add>, %20, %cst_10 [1] : vector<128x256xf32> to vector<128xf32>
    %22 = vector.shape_cast %21 : vector<128xf32> to vector<128x1xf32>
    %23 = tpu.reciprocal %22 {approx = true} : vector<128x1xf32> -> vector<128x1xf32>
    %24 = arith.truncf %20 : vector<128x256xf32> to vector<128x256xbf16>
    %c0_11 = arith.constant 0 : index
    %c0_12 = arith.constant 0 : index
    %25 = vector.load %arg3[%c0_11, %c0_12] : memref<256x64xbf16, #tpu.memory_space<vmem>>, vector<256x64xbf16>
    %cst_13 = arith.constant dense<0.000000e+00> : vector<128x64xf32>
    %26 = tpu.matmul %24, %25, %cst_13 {dimension_numbers = #tpu.dot_dimension_numbers<[1], [0], [0], [1], [0, 0, 1, 1], [], []>} : vector<128x256xbf16>, vector<256x64xbf16>, vector<128x64xf32> -> vector<128x64xf32>
    %27 = vector.broadcast %23 : vector<128x1xf32> to vector<128x64xf32>
    %28 = arith.mulf %26, %27 : vector<128x64xf32>
    %cst_14 = arith.constant 0.000000e+00 : f32
    %29 = vector.broadcast %cst_14 : f32 to vector<128x64xf32>
    %30 = arith.cmpf ogt, %28, %29 : vector<128x64xf32>
    %cst_15 = arith.constant 0.000000e+00 : f32
    %31 = vector.broadcast %cst_15 : f32 to vector<128x64xf32>
    %32 = arith.minimumf %28, %31 : vector<128x64xf32>
    %33 = math.exp %32 : vector<128x64xf32>
    %cst_16 = arith.constant 1.000000e+00 : f32
    %34 = vector.broadcast %cst_16 : f32 to vector<128x64xf32>
    %35 = arith.subf %33, %34 : vector<128x64xf32>
    %36 = arith.select %30, %28, %35 : vector<128x64xi1>, vector<128x64xf32>
    %37 = arith.mulf %36, %36 : vector<128x64xf32>
    %cst_17 = arith.constant dense<0.000000e+00> : vector<128xf32>
    %38 = vector.multi_reduction <add>, %37, %cst_17 [1] : vector<128x64xf32> to vector<128xf32>
    %39 = vector.shape_cast %38 : vector<128xf32> to vector<128x1xf32>
    %cst_18 = arith.constant 1.000000e-24 : f32
    %40 = vector.broadcast %cst_18 : f32 to vector<128x1xf32>
    %41 = arith.maximumf %39, %40 : vector<128x1xf32>
    %42 = math.rsqrt %41 : vector<128x1xf32>
    %43 = vector.broadcast %42 : vector<128x1xf32> to vector<128x64xf32>
    %44 = arith.mulf %36, %43 : vector<128x64xf32>
    %c0_19 = arith.constant 0 : index
    %c0_20 = arith.constant 0 : index
    %45 = vector.load %arg6[%c0_19, %c0_20] : memref<128x64xf32, #tpu.memory_space<vmem>>, vector<128x64xf32>
    tpu.vector_store %arg6[%c0_19, %c0_20], %36 {strides = array<i32>} : memref<128x64xf32, #tpu.memory_space<vmem>>, vector<128x64xf32>,
    %c0_21 = arith.constant 0 : index
    %c0_22 = arith.constant 0 : index
    %46 = vector.load %arg7[%c0_21, %c0_22] : memref<128x64xf32, #tpu.memory_space<vmem>>, vector<128x64xf32>
    tpu.vector_store %arg7[%c0_21, %c0_22], %44 {strides = array<i32>} : memref<128x64xf32, #tpu.memory_space<vmem>>, vector<128x64xf32>,
    return
  }
  func.func @transform_0(%arg0: i32) -> (i32, i32) {
    %c0_i32 = arith.constant 0 : i32
    %c0_i32_0 = arith.constant 0 : i32
    return %arg0, %c0_i32 : i32, i32
  }
  func.func @transform_1(%arg0: i32) -> (i32, i32) {
    %c0_i32 = arith.constant 0 : i32
    %c0_i32_0 = arith.constant 0 : i32
    %c0_i32_1 = arith.constant 0 : i32
    return %c0_i32, %c0_i32_0 : i32, i32
  }
  func.func @transform_2(%arg0: i32) -> (i32, i32) {
    %c0_i32 = arith.constant 0 : i32
    %c0_i32_0 = arith.constant 0 : i32
    %c0_i32_1 = arith.constant 0 : i32
    return %c0_i32, %c0_i32_0 : i32, i32
  }
  func.func @transform_3(%arg0: i32) -> (i32, i32) {
    %c0_i32 = arith.constant 0 : i32
    %c0_i32_0 = arith.constant 0 : i32
    return %arg0, %c0_i32 : i32, i32
  }
  func.func @transform_4(%arg0: i32) -> (i32, i32) {
    %c0_i32 = arith.constant 0 : i32
    %c0_i32_0 = arith.constant 0 : i32
    return %arg0, %c0_i32 : i32, i32
  }
  func.func @transform_5(%arg0: i32) -> (i32, i32) {
    %c0_i32 = arith.constant 0 : i32
    %c0_i32_0 = arith.constant 0 : i32
    return %arg0, %c0_i32 : i32, i32
  }
  func.func @transform_6(%arg0: i32) -> (i32, i32) {
    %c0_i32 = arith.constant 0 : i32
    %c0_i32_0 = arith.constant 0 : i32
    return %arg0, %c0_i32 : i32, i32
  }
}

module attributes {stable_mosaic.version = 11 : i64} {
  func.func @gat_project_kernel(%arg0: i32, %arg1: memref<128x64xf32, #tpu.memory_space<vmem>>, %arg2: memref<64x32xf32, #tpu.memory_space<vmem>>, %arg3: memref<64x2xf32, #tpu.memory_space<vmem>>, %arg4: memref<128x32xf32, #tpu.memory_space<vmem>>, %arg5: memref<128x2xf32, #tpu.memory_space<vmem>>) attributes {dimension_semantics = [#tpu.dimension_semantics<parallel>], iteration_bounds = array<i64: 2>, scalar_prefetch = 0 : i64, scratch_operands = 0 : i64, tpu.core_type = #tpu.core_type<tc>, window_params = [{transform_indices = @transform_0, window_bounds = array<i64: 128, 64>}, {pipeline_mode = #tpu.pipeline_mode<synchronous>, transform_indices = @transform_1, window_bounds = array<i64: 64, 32>}, {pipeline_mode = #tpu.pipeline_mode<synchronous>, transform_indices = @transform_2, window_bounds = array<i64: 64, 2>}, {transform_indices = @transform_3, window_bounds = array<i64: 128, 32>}, {transform_indices = @transform_4, window_bounds = array<i64: 128, 2>}]} {
    %c0 = arith.constant 0 : index
    %c0_0 = arith.constant 0 : index
    %0 = vector.load %arg1[%c0, %c0_0] : memref<128x64xf32, #tpu.memory_space<vmem>>, vector<128x64xf32>
    %c0_1 = arith.constant 0 : index
    %c0_2 = arith.constant 0 : index
    %1 = vector.load %arg2[%c0_1, %c0_2] : memref<64x32xf32, #tpu.memory_space<vmem>>, vector<64x32xf32>
    %cst = arith.constant dense<0.000000e+00> : vector<128x32xf32>
    %2 = tpu.matmul %0, %1, %cst {dimension_numbers = #tpu.dot_dimension_numbers<[1], [0], [0], [1], [0, 0, 1, 1], [], []>} : vector<128x64xf32>, vector<64x32xf32>, vector<128x32xf32> -> vector<128x32xf32>
    %c0_3 = arith.constant 0 : index
    %c0_4 = arith.constant 0 : index
    %3 = vector.load %arg4[%c0_3, %c0_4] : memref<128x32xf32, #tpu.memory_space<vmem>>, vector<128x32xf32>
    tpu.vector_store %arg4[%c0_3, %c0_4], %2 {strides = array<i32>} : memref<128x32xf32, #tpu.memory_space<vmem>>, vector<128x32xf32>,
    %c0_5 = arith.constant 0 : index
    %c0_6 = arith.constant 0 : index
    %4 = vector.load %arg3[%c0_5, %c0_6] : memref<64x2xf32, #tpu.memory_space<vmem>>, vector<64x2xf32>
    %cst_7 = arith.constant dense<0.000000e+00> : vector<128x2xf32>
    %5 = tpu.matmul %0, %4, %cst_7 {dimension_numbers = #tpu.dot_dimension_numbers<[1], [0], [0], [1], [0, 0, 1, 1], [], []>} : vector<128x64xf32>, vector<64x2xf32>, vector<128x2xf32> -> vector<128x2xf32>
    %c0_8 = arith.constant 0 : index
    %c0_9 = arith.constant 0 : index
    %6 = vector.load %arg5[%c0_8, %c0_9] : memref<128x2xf32, #tpu.memory_space<vmem>>, vector<128x2xf32>
    tpu.vector_store %arg5[%c0_8, %c0_9], %5 {strides = array<i32>} : memref<128x2xf32, #tpu.memory_space<vmem>>, vector<128x2xf32>,
    return
  }
  func.func @transform_0(%arg0: i32) -> (i32, i32) {
    %c0_i32 = arith.constant 0 : i32
    %c0_i32_0 = arith.constant 0 : i32
    return %arg0, %c0_i32 : i32, i32
  }
  func.func @transform_1(%arg0: i32) -> (i32, i32) {
    %c0_i32 = arith.constant 0 : i32
    %c0_i32_0 = arith.constant 0 : i32
    %c0_i32_1 = arith.constant 0 : i32
    return %c0_i32, %c0_i32_0 : i32, i32
  }
  func.func @transform_2(%arg0: i32) -> (i32, i32) {
    %c0_i32 = arith.constant 0 : i32
    %c0_i32_0 = arith.constant 0 : i32
    %c0_i32_1 = arith.constant 0 : i32
    return %c0_i32, %c0_i32_0 : i32, i32
  }
  func.func @transform_3(%arg0: i32) -> (i32, i32) {
    %c0_i32 = arith.constant 0 : i32
    %c0_i32_0 = arith.constant 0 : i32
    return %arg0, %c0_i32 : i32, i32
  }
  func.func @transform_4(%arg0: i32) -> (i32, i32) {
    %c0_i32 = arith.constant 0 : i32
    %c0_i32_0 = arith.constant 0 : i32
    return %arg0, %c0_i32 : i32, i32
  }
}

module attributes {stable_mosaic.version = 11 : i64} {
  func.func @gat_attention_kernel(%arg0: i32, %arg1: memref<128x1xf32, #tpu.memory_space<vmem>>, %arg2: memref<1x256xf32, #tpu.memory_space<vmem>>, %arg3: memref<256x32xbf16, #tpu.memory_space<vmem>>, %arg4: memref<128x256xbf16, #tpu.memory_space<vmem>>, %arg5: memref<128x256xbf16, #tpu.memory_space<vmem>>, %arg6: memref<128x32xf32, #tpu.memory_space<vmem>>) attributes {dimension_semantics = [#tpu.dimension_semantics<parallel>], iteration_bounds = array<i64: 2>, scalar_prefetch = 0 : i64, scratch_operands = 0 : i64, tpu.core_type = #tpu.core_type<tc>, window_params = [{transform_indices = @transform_0, window_bounds = array<i64: 128, 1>}, {pipeline_mode = #tpu.pipeline_mode<synchronous>, transform_indices = @transform_1, window_bounds = array<i64: 1, 256>}, {pipeline_mode = #tpu.pipeline_mode<synchronous>, transform_indices = @transform_2, window_bounds = array<i64: 256, 32>}, {transform_indices = @transform_3, window_bounds = array<i64: 128, 256>}, {transform_indices = @transform_4, window_bounds = array<i64: 128, 256>}, {transform_indices = @transform_5, window_bounds = array<i64: 128, 32>}]} {
    %c0 = arith.constant 0 : index
    %c0_0 = arith.constant 0 : index
    %0 = vector.load %arg1[%c0, %c0_0] : memref<128x1xf32, #tpu.memory_space<vmem>>, vector<128x1xf32>
    %c0_1 = arith.constant 0 : index
    %c0_2 = arith.constant 0 : index
    %1 = vector.load %arg2[%c0_1, %c0_2] : memref<1x256xf32, #tpu.memory_space<vmem>>, vector<1x256xf32>
    %2 = vector.broadcast %0 : vector<128x1xf32> to vector<128x256xf32>
    %3 = vector.broadcast %1 : vector<1x256xf32> to vector<128x256xf32>
    %4 = arith.addf %2, %3 : vector<128x256xf32>
    %c0_3 = arith.constant 0 : index
    %c0_4 = arith.constant 0 : index
    %5 = vector.load %arg5[%c0_3, %c0_4] : memref<128x256xbf16, #tpu.memory_space<vmem>>, vector<128x256xbf16>
    %6 = arith.extf %5 : vector<128x256xbf16> to vector<128x256xf32>
    %7 = arith.mulf %4, %6 : vector<128x256xf32>
    %cst = arith.constant 2.000000e-01 : f32
    %8 = vector.broadcast %cst : f32 to vector<128x256xf32>
    %9 = arith.mulf %8, %7 : vector<128x256xf32>
    %10 = arith.maximumf %7, %9 : vector<128x256xf32>
    %c0_5 = arith.constant 0 : index
    %c0_6 = arith.constant 0 : index
    %11 = vector.load %arg4[%c0_5, %c0_6] : memref<128x256xbf16, #tpu.memory_space<vmem>>, vector<128x256xbf16>
    %cst_7 = arith.constant 0.000000e+00 : bf16
    %12 = vector.broadcast %cst_7 : bf16 to vector<128x256xbf16>
    %13 = arith.cmpf ogt, %11, %12 : vector<128x256xbf16>
    %cst_8 = arith.constant -9.000000e+15 : f32
    %14 = vector.broadcast %cst_8 : f32 to vector<128x256xf32>
    %15 = arith.select %13, %10, %14 : vector<128x256xi1>, vector<128x256xf32>
    %cst_9 = arith.constant dense<0xFF800000> : vector<128xf32>
    %16 = vector.multi_reduction <maximumf>, %15, %cst_9 [1] : vector<128x256xf32> to vector<128xf32>
    %17 = vector.shape_cast %16 : vector<128xf32> to vector<128x1xf32>
    %18 = vector.broadcast %17 : vector<128x1xf32> to vector<128x256xf32>
    %19 = arith.subf %15, %18 : vector<128x256xf32>
    %20 = math.exp %19 : vector<128x256xf32>
    %cst_10 = arith.constant dense<0.000000e+00> : vector<128xf32>
    %21 = vector.multi_reduction <add>, %20, %cst_10 [1] : vector<128x256xf32> to vector<128xf32>
    %22 = vector.shape_cast %21 : vector<128xf32> to vector<128x1xf32>
    %23 = tpu.reciprocal %22 {approx = true} : vector<128x1xf32> -> vector<128x1xf32>
    %24 = arith.truncf %20 : vector<128x256xf32> to vector<128x256xbf16>
    %c0_11 = arith.constant 0 : index
    %c0_12 = arith.constant 0 : index
    %25 = vector.load %arg3[%c0_11, %c0_12] : memref<256x32xbf16, #tpu.memory_space<vmem>>, vector<256x32xbf16>
    %cst_13 = arith.constant dense<0.000000e+00> : vector<128x32xf32>
    %26 = tpu.matmul %24, %25, %cst_13 {dimension_numbers = #tpu.dot_dimension_numbers<[1], [0], [0], [1], [0, 0, 1, 1], [], []>} : vector<128x256xbf16>, vector<256x32xbf16>, vector<128x32xf32> -> vector<128x32xf32>
    %27 = vector.broadcast %23 : vector<128x1xf32> to vector<128x32xf32>
    %28 = arith.mulf %26, %27 : vector<128x32xf32>
    %cst_14 = arith.constant 0.000000e+00 : f32
    %29 = vector.broadcast %cst_14 : f32 to vector<128x32xf32>
    %30 = arith.cmpf ogt, %28, %29 : vector<128x32xf32>
    %cst_15 = arith.constant 0.000000e+00 : f32
    %31 = vector.broadcast %cst_15 : f32 to vector<128x32xf32>
    %32 = arith.minimumf %28, %31 : vector<128x32xf32>
    %33 = math.exp %32 : vector<128x32xf32>
    %cst_16 = arith.constant 1.000000e+00 : f32
    %34 = vector.broadcast %cst_16 : f32 to vector<128x32xf32>
    %35 = arith.subf %33, %34 : vector<128x32xf32>
    %36 = arith.select %30, %28, %35 : vector<128x32xi1>, vector<128x32xf32>
    %37 = arith.mulf %36, %36 : vector<128x32xf32>
    %cst_17 = arith.constant dense<0.000000e+00> : vector<128xf32>
    %38 = vector.multi_reduction <add>, %37, %cst_17 [1] : vector<128x32xf32> to vector<128xf32>
    %39 = vector.shape_cast %38 : vector<128xf32> to vector<128x1xf32>
    %cst_18 = arith.constant 1.000000e-24 : f32
    %40 = vector.broadcast %cst_18 : f32 to vector<128x1xf32>
    %41 = arith.maximumf %39, %40 : vector<128x1xf32>
    %42 = math.rsqrt %41 : vector<128x1xf32>
    %43 = vector.broadcast %42 : vector<128x1xf32> to vector<128x32xf32>
    %44 = arith.mulf %36, %43 : vector<128x32xf32>
    %c0_19 = arith.constant 0 : index
    %c0_20 = arith.constant 0 : index
    %45 = vector.load %arg6[%c0_19, %c0_20] : memref<128x32xf32, #tpu.memory_space<vmem>>, vector<128x32xf32>
    tpu.vector_store %arg6[%c0_19, %c0_20], %44 {strides = array<i32>} : memref<128x32xf32, #tpu.memory_space<vmem>>, vector<128x32xf32>,
    return
  }
  func.func @transform_0(%arg0: i32) -> (i32, i32) {
    %c0_i32 = arith.constant 0 : i32
    %c0_i32_0 = arith.constant 0 : i32
    return %arg0, %c0_i32 : i32, i32
  }
  func.func @transform_1(%arg0: i32) -> (i32, i32) {
    %c0_i32 = arith.constant 0 : i32
    %c0_i32_0 = arith.constant 0 : i32
    %c0_i32_1 = arith.constant 0 : i32
    return %c0_i32, %c0_i32_0 : i32, i32
  }
  func.func @transform_2(%arg0: i32) -> (i32, i32) {
    %c0_i32 = arith.constant 0 : i32
    %c0_i32_0 = arith.constant 0 : i32
    %c0_i32_1 = arith.constant 0 : i32
    return %c0_i32, %c0_i32_0 : i32, i32
  }
  func.func @transform_3(%arg0: i32) -> (i32, i32) {
    %c0_i32 = arith.constant 0 : i32
    %c0_i32_0 = arith.constant 0 : i32
    return %arg0, %c0_i32 : i32, i32
  }
  func.func @transform_4(%arg0: i32) -> (i32, i32) {
    %c0_i32 = arith.constant 0 : i32
    %c0_i32_0 = arith.constant 0 : i32
    return %arg0, %c0_i32 : i32, i32
  }
  func.func @transform_5(%arg0: i32) -> (i32, i32) {
    %c0_i32 = arith.constant 0 : i32
    %c0_i32_0 = arith.constant 0 : i32
    return %arg0, %c0_i32 : i32, i32
  }
}

module attributes {stable_mosaic.version = 11 : i64} {
  func.func @decoder_q_kernel(%arg0: i32, %arg1: memref<128x64xf32, #tpu.memory_space<vmem>>, %arg2: memref<128x32xf32, #tpu.memory_space<vmem>>, %arg3: memref<64x256xbf16, #tpu.memory_space<vmem>>, %arg4: memref<32x256xbf16, #tpu.memory_space<vmem>>, %arg5: memref<32x8xf32, #tpu.memory_space<vmem>>, %arg6: memref<1x8xf32, #tpu.memory_space<vmem>>, %arg7: memref<128x256xf32, #tpu.memory_space<vmem>>, %arg8: memref<128x256xf32, #tpu.memory_space<vmem>>, %arg9: memref<128x8xf32, #tpu.memory_space<vmem>>) attributes {dimension_semantics = [#tpu.dimension_semantics<parallel>], iteration_bounds = array<i64: 2>, scalar_prefetch = 0 : i64, scratch_operands = 0 : i64, tpu.core_type = #tpu.core_type<tc>, window_params = [{transform_indices = @transform_0, window_bounds = array<i64: 128, 64>}, {transform_indices = @transform_1, window_bounds = array<i64: 128, 32>}, {pipeline_mode = #tpu.pipeline_mode<synchronous>, transform_indices = @transform_2, window_bounds = array<i64: 64, 256>}, {pipeline_mode = #tpu.pipeline_mode<synchronous>, transform_indices = @transform_3, window_bounds = array<i64: 32, 256>}, {pipeline_mode = #tpu.pipeline_mode<synchronous>, transform_indices = @transform_4, window_bounds = array<i64: 32, 8>}, {pipeline_mode = #tpu.pipeline_mode<synchronous>, transform_indices = @transform_5, window_bounds = array<i64: 1, 8>}, {transform_indices = @transform_6, window_bounds = array<i64: 128, 256>}, {transform_indices = @transform_7, window_bounds = array<i64: 128, 256>}, {transform_indices = @transform_8, window_bounds = array<i64: 128, 8>}]} {
    %c0 = arith.constant 0 : index
    %c0_0 = arith.constant 0 : index
    %0 = vector.load %arg1[%c0, %c0_0] : memref<128x64xf32, #tpu.memory_space<vmem>>, vector<128x64xf32>
    %c0_1 = arith.constant 0 : index
    %c0_2 = arith.constant 0 : index
    %1 = vector.load %arg2[%c0_1, %c0_2] : memref<128x32xf32, #tpu.memory_space<vmem>>, vector<128x32xf32>
    %2 = arith.truncf %0 : vector<128x64xf32> to vector<128x64xbf16>
    %c0_3 = arith.constant 0 : index
    %c0_4 = arith.constant 0 : index
    %3 = vector.load %arg3[%c0_3, %c0_4] : memref<64x256xbf16, #tpu.memory_space<vmem>>, vector<64x256xbf16>
    %cst = arith.constant dense<0.000000e+00> : vector<128x256xf32>
    %4 = tpu.matmul %2, %3, %cst {dimension_numbers = #tpu.dot_dimension_numbers<[1], [0], [0], [1], [0, 0, 1, 1], [], []>} : vector<128x64xbf16>, vector<64x256xbf16>, vector<128x256xf32> -> vector<128x256xf32>
    %5 = arith.negf %4 : vector<128x256xf32>
    %6 = math.exp %5 : vector<128x256xf32>
    %cst_5 = arith.constant 1.000000e+00 : f32
    %7 = vector.broadcast %cst_5 : f32 to vector<128x256xf32>
    %8 = arith.addf %7, %6 : vector<128x256xf32>
    %9 = arith.divf %7, %8 : vector<128x256xf32>
    %c0_6 = arith.constant 0 : index
    %c0_7 = arith.constant 0 : index
    %10 = vector.load %arg7[%c0_6, %c0_7] : memref<128x256xf32, #tpu.memory_space<vmem>>, vector<128x256xf32>
    tpu.vector_store %arg7[%c0_6, %c0_7], %9 {strides = array<i32>} : memref<128x256xf32, #tpu.memory_space<vmem>>, vector<128x256xf32>,
    %11 = arith.truncf %1 : vector<128x32xf32> to vector<128x32xbf16>
    %c0_8 = arith.constant 0 : index
    %c0_9 = arith.constant 0 : index
    %12 = vector.load %arg4[%c0_8, %c0_9] : memref<32x256xbf16, #tpu.memory_space<vmem>>, vector<32x256xbf16>
    %cst_10 = arith.constant dense<0.000000e+00> : vector<128x256xf32>
    %13 = tpu.matmul %11, %12, %cst_10 {dimension_numbers = #tpu.dot_dimension_numbers<[1], [0], [0], [1], [0, 0, 1, 1], [], []>} : vector<128x32xbf16>, vector<32x256xbf16>, vector<128x256xf32> -> vector<128x256xf32>
    %14 = arith.negf %13 : vector<128x256xf32>
    %15 = math.exp %14 : vector<128x256xf32>
    %cst_11 = arith.constant 1.000000e+00 : f32
    %16 = vector.broadcast %cst_11 : f32 to vector<128x256xf32>
    %17 = arith.addf %16, %15 : vector<128x256xf32>
    %18 = arith.divf %16, %17 : vector<128x256xf32>
    %c0_12 = arith.constant 0 : index
    %c0_13 = arith.constant 0 : index
    %19 = vector.load %arg8[%c0_12, %c0_13] : memref<128x256xf32, #tpu.memory_space<vmem>>, vector<128x256xf32>
    tpu.vector_store %arg8[%c0_12, %c0_13], %18 {strides = array<i32>} : memref<128x256xf32, #tpu.memory_space<vmem>>, vector<128x256xf32>,
    %20 = arith.mulf %1, %1 : vector<128x32xf32>
    %cst_14 = arith.constant dense<0.000000e+00> : vector<128xf32>
    %21 = vector.multi_reduction <add>, %20, %cst_14 [1] : vector<128x32xf32> to vector<128xf32>
    %22 = vector.shape_cast %21 : vector<128xf32> to vector<128x1xf32>
    %c0_15 = arith.constant 0 : index
    %c0_16 = arith.constant 0 : index
    %23 = vector.load %arg5[%c0_15, %c0_16] : memref<32x8xf32, #tpu.memory_space<vmem>>, vector<32x8xf32>
    %cst_17 = arith.constant dense<0.000000e+00> : vector<128x8xf32>
    %24 = tpu.matmul %1, %23, %cst_17 {dimension_numbers = #tpu.dot_dimension_numbers<[1], [0], [0], [1], [0, 0, 1, 1], [], []>} : vector<128x32xf32>, vector<32x8xf32>, vector<128x8xf32> -> vector<128x8xf32>
    %c0_18 = arith.constant 0 : index
    %c0_19 = arith.constant 0 : index
    %25 = vector.load %arg6[%c0_18, %c0_19] : memref<1x8xf32, #tpu.memory_space<vmem>>, vector<1x8xf32>
    %26 = vector.broadcast %22 : vector<128x1xf32> to vector<128x8xf32>
    %27 = vector.broadcast %25 : vector<1x8xf32> to vector<128x8xf32>
    %28 = arith.addf %26, %27 : vector<128x8xf32>
    %cst_20 = arith.constant 2.000000e+00 : f32
    %29 = vector.broadcast %cst_20 : f32 to vector<128x8xf32>
    %30 = arith.mulf %29, %24 : vector<128x8xf32>
    %31 = arith.subf %28, %30 : vector<128x8xf32>
    %cst_21 = arith.constant 0.000000e+00 : f32
    %32 = vector.broadcast %cst_21 : f32 to vector<128x8xf32>
    %33 = arith.maximumf %31, %32 : vector<128x8xf32>
    %cst_22 = arith.constant 1.000000e+00 : f32
    %34 = vector.broadcast %cst_22 : f32 to vector<128x8xf32>
    %35 = arith.divf %33, %34 : vector<128x8xf32>
    %cst_23 = arith.constant 1.000000e+00 : f32
    %36 = vector.broadcast %cst_23 : f32 to vector<128x8xf32>
    %37 = arith.addf %36, %35 : vector<128x8xf32>
    %cst_24 = arith.constant 1.000000e+00 : f32
    %38 = vector.broadcast %cst_24 : f32 to vector<128x8xf32>
    %39 = arith.divf %38, %37 : vector<128x8xf32>
    %cst_25 = arith.constant dense<0.000000e+00> : vector<128xf32>
    %40 = vector.multi_reduction <add>, %39, %cst_25 [1] : vector<128x8xf32> to vector<128xf32>
    %41 = vector.shape_cast %40 : vector<128xf32> to vector<128x1xf32>
    %42 = vector.broadcast %41 : vector<128x1xf32> to vector<128x8xf32>
    %43 = arith.divf %39, %42 : vector<128x8xf32>
    %c0_26 = arith.constant 0 : index
    %c0_27 = arith.constant 0 : index
    %44 = vector.load %arg9[%c0_26, %c0_27] : memref<128x8xf32, #tpu.memory_space<vmem>>, vector<128x8xf32>
    tpu.vector_store %arg9[%c0_26, %c0_27], %43 {strides = array<i32>} : memref<128x8xf32, #tpu.memory_space<vmem>>, vector<128x8xf32>,
    return
  }
  func.func @transform_0(%arg0: i32) -> (i32, i32) {
    %c0_i32 = arith.constant 0 : i32
    %c0_i32_0 = arith.constant 0 : i32
    return %arg0, %c0_i32 : i32, i32
  }
  func.func @transform_1(%arg0: i32) -> (i32, i32) {
    %c0_i32 = arith.constant 0 : i32
    %c0_i32_0 = arith.constant 0 : i32
    return %arg0, %c0_i32 : i32, i32
  }
  func.func @transform_2(%arg0: i32) -> (i32, i32) {
    %c0_i32 = arith.constant 0 : i32
    %c0_i32_0 = arith.constant 0 : i32
    %c0_i32_1 = arith.constant 0 : i32
    return %c0_i32, %c0_i32_0 : i32, i32
  }
  func.func @transform_3(%arg0: i32) -> (i32, i32) {
    %c0_i32 = arith.constant 0 : i32
    %c0_i32_0 = arith.constant 0 : i32
    %c0_i32_1 = arith.constant 0 : i32
    return %c0_i32, %c0_i32_0 : i32, i32
  }
  func.func @transform_4(%arg0: i32) -> (i32, i32) {
    %c0_i32 = arith.constant 0 : i32
    %c0_i32_0 = arith.constant 0 : i32
    %c0_i32_1 = arith.constant 0 : i32
    return %c0_i32, %c0_i32_0 : i32, i32
  }
  func.func @transform_5(%arg0: i32) -> (i32, i32) {
    %c0_i32 = arith.constant 0 : i32
    %c0_i32_0 = arith.constant 0 : i32
    %c0_i32_1 = arith.constant 0 : i32
    return %c0_i32, %c0_i32_0 : i32, i32
  }
  func.func @transform_6(%arg0: i32) -> (i32, i32) {
    %c0_i32 = arith.constant 0 : i32
    %c0_i32_0 = arith.constant 0 : i32
    return %arg0, %c0_i32 : i32, i32
  }
  func.func @transform_7(%arg0: i32) -> (i32, i32) {
    %c0_i32 = arith.constant 0 : i32
    %c0_i32_0 = arith.constant 0 : i32
    return %arg0, %c0_i32 : i32, i32
  }
  func.func @transform_8(%arg0: i32) -> (i32, i32) {
    %c0_i32 = arith.constant 0 : i32
    %c0_i32_0 = arith.constant 0 : i32
    return %arg0, %c0_i32 : i32, i32
  }
}

</mosaic_0001>

<bundles_post_ra>
// kernel: daegc_forward.7
= control target key start
LH: loop header
LB: loop body
LE: loop exit
PB: predicated region body
PF: predicated region fallthrough
CT: control target
= control target key end

     0   :  { %s956_s15 = smov 0   ;;  %s1147_s0 = inlined_call_operand.vmem [shape: f32[256,64], index: 0, kind: input, shape index: {}]   ;;  %s1148_s1 = inlined_call_operand.vmem [shape: f32[64,32], index: 1, kind: input, shape index: {}]   ;;  %s1149_s2 = inlined_call_operand.vmem [shape: f32[64,2], index: 2, kind: input, shape index: {}]   ;;  %s1150_s3 = inlined_call_operand.vmem [shape: f32[256,32], index: 3, kind: output, shape index: {0}]   ;;  %s1151_s4 = inlined_call_operand.vmem [shape: f32[256,2], index: 4, kind: output, shape index: {1}]  }
   0x1 LB: > { %s710_s16 = sadd.s32 4294967295, %s929_s15   ;;  %p714_p0 = scmp.ge.s32.totalorder %s929_s15, 1  ;;  %s929_s15 = sphi %s956_s15, %s15_s15  }
   0x2   : > { %p166_p1 = scmp.lt.s32.totalorder %s929_s15, 3 }
   0x4   : > { %p167_p2 = pnand %p714_p0, %p166_p1 }
   0x5   : > { %v231_v0 = vld [vmem:[%s1148_s1] sm:$0xff] (!%p167_p2)  ;;  %v232_v1 = vld [vmem:[%s1148_s1 + $0x8] sm:$0xff] (!%p167_p2)  ;;  %s715_s23 = sshll.u32 (!%p167_p2), %s710_s16, 4  ;;  %v233_v5 = vld [vmem:[%s1148_s1 + $0x10] sm:$0xff] (!%p167_p2)  ;;  %vm239_vm0 = vcmask (!%p167_p2), 523264   ;;  %vm433_vm1 = vcmask (!%p167_p2), 261120  }
   0x6   : > { %170 = sbr.rel (%p167_p2) target bundleno = 268 (0x10c), region = 32  ;;  %v450_v2 = vld [vmem:[%s1149_s2] sm:$0xff] (!%p167_p2)  ;;  %v883_v3 = vpack.c.bf16 (!%p167_p2), %v232_v1, %v231_v0  ;;  %v451_v4 = vld [vmem:[%s1149_s2 + $0x8] sm:$0xff] (!%p167_p2)  ;;  %v234_v6 = vld [vmem:[%s1148_s1 + $0x18] sm:$0xff] (!%p167_p2)  ;;  %p198_p3 = scmp.lt.s32.totalorder (!%p167_p2), %s715_s23, 31  ;;  %vm603_vm2 = vcmask (!%p167_p2), 15360  }
   0x7   : > { %v899_v7 = vpack.c.bf16 (!%p167_p2), %v451_v4, %v450_v2  ;;  %v887_v8 = vpack.c.bf16 (!%p167_p2), %v234_v6, %v233_v5  ;;  %v452_v9 = vld [vmem:[%s1149_s2 + $0x10] sm:$0xff] (!%p167_p2)  ;;  %v453_v10 = vld [vmem:[%s1149_s2 + $0x18] sm:$0xff] (!%p167_p2)  ;;  %v235_v11 = vld [vmem:[%s1148_s1 + $0x20] sm:$0xff] (!%p167_p2) }
   0x8   : > { %884 = vmatprep.subr.bf16.mxu0 (!%p167_p2), %v883_v3  ;;  %v903_v12 = vpack.c.bf16 (!%p167_p2), %v453_v10, %v452_v9  ;;  %v236_v13 = vld [vmem:[%s1148_s1 + $0x28] sm:$0xff] (!%p167_p2)  ;;  %v454_v14 = vld [vmem:[%s1149_s2 + $0x20] sm:$0xff] (!%p167_p2)  ;;  %v237_v18 = vld [vmem:[%s1148_s1 + $0x30] sm:$0xff] (!%p167_p2) }
   0x9   : > { %v455_v15 = vld [vmem:[%s1149_s2 + $0x28] sm:$0xff] (!%p167_p2)  ;;  %900 = vmatprep.subr.bf16.mxu1 (!%p167_p2), %v899_v7  ;;  %886 = vmatpush3.bf16.msra.mxu0 (!%p167_p2), %v883_v3  ;;  %v891_v16 = vpack.c.bf16 (!%p167_p2), %v236_v13, %v235_v11  ;;  %v238_v19 = vld [vmem:[%s1148_s1 + $0x38] sm:$0xff] (!%p167_p2)  ;;  %v456_v20 = vld [vmem:[%s1149_s2 + $0x30] sm:$0xff] (!%p167_p2) }
   0xa   : > { %902 = vmatpush3.bf16.msra.mxu1 (!%p167_p2), %v899_v7  ;;  %888 = vmatprep.subr.bf16.mxu0 (!%p167_p2), %v887_v8  ;;  %v907_v17 = vpack.c.bf16 (!%p167_p2), %v455_v15, %v454_v14  ;;  %v457_v21 = vld [vmem:[%s1149_s2 + $0x38] sm:$0xff] (!%p167_p2)  ;;  %v895_v23 = vpack.c.bf16 (!%p167_p2), %v238_v19, %v237_v18 }
   0xb   : > { %904 = vmatprep.subr.bf16.mxu1 (!%p167_p2), %v903_v12  ;;  %v911_v24 = vpack.c.bf16 (!%p167_p2), %v457_v21, %v456_v20 }
   0xd   : > { %s1153_s23 = smov (!%p198_p3, %s715_s23), 31  ;;  %890 = vmatpush3.bf16.msra.mxu0 %v887_v8 }
   0xe   : > { %s1000_s17 = sshll.u32 %s1153_s23, 3  ;;  %906 = vmatpush3.bf16.msra.mxu1 %v903_v12  ;;  %892 = vmatprep.subr.bf16.mxu0 %v891_v16 }
   0xf   : > { %s1012_s25 = scalar_lea.vmem %s1147_s0, %s1000_s17  ;;  %908 = vmatprep.subr.bf16.mxu1 %v907_v17  ;;  %s1072_s5 = scalar_lea.vmem %s1150_s3, %s1000_s17 }
  0x10   : > { %v215_v22 = vld [vmem:[%s1012_s25] sm:$0xff]  ;;  %v216_v25 = vld [vmem:[%s1012_s25 + $0x8] sm:$0xff]  ;;  %v217_v26 = vld [vmem:[%s1012_s25 + $0x10] sm:$0xff]  ;;  %s1078_s8 = scalar_lea.vmem %s1151_s4, %s1000_s17 }
  0x11   : > { %819 = vmatprep.mubr.msk.f32.mxu0 %vm239_vm0, %v215_v22  ;;  %859 = vmatprep.mubr.msk.f32.mxu1 %vm239_vm0, %v215_v22  ;;  %v218_v27 = vld [vmem:[%s1012_s25 + $0x18] sm:$0xff]  ;;  %v219_v28 = vld [vmem:[%s1012_s25 + $0x20] sm:$0xff]  ;;  %v220_v29 = vld [vmem:[%s1012_s25 + $0x28] sm:$0xff] }
  0x12   : > { %894 = vmatpush3.bf16.msra.mxu0 %v891_v16  ;;  %910 = vmatpush3.bf16.msra.mxu1 %v907_v17  ;;  %v221_v30 = vld [vmem:[%s1012_s25 + $0x30] sm:$0xff]  ;;  %v222_v31 = vld [vmem:[%s1012_s25 + $0x38] sm:$0xff]  ;;  %v223_v32 = vld [vmem:[%s1012_s25 + $0x40] sm:$0xff] }
  0x13   : > { %896 = vmatprep.subr.bf16.mxu0 %v895_v23  ;;  %912 = vmatprep.subr.bf16.mxu1 %v911_v24  ;;  %v224_v33 = vld [vmem:[%s1012_s25 + $0x48] sm:$0xff]  ;;  %v225_v34 = vld [vmem:[%s1012_s25 + $0x50] sm:$0xff]  ;;  %v226_v35 = vld [vmem:[%s1012_s25 + $0x58] sm:$0xff] }
  0x14   : > { %v227_v36 = vld [vmem:[%s1012_s25 + $0x60] sm:$0xff]  ;;  %v228_v37 = vld [vmem:[%s1012_s25 + $0x68] sm:$0xff]  ;;  %v229_v38 = vld [vmem:[%s1012_s25 + $0x70] sm:$0xff] }
  0x15   : > { %v230_v39 = vld [vmem:[%s1012_s25 + $0x78] sm:$0xff] }
  0x16   : > { %898 = vmatpush3.bf16.msra.mxu0 %v895_v23  ;;  %914 = vmatpush3.bf16.msra.mxu1 %v911_v24 }
  0x19   : > { %820 = vmatmul.mubr.msk.f32.vlgmr.msra.gmra.mrb[0].mxu0 %vm239_vm0, %v216_v25  ;;  %860 = vmatmul.mubr.msk.f32.vlgmr.msra.gmra.mrb[0].mxu1 %vm239_vm0, %v216_v25 }
  0x1a   : > { %822 = vmatprep.mubr.msk.f32.mxu0 %vm239_vm0, %v217_v26  ;;  %862 = vmatprep.mubr.msk.f32.mxu1 %vm239_vm0, %v217_v26 }
  0x1d   : > { %823 = vmatmul.mubr.msk.f32.gmra.mrb[2].mxu0 %vm239_vm0, %v218_v27  ;;  %863 = vmatmul.mubr.msk.f32.gmra.mrb[2].mxu1 %vm239_vm0, %v218_v27 }
  0x1e   : > { %825 = vmatprep.mubr.msk.f32.mxu0 %vm239_vm0, %v219_v28  ;;  %865 = vmatprep.mubr.msk.f32.mxu1 %vm239_vm0, %v219_v28 }
  0x21   : > { %826 = vmatmul.mubr.msk.f32.gmra.mrb[4].mxu0 %vm239_vm0, %v220_v29  ;;  %866 = vmatmul.mubr.msk.f32.gmra.mrb[4].mxu1 %vm239_vm0, %v220_v29 }
  0x22   : > { %828 = vmatprep.mubr.msk.f32.mxu0 %vm239_vm0, %v221_v30  ;;  %868 = vmatprep.mubr.msk.f32.mxu1 %vm239_vm0, %v221_v30 }
  0x25   : > { %829 = vmatmul.mubr.msk.f32.gmra.mrb[6].mxu0 %vm239_vm0, %v222_v31  ;;  %869 = vmatmul.mubr.msk.f32.gmra.mrb[6].mxu1 %vm239_vm0, %v222_v31 }
  0x26   : > { %831 = vmatprep.mubr.msk.f32.mxu0 %vm239_vm0, %v223_v32  ;;  %871 = vmatprep.mubr.msk.f32.mxu1 %vm239_vm0, %v223_v32 }
  0x29   : > { %832 = vmatmul.mubr.msk.f32.gmra.mrb[8].mxu0 %vm239_vm0, %v224_v33  ;;  %872 = vmatmul.mubr.msk.f32.gmra.mrb[8].mxu1 %vm239_vm0, %v224_v33 }
  0x2a   : > { %834 = vmatprep.mubr.msk.f32.mxu0 %vm239_vm0, %v225_v34  ;;  %874 = vmatprep.mubr.msk.f32.mxu1 %vm239_vm0, %v225_v34 }
  0x2d   : > { %835 = vmatmul.mubr.msk.f32.gmra.mrb[10].mxu0 %vm239_vm0, %v226_v35  ;;  %875 = vmatmul.mubr.msk.f32.gmra.mrb[10].mxu1 %vm239_vm0, %v226_v35 }
  0x2e   : > { %837 = vmatprep.mubr.msk.f32.mxu0 %vm239_vm0, %v227_v36  ;;  %877 = vmatprep.mubr.msk.f32.mxu1 %vm239_vm0, %v227_v36 }
  0x31   : > { %838 = vmatmul.mubr.msk.f32.gmra.mrb[12].mxu0 %vm239_vm0, %v228_v37  ;;  %878 = vmatmul.mubr.msk.f32.gmra.mrb[12].mxu1 %vm239_vm0, %v228_v37 }
  0x32   : > { %840 = vmatprep.mubr.msk.f32.mxu0 %vm239_vm0, %v229_v38  ;;  %880 = vmatprep.mubr.msk.f32.mxu1 %vm239_vm0, %v229_v38 }
  0x35   : > { %841 = vmatmul.mubr.msk.f32.gmra.mrb[14].mxu0 %vm239_vm0, %v230_v39  ;;  %881 = vmatmul.mubr.msk.f32.gmra.mrb[14].mxu1 %vm239_vm0, %v230_v39 }
  0xec   : > { %v821_v40 = vpop.f32.mrb[0].mxu0  ;;  %v861_v41 = vpop.f32.mrb[0].mxu1 }
  0xed   : > { %435 = vst.msk [vmem:[%s1072_s5 + $0x8] sm:$0xff] %vm433_vm1, %v821_v40  ;;  %v354_v42 = vpop.f32.mrb[1].mxu0  ;;  %v524_v43 = vpop.f32.mrb[1].mxu1 }
  0xee   : > { %605 = vst.msk [vmem:[%s1078_s8 + $0x8] sm:$0xff] %vm603_vm2, %v861_v41  ;;  %604 = vst.msk [vmem:[%s1078_s8] sm:$0xff] %vm603_vm2, %v524_v43 }
  0xef   : > { %434 = vst.msk [vmem:[%s1072_s5] sm:$0xff] %vm433_vm1, %v354_v42 }
  0xf0   : > { %v824_v44 = vpop.f32.mrb[2].mxu0  ;;  %v864_v45 = vpop.f32.mrb[2].mxu1 }
  0xf1   : > { %437 = vst.msk [vmem:[%s1072_s5 + $0x18] sm:$0xff] %vm433_vm1, %v824_v44  ;;  %v364_v46 = vpop.f32.mrb[3].mxu0  ;;  %v534_v47 = vpop.f32.mrb[3].mxu1 }
  0xf2   : > { %607 = vst.msk [vmem:[%s1078_s8 + $0x18] sm:$0xff] %vm603_vm2, %v864_v45  ;;  %606 = vst.msk [vmem:[%s1078_s8 + $0x10] sm:$0xff] %vm603_vm2, %v534_v47 }
  0xf3   : > { %436 = vst.msk [vmem:[%s1072_s5 + $0x10] sm:$0xff] %vm433_vm1, %v364_v46 }
  0xf4   : > { %v827_v48 = vpop.f32.mrb[4].mxu0  ;;  %v867_v49 = vpop.f32.mrb[4].mxu1 }
  0xf5   : > { %439 = vst.msk [vmem:[%s1072_s5 + $0x28] sm:$0xff] %vm433_vm1, %v827_v48  ;;  %v374_v50 = vpop.f32.mrb[5].mxu0  ;;  %v544_v51 = vpop.f32.mrb[5].mxu1 }
  0xf6   : > { %609 = vst.msk [vmem:[%s1078_s8 + $0x28] sm:$0xff] %vm603_vm2, %v867_v49  ;;  %608 = vst.msk [vmem:[%s1078_s8 + $0x20] sm:$0xff] %vm603_vm2, %v544_v51 }
  0xf7   : > { %438 = vst.msk [vmem:[%s1072_s5 + $0x20] sm:$0xff] %vm433_vm1, %v374_v50 }
  0xf8   : > { %v830_v52 = vpop.f32.mrb[6].mxu0  ;;  %v870_v53 = vpop.f32.mrb[6].mxu1 }
  0xf9   : > { %441 = vst.msk [vmem:[%s1072_s5 + $0x38] sm:$0xff] %vm433_vm1, %v830_v52  ;;  %v384_v54 = vpop.f32.mrb[7].mxu0  ;;  %v554_v55 = vpop.f32.mrb[7].mxu1 }
  0xfa   : > { %611 = vst.msk [vmem:[%s1078_s8 + $0x38] sm:$0xff] %vm603_vm2, %v870_v53  ;;  %610 = vst.msk [vmem:[%s1078_s8 + $0x30] sm:$0xff] %vm603_vm2, %v554_v55 }
  0xfb   : > { %440 = vst.msk [vmem:[%s1072_s5 + $0x30] sm:$0xff] %vm433_vm1, %v384_v54 }
  0xfc   : > { %v833_v56 = vpop.f32.mrb[8].mxu0  ;;  %v873_v57 = vpop.f32.mrb[8].mxu1 }
  0xfd   : > { %443 = vst.msk [vmem:[%s1072_s5 + $0x48] sm:$0xff] %vm433_vm1, %v833_v56  ;;  %v394_v58 = vpop.f32.mrb[9].mxu0  ;;  %v564_v59 = vpop.f32.mrb[9].mxu1 }
  0xfe   : > { %613 = vst.msk [vmem:[%s1078_s8 + $0x48] sm:$0xff] %vm603_vm2, %v873_v57  ;;  %612 = vst.msk [vmem:[%s1078_s8 + $0x40] sm:$0xff] %vm603_vm2, %v564_v59 }
  0xff   : > { %442 = vst.msk [vmem:[%s1072_s5 + $0x40] sm:$0xff] %vm433_vm1, %v394_v58 }
 0x100   : > { %v836_v60 = vpop.f32.mrb[10].mxu0  ;;  %v876_v61 = vpop.f32.mrb[10].mxu1 }
 0x101   : > { %445 = vst.msk [vmem:[%s1072_s5 + $0x58] sm:$0xff] %vm433_vm1, %v836_v60  ;;  %v404_v62 = vpop.f32.mrb[11].mxu0  ;;  %v574_v63 = vpop.f32.mrb[11].mxu1 }
 0x102   : > { %615 = vst.msk [vmem:[%s1078_s8 + $0x58] sm:$0xff] %vm603_vm2, %v876_v61  ;;  %614 = vst.msk [vmem:[%s1078_s8 + $0x50] sm:$0xff] %vm603_vm2, %v574_v63 }
 0x103   : > { %444 = vst.msk [vmem:[%s1072_s5 + $0x50] sm:$0xff] %vm433_vm1, %v404_v62 }
 0x104   : > { %v839_v0 = vpop.f32.mrb[12].mxu0  ;;  %v879_v1 = vpop.f32.mrb[12].mxu1 }
 0x105   : > { %447 = vst.msk [vmem:[%s1072_s5 + $0x68] sm:$0xff] %vm433_vm1, %v839_v0  ;;  %v414_v2 = vpop.f32.mrb[13].mxu0  ;;  %v584_v3 = vpop.f32.mrb[13].mxu1 }
 0x106   : > { %617 = vst.msk [vmem:[%s1078_s8 + $0x68] sm:$0xff] %vm603_vm2, %v879_v1  ;;  %616 = vst.msk [vmem:[%s1078_s8 + $0x60] sm:$0xff] %vm603_vm2, %v584_v3 }
 0x107   : > { %446 = vst.msk [vmem:[%s1072_s5 + $0x60] sm:$0xff] %vm433_vm1, %v414_v2 }
 0x108   : > { %v842_v4 = vpop.f32.mrb[14].mxu0  ;;  %v882_v5 = vpop.f32.mrb[14].mxu1 }
 0x109   : > { %449 = vst.msk [vmem:[%s1072_s5 + $0x78] sm:$0xff] %vm433_vm1, %v842_v4  ;;  %v424_v6 = vpop.f32.mrb[15].mxu0  ;;  %v594_v7 = vpop.f32.mrb[15].mxu1 }
 0x10a   : > { %619 = vst.msk [vmem:[%s1078_s8 + $0x78] sm:$0xff] %vm603_vm2, %v882_v5  ;;  %618 = vst.msk [vmem:[%s1078_s8 + $0x70] sm:$0xff] %vm603_vm2, %v594_v7 }
 0x10b   : > { %448 = vst.msk [vmem:[%s1072_s5 + $0x70] sm:$0xff] %vm433_vm1, %v424_v6 }
 0x10c PF: > { %s15_s15 = sadd.s32 1, %s929_s15  }
 0x10d   : > { %p12_p4 = scmp.ge.s32.totalorder %s15_s15, 4  }
 0x10f   :  { %14 = sbr.rel (!%p12_p4) target bundleno = 1 (0x1), region = 74 }

// kernel: daegc_forward.5
= control target key start
LH: loop header
LB: loop body
LE: loop exit
PB: predicated region body
PF: predicated region fallthrough
CT: control target
= control target key end

     0   :  { %s955_s15 = smov 0   ;;  %s1146_s0 = inlined_call_operand.vmem [shape: f32[256,64], index: 0, kind: input, shape index: {}]   ;;  %s1147_s1 = inlined_call_operand.vmem [shape: f32[64,64], index: 1, kind: input, shape index: {}]   ;;  %s1148_s2 = inlined_call_operand.vmem [shape: f32[64,2], index: 2, kind: input, shape index: {}]   ;;  %s1149_s3 = inlined_call_operand.vmem [shape: f32[256,64], index: 3, kind: output, shape index: {0}]   ;;  %s1150_s4 = inlined_call_operand.vmem [shape: f32[256,2], index: 4, kind: output, shape index: {1}]  }
   0x1 LB: > { %s709_s16 = sadd.s32 4294967295, %s928_s15   ;;  %p713_p0 = scmp.ge.s32.totalorder %s928_s15, 1  ;;  %s928_s15 = sphi %s955_s15, %s15_s15  }
   0x2   : > { %p166_p1 = scmp.lt.s32.totalorder %s928_s15, 3 }
   0x4   : > { %p167_p2 = pnand %p713_p0, %p166_p1 }
   0x5   : > { %v231_v0 = vld [vmem:[%s1147_s1] sm:$0xff] (!%p167_p2)  ;;  %v232_v1 = vld [vmem:[%s1147_s1 + $0x8] sm:$0xff] (!%p167_p2)  ;;  %s714_s23 = sshll.u32 (!%p167_p2), %s709_s16, 4  ;;  %v233_v5 = vld [vmem:[%s1147_s1 + $0x10] sm:$0xff] (!%p167_p2)  ;;  %vm239_vm0 = vcmask (!%p167_p2), 523264   ;;  %vm602_vm1 = vcmask (!%p167_p2), 15360  }
   0x6   : > { %170 = sbr.rel (%p167_p2) target bundleno = 268 (0x10c), region = 32  ;;  %v449_v2 = vld [vmem:[%s1148_s2] sm:$0xff] (!%p167_p2)  ;;  %v882_v3 = vpack.c.bf16 (!%p167_p2), %v232_v1, %v231_v0  ;;  %v450_v4 = vld [vmem:[%s1148_s2 + $0x8] sm:$0xff] (!%p167_p2)  ;;  %v234_v6 = vld [vmem:[%s1147_s1 + $0x18] sm:$0xff] (!%p167_p2)  ;;  %p198_p3 = scmp.lt.s32.totalorder (!%p167_p2), %s714_s23, 31 }
   0x7   : > { %v898_v7 = vpack.c.bf16 (!%p167_p2), %v450_v4, %v449_v2  ;;  %v886_v8 = vpack.c.bf16 (!%p167_p2), %v234_v6, %v233_v5  ;;  %v451_v9 = vld [vmem:[%s1148_s2 + $0x10] sm:$0xff] (!%p167_p2)  ;;  %v452_v10 = vld [vmem:[%s1148_s2 + $0x18] sm:$0xff] (!%p167_p2)  ;;  %v235_v11 = vld [vmem:[%s1147_s1 + $0x20] sm:$0xff] (!%p167_p2) }
   0x8   : > { %883 = vmatprep.subr.bf16.mxu0 (!%p167_p2), %v882_v3  ;;  %v902_v12 = vpack.c.bf16 (!%p167_p2), %v452_v10, %v451_v9  ;;  %v236_v13 = vld [vmem:[%s1147_s1 + $0x28] sm:$0xff] (!%p167_p2)  ;;  %v453_v14 = vld [vmem:[%s1148_s2 + $0x20] sm:$0xff] (!%p167_p2)  ;;  %v237_v18 = vld [vmem:[%s1147_s1 + $0x30] sm:$0xff] (!%p167_p2) }
   0x9   : > { %v454_v15 = vld [vmem:[%s1148_s2 + $0x28] sm:$0xff] (!%p167_p2)  ;;  %899 = vmatprep.subr.bf16.mxu1 (!%p167_p2), %v898_v7  ;;  %885 = vmatpush3.bf16.msra.mxu0 (!%p167_p2), %v882_v3  ;;  %v890_v16 = vpack.c.bf16 (!%p167_p2), %v236_v13, %v235_v11  ;;  %v238_v19 = vld [vmem:[%s1147_s1 + $0x38] sm:$0xff] (!%p167_p2)  ;;  %v455_v20 = vld [vmem:[%s1148_s2 + $0x30] sm:$0xff] (!%p167_p2) }
   0xa   : > { %901 = vmatpush3.bf16.msra.mxu1 (!%p167_p2), %v898_v7  ;;  %887 = vmatprep.subr.bf16.mxu0 (!%p167_p2), %v886_v8  ;;  %v906_v17 = vpack.c.bf16 (!%p167_p2), %v454_v15, %v453_v14  ;;  %v456_v21 = vld [vmem:[%s1148_s2 + $0x38] sm:$0xff] (!%p167_p2)  ;;  %v894_v23 = vpack.c.bf16 (!%p167_p2), %v238_v19, %v237_v18 }
   0xb   : > { %903 = vmatprep.subr.bf16.mxu1 (!%p167_p2), %v902_v12  ;;  %v910_v24 = vpack.c.bf16 (!%p167_p2), %v456_v21, %v455_v20 }
   0xd   : > { %s1152_s23 = smov (!%p198_p3, %s714_s23), 31  ;;  %889 = vmatpush3.bf16.msra.mxu0 %v886_v8 }
   0xe   : > { %s999_s17 = sshll.u32 %s1152_s23, 3  ;;  %905 = vmatpush3.bf16.msra.mxu1 %v902_v12  ;;  %891 = vmatprep.subr.bf16.mxu0 %v890_v16 }
   0xf   : > { %s1011_s25 = scalar_lea.vmem %s1146_s0, %s999_s17  ;;  %907 = vmatprep.subr.bf16.mxu1 %v906_v17  ;;  %s1071_s5 = scalar_lea.vmem %s1149_s3, %s999_s17 }
  0x10   : > { %v215_v22 = vld [vmem:[%s1011_s25] sm:$0xff]  ;;  %v216_v25 = vld [vmem:[%s1011_s25 + $0x8] sm:$0xff]  ;;  %v217_v26 = vld [vmem:[%s1011_s25 + $0x10] sm:$0xff]  ;;  %s1077_s8 = scalar_lea.vmem %s1150_s4, %s999_s17 }
  0x11   : > { %818 = vmatprep.mubr.msk.f32.mxu0 %vm239_vm0, %v215_v22  ;;  %858 = vmatprep.mubr.msk.f32.mxu1 %vm239_vm0, %v215_v22  ;;  %v218_v27 = vld [vmem:[%s1011_s25 + $0x18] sm:$0xff]  ;;  %v219_v28 = vld [vmem:[%s1011_s25 + $0x20] sm:$0xff]  ;;  %v220_v29 = vld [vmem:[%s1011_s25 + $0x28] sm:$0xff] }
  0x12   : > { %893 = vmatpush3.bf16.msra.mxu0 %v890_v16  ;;  %909 = vmatpush3.bf16.msra.mxu1 %v906_v17  ;;  %v221_v30 = vld [vmem:[%s1011_s25 + $0x30] sm:$0xff]  ;;  %v222_v31 = vld [vmem:[%s1011_s25 + $0x38] sm:$0xff]  ;;  %v223_v32 = vld [vmem:[%s1011_s25 + $0x40] sm:$0xff] }
  0x13   : > { %895 = vmatprep.subr.bf16.mxu0 %v894_v23  ;;  %911 = vmatprep.subr.bf16.mxu1 %v910_v24  ;;  %v224_v33 = vld [vmem:[%s1011_s25 + $0x48] sm:$0xff]  ;;  %v225_v34 = vld [vmem:[%s1011_s25 + $0x50] sm:$0xff]  ;;  %v226_v35 = vld [vmem:[%s1011_s25 + $0x58] sm:$0xff] }
  0x14   : > { %v227_v36 = vld [vmem:[%s1011_s25 + $0x60] sm:$0xff]  ;;  %v228_v37 = vld [vmem:[%s1011_s25 + $0x68] sm:$0xff]  ;;  %v229_v38 = vld [vmem:[%s1011_s25 + $0x70] sm:$0xff] }
  0x15   : > { %v230_v39 = vld [vmem:[%s1011_s25 + $0x78] sm:$0xff] }
  0x16   : > { %897 = vmatpush3.bf16.msra.mxu0 %v894_v23  ;;  %913 = vmatpush3.bf16.msra.mxu1 %v910_v24 }
  0x19   : > { %819 = vmatmul.mubr.msk.f32.vlgmr.msra.gmra.mrb[0].mxu0 %vm239_vm0, %v216_v25  ;;  %859 = vmatmul.mubr.msk.f32.vlgmr.msra.gmra.mrb[0].mxu1 %vm239_vm0, %v216_v25 }
  0x1a   : > { %821 = vmatprep.mubr.msk.f32.mxu0 %vm239_vm0, %v217_v26  ;;  %861 = vmatprep.mubr.msk.f32.mxu1 %vm239_vm0, %v217_v26 }
  0x1d   : > { %822 = vmatmul.mubr.msk.f32.gmra.mrb[2].mxu0 %vm239_vm0, %v218_v27  ;;  %862 = vmatmul.mubr.msk.f32.gmra.mrb[2].mxu1 %vm239_vm0, %v218_v27 }
  0x1e   : > { %824 = vmatprep.mubr.msk.f32.mxu0 %vm239_vm0, %v219_v28  ;;  %864 = vmatprep.mubr.msk.f32.mxu1 %vm239_vm0, %v219_v28 }
  0x21   : > { %825 = vmatmul.mubr.msk.f32.gmra.mrb[4].mxu0 %vm239_vm0, %v220_v29  ;;  %865 = vmatmul.mubr.msk.f32.gmra.mrb[4].mxu1 %vm239_vm0, %v220_v29 }
  0x22   : > { %827 = vmatprep.mubr.msk.f32.mxu0 %vm239_vm0, %v221_v30  ;;  %867 = vmatprep.mubr.msk.f32.mxu1 %vm239_vm0, %v221_v30 }
  0x25   : > { %828 = vmatmul.mubr.msk.f32.gmra.mrb[6].mxu0 %vm239_vm0, %v222_v31  ;;  %868 = vmatmul.mubr.msk.f32.gmra.mrb[6].mxu1 %vm239_vm0, %v222_v31 }
  0x26   : > { %830 = vmatprep.mubr.msk.f32.mxu0 %vm239_vm0, %v223_v32  ;;  %870 = vmatprep.mubr.msk.f32.mxu1 %vm239_vm0, %v223_v32 }
  0x29   : > { %831 = vmatmul.mubr.msk.f32.gmra.mrb[8].mxu0 %vm239_vm0, %v224_v33  ;;  %871 = vmatmul.mubr.msk.f32.gmra.mrb[8].mxu1 %vm239_vm0, %v224_v33 }
  0x2a   : > { %833 = vmatprep.mubr.msk.f32.mxu0 %vm239_vm0, %v225_v34  ;;  %873 = vmatprep.mubr.msk.f32.mxu1 %vm239_vm0, %v225_v34 }
  0x2d   : > { %834 = vmatmul.mubr.msk.f32.gmra.mrb[10].mxu0 %vm239_vm0, %v226_v35  ;;  %874 = vmatmul.mubr.msk.f32.gmra.mrb[10].mxu1 %vm239_vm0, %v226_v35 }
  0x2e   : > { %836 = vmatprep.mubr.msk.f32.mxu0 %vm239_vm0, %v227_v36  ;;  %876 = vmatprep.mubr.msk.f32.mxu1 %vm239_vm0, %v227_v36 }
  0x31   : > { %837 = vmatmul.mubr.msk.f32.gmra.mrb[12].mxu0 %vm239_vm0, %v228_v37  ;;  %877 = vmatmul.mubr.msk.f32.gmra.mrb[12].mxu1 %vm239_vm0, %v228_v37 }
  0x32   : > { %839 = vmatprep.mubr.msk.f32.mxu0 %vm239_vm0, %v229_v38  ;;  %879 = vmatprep.mubr.msk.f32.mxu1 %vm239_vm0, %v229_v38 }
  0x35   : > { %840 = vmatmul.mubr.msk.f32.gmra.mrb[14].mxu0 %vm239_vm0, %v230_v39  ;;  %880 = vmatmul.mubr.msk.f32.gmra.mrb[14].mxu1 %vm239_vm0, %v230_v39 }
  0xec   : > { %v820_v40 = vpop.f32.mrb[0].mxu0  ;;  %v860_v41 = vpop.f32.mrb[0].mxu1 }
  0xed   : > { %434 = vst.msk [vmem:[%s1071_s5 + $0x8] sm:$0xff] %vm239_vm0, %v820_v40  ;;  %v354_v42 = vpop.f32.mrb[1].mxu0  ;;  %v523_v43 = vpop.f32.mrb[1].mxu1 }
  0xee   : > { %604 = vst.msk [vmem:[%s1077_s8 + $0x8] sm:$0xff] %vm602_vm1, %v860_v41  ;;  %603 = vst.msk [vmem:[%s1077_s8] sm:$0xff] %vm602_vm1, %v523_v43 }
  0xef   : > { %433 = vst.msk [vmem:[%s1071_s5] sm:$0xff] %vm239_vm0, %v354_v42 }
  0xf0   : > { %v823_v44 = vpop.f32.mrb[2].mxu0  ;;  %v863_v45 = vpop.f32.mrb[2].mxu1 }
  0xf1   : > { %436 = vst.msk [vmem:[%s1071_s5 + $0x18] sm:$0xff] %vm239_vm0, %v823_v44  ;;  %v364_v46 = vpop.f32.mrb[3].mxu0  ;;  %v533_v47 = vpop.f32.mrb[3].mxu1 }
  0xf2   : > { %606 = vst.msk [vmem:[%s1077_s8 + $0x18] sm:$0xff] %vm602_vm1, %v863_v45  ;;  %605 = vst.msk [vmem:[%s1077_s8 + $0x10] sm:$0xff] %vm602_vm1, %v533_v47 }
  0xf3   : > { %435 = vst.msk [vmem:[%s1071_s5 + $0x10] sm:$0xff] %vm239_vm0, %v364_v46 }
  0xf4   : > { %v826_v48 = vpop.f32.mrb[4].mxu0  ;;  %v866_v49 = vpop.f32.mrb[4].mxu1 }
  0xf5   : > { %438 = vst.msk [vmem:[%s1071_s5 + $0x28] sm:$0xff] %vm239_vm0, %v826_v48  ;;  %v374_v50 = vpop.f32.mrb[5].mxu0  ;;  %v543_v51 = vpop.f32.mrb[5].mxu1 }
  0xf6   : > { %608 = vst.msk [vmem:[%s1077_s8 + $0x28] sm:$0xff] %vm602_vm1, %v866_v49  ;;  %607 = vst.msk [vmem:[%s1077_s8 + $0x20] sm:$0xff] %vm602_vm1, %v543_v51 }
  0xf7   : > { %437 = vst.msk [vmem:[%s1071_s5 + $0x20] sm:$0xff] %vm239_vm0, %v374_v50 }
  0xf8   : > { %v829_v52 = vpop.f32.mrb[6].mxu0  ;;  %v869_v53 = vpop.f32.mrb[6].mxu1 }
  0xf9   : > { %440 = vst.msk [vmem:[%s1071_s5 + $0x38] sm:$0xff] %vm239_vm0, %v829_v52  ;;  %v384_v54 = vpop.f32.mrb[7].mxu0  ;;  %v553_v55 = vpop.f32.mrb[7].mxu1 }
  0xfa   : > { %610 = vst.msk [vmem:[%s1077_s8 + $0x38] sm:$0xff] %vm602_vm1, %v869_v53  ;;  %609 = vst.msk [vmem:[%s1077_s8 + $0x30] sm:$0xff] %vm602_vm1, %v553_v55 }
  0xfb   : > { %439 = vst.msk [vmem:[%s1071_s5 + $0x30] sm:$0xff] %vm239_vm0, %v384_v54 }
  0xfc   : > { %v832_v56 = vpop.f32.mrb[8].mxu0  ;;  %v872_v57 = vpop.f32.mrb[8].mxu1 }
  0xfd   : > { %442 = vst.msk [vmem:[%s1071_s5 + $0x48] sm:$0xff] %vm239_vm0, %v832_v56  ;;  %v394_v58 = vpop.f32.mrb[9].mxu0  ;;  %v563_v59 = vpop.f32.mrb[9].mxu1 }
  0xfe   : > { %612 = vst.msk [vmem:[%s1077_s8 + $0x48] sm:$0xff] %vm602_vm1, %v872_v57  ;;  %611 = vst.msk [vmem:[%s1077_s8 + $0x40] sm:$0xff] %vm602_vm1, %v563_v59 }
  0xff   : > { %441 = vst.msk [vmem:[%s1071_s5 + $0x40] sm:$0xff] %vm239_vm0, %v394_v58 }
 0x100   : > { %v835_v60 = vpop.f32.mrb[10].mxu0  ;;  %v875_v61 = vpop.f32.mrb[10].mxu1 }
 0x101   : > { %444 = vst.msk [vmem:[%s1071_s5 + $0x58] sm:$0xff] %vm239_vm0, %v835_v60  ;;  %v404_v62 = vpop.f32.mrb[11].mxu0  ;;  %v573_v63 = vpop.f32.mrb[11].mxu1 }
 0x102   : > { %614 = vst.msk [vmem:[%s1077_s8 + $0x58] sm:$0xff] %vm602_vm1, %v875_v61  ;;  %613 = vst.msk [vmem:[%s1077_s8 + $0x50] sm:$0xff] %vm602_vm1, %v573_v63 }
 0x103   : > { %443 = vst.msk [vmem:[%s1071_s5 + $0x50] sm:$0xff] %vm239_vm0, %v404_v62 }
 0x104   : > { %v838_v0 = vpop.f32.mrb[12].mxu0  ;;  %v878_v1 = vpop.f32.mrb[12].mxu1 }
 0x105   : > { %446 = vst.msk [vmem:[%s1071_s5 + $0x68] sm:$0xff] %vm239_vm0, %v838_v0  ;;  %v414_v2 = vpop.f32.mrb[13].mxu0  ;;  %v583_v3 = vpop.f32.mrb[13].mxu1 }
 0x106   : > { %616 = vst.msk [vmem:[%s1077_s8 + $0x68] sm:$0xff] %vm602_vm1, %v878_v1  ;;  %615 = vst.msk [vmem:[%s1077_s8 + $0x60] sm:$0xff] %vm602_vm1, %v583_v3 }
 0x107   : > { %445 = vst.msk [vmem:[%s1071_s5 + $0x60] sm:$0xff] %vm239_vm0, %v414_v2 }
 0x108   : > { %v841_v4 = vpop.f32.mrb[14].mxu0  ;;  %v881_v5 = vpop.f32.mrb[14].mxu1 }
 0x109   : > { %448 = vst.msk [vmem:[%s1071_s5 + $0x78] sm:$0xff] %vm239_vm0, %v841_v4  ;;  %v424_v6 = vpop.f32.mrb[15].mxu0  ;;  %v593_v7 = vpop.f32.mrb[15].mxu1 }
 0x10a   : > { %618 = vst.msk [vmem:[%s1077_s8 + $0x78] sm:$0xff] %vm602_vm1, %v881_v5  ;;  %617 = vst.msk [vmem:[%s1077_s8 + $0x70] sm:$0xff] %vm602_vm1, %v593_v7 }
 0x10b   : > { %447 = vst.msk [vmem:[%s1071_s5 + $0x70] sm:$0xff] %vm239_vm0, %v424_v6 }
 0x10c PF: > { %s15_s15 = sadd.s32 1, %s928_s15  }
 0x10d   : > { %p12_p4 = scmp.ge.s32.totalorder %s15_s15, 4  }
 0x10f   :  { %14 = sbr.rel (!%p12_p4) target bundleno = 1 (0x1), region = 74 }

// kernel: daegc_forward.6
= control target key start
LH: loop header
LB: loop body
LE: loop exit
PB: predicated region body
PF: predicated region fallthrough
CT: control target
= control target key end

     0   :  { %s1934_s21 = smov 0   ;;  %s3143_s0 = inlined_call_operand.vmem [shape: f32[256,1], index: 0, kind: input, shape index: {}]   ;;  %s3144_s1 = inlined_call_operand.vmem [shape: f32[1,256], index: 1, kind: input, shape index: {}]   ;;  %s3145_s2 = inlined_call_operand.vmem [shape: bf16[256,64], index: 2, kind: input, shape index: {}]   ;;  %s3146_s3 = inlined_call_operand.vmem [shape: bf16[256,256], index: 3, kind: input, shape index: {}]   ;;  %s3147_s4 = inlined_call_operand.vmem [shape: bf16[256,256], index: 4, kind: input, shape index: {}]   ;;  %s3148_s5 = inlined_call_operand.vmem [shape: f32[256,64], index: 5, kind: output, shape index: {0}]   ;;  %s3149_s6 = inlined_call_operand.vmem [shape: f32[256,64], index: 6, kind: output, shape index: {1}]  }
   0x1 LB: > { %s1570_s22 = sadd.s32 4294967295, %s1896_s21   ;;  %p1574_p0 = scmp.ge.s32.totalorder %s1896_s21, 1  ;;  %s1896_s21 = sphi %s1934_s21, %s17_s21  }
   0x2   : > { %p240_p1 = scmp.lt.s32.totalorder %s1896_s21, 3 }
   0x4   : > { %p241_p2 = pnand %p1574_p0, %p240_p1 }
   0x6   : > { %244 = sbr.rel (%p241_p2) target bundleno = 777 (0x309), region = 40 }
   0xd   : > { %s1575_s23 = sshll.u32 %s1570_s22, 4  ;;  %v1898_v0 = vmov 0   ;;  %v1714_v17 = vld [vmem:[%s3145_s2 + $0x40] sm:$0xff]   ;;  %v1716_v19 = vld [vmem:[%s3145_s2 + $0x48] sm:$0xff]   ;;  %v1718_v21 = vld [vmem:[%s3145_s2 + $0x50] sm:$0xff]   ;;  %v420_v23 = vlaneseq }
   0xe   : > { %1713 = vset.pattern.permute.xlu1 %v1898_v0  ;;  %1712 = vset.pattern.permute.xlu0 %v1898_v0  ;;  %p288_p3 = scmp.lt.s32.totalorder %s1575_s23, 31  ;;  %v1715_v18 = vld [vmem:[%s3145_s2] sm:$0xff]   ;;  %v1717_v20 = vld [vmem:[%s3145_s2 + $0x8] sm:$0xff]   ;;  %v1719_v22 = vld [vmem:[%s3145_s2 + $0x10] sm:$0xff]  }
   0xf   : > { %1623 = vmatprep.subr.bf16.mxu0 %v1714_v17  ;;  %1687 = vmatprep.subr.bf16.mxu1 %v1714_v17  ;;  %v421_v24 = vshrl.u32 %v420_v23, 7  ;;  %v338_v29 = vld [vmem:[%s3144_s1] sm:$0x3] }
  0x10   : > { %s3276_s23 = smov (!%p288_p3, %s1575_s23), 31  ;;  %1624 = vmatpush3.bf16.msra.mxu0 %v1715_v18  ;;  %1695 = vmatpush3.bf16.msra.mxu1 %v1715_v18 }
  0x11   : > { %s1944_s24 = sshll.u32 %s3276_s23, 3  ;;  %1625 = vmatprep.subr.bf16.mxu0 %v1716_v19  ;;  %1688 = vmatprep.subr.bf16.mxu1 %v1716_v19  ;;  %v422_v25 = vsub.s32 0, %v421_v24  ;;  %v426_v26 = vsub.s32 1, %v421_v24 }
  0x12   : > { %s291_s27 = scalar_lea.vmem %s3143_s0, %s1944_s24  ;;  %s1972_s18 = scalar_lea.vmem %s3146_s3, %s1944_s24 }
  0x13   : > { %v330_v1 = vld [vmem:[%s291_s27 + $0x40] sm:$0xff]  ;;  %v331_v3 = vld [vmem:[%s291_s27 + $0x48] sm:$0xff]  ;;  %v325_v5 = vld [vmem:[%s291_s27 + $0x18] sm:$0xff]  ;;  %s1978_s22 = scalar_lea.vmem %s3147_s4, %s1944_s24  ;;  %v1996_v35 = vrot.slane %v338_v29, %v422_v25  ;;  %v1998_v36 = vrot.slane %v338_v29, %v426_v26  ;;  %s2882_s26 = scalar_lea.vmem %s3148_s5, %s1944_s24 }
  0x14   : > { %v322_v2 = vld [vmem:[%s291_s27] sm:$0xff]  ;;  %381 = vperm.xlu1 %1713, %v330_v1   ;;  %v323_v4 = vld [vmem:[%s291_s27 + $0x8] sm:$0xff]  ;;  %v324_v6 = vld [vmem:[%s291_s27 + $0x10] sm:$0xff]  ;;  %1626 = vmatpush3.bf16.msra.mxu0 %v1717_v20  ;;  %s3090_s29 = scalar_lea.vmem %s3149_s6, %s1944_s24 }
  0x15   : > { %341 = vperm.xlu0 %1712, %v322_v2   ;;  %v333_v7 = vld [vmem:[%s291_s27 + $0x58] sm:$0xff]  ;;  %v332_v8 = vld [vmem:[%s291_s27 + $0x50] sm:$0xff]  ;;  %v327_v9 = vld [vmem:[%s291_s27 + $0x28] sm:$0xff]  ;;  %1696 = vmatpush3.bf16.msra.mxu1 %v1717_v20 }
  0x16   : > { %v326_v10 = vld [vmem:[%s291_s27 + $0x20] sm:$0xff]  ;;  %v335_v11 = vld [vmem:[%s291_s27 + $0x68] sm:$0xff]  ;;  %v329_v13 = vld [vmem:[%s291_s27 + $0x38] sm:$0xff]  ;;  %1627 = vmatprep.subr.bf16.mxu0 %v1718_v21  ;;  %1689 = vmatprep.subr.bf16.mxu1 %v1718_v21 }
  0x17   : > { %v334_v12 = vld [vmem:[%s291_s27 + $0x60] sm:$0xff]  ;;  %v328_v14 = vld [vmem:[%s291_s27 + $0x30] sm:$0xff]  ;;  %v337_v15 = vld [vmem:[%s291_s27 + $0x78] sm:$0xff] }
  0x18   : > { %386 = vperm.xlu1 %1713, %v331_v3   ;;  %v336_v16 = vld [vmem:[%s291_s27 + $0x70] sm:$0xff]  ;;  %1628 = vmatpush3.bf16.msra.mxu0 %v1719_v22  ;;  %v606_v27 = vld [vmem:[%s1972_s18] sm:$0xff]  ;;  %v1992_v32 = vld [vmem:[%s1978_s22 + $0x48] sm:$0xff] }
  0x19   : > { %346 = vperm.xlu0 %1712, %v323_v4   ;;  %1697 = vmatpush3.bf16.msra.mxu1 %v1719_v22  ;;  %v614_v28 = vld [vmem:[%s1972_s18 + $0x40] sm:$0xff]  ;;  %v607_v33 = vld [vmem:[%s1972_s18 + $0x8] sm:$0xff]  ;;  %vm622_vm0 = vcmp.gt.bf16.partialorder %v606_v27, 0  ;;  %v2006_v40 = vld [vmem:[%s1978_s22 + $0x18] sm:$0xff]  ;;  %v496_v43 = vunpack.c.l.bf16 %v1992_v32  ;;  %v497_v46 = vunpack.c.h.bf16 %v1992_v32 }
  0x1a   : > { %v1986_v30 = vld [vmem:[%s1978_s22 + $0x40] sm:$0xff]  ;;  %vm630_vm1 = vcmp.gt.bf16.partialorder %v614_v28, 0  ;;  %v615_v34 = vld [vmem:[%s1972_s18 + $0x48] sm:$0xff]  ;;  %v2012_v44 = vld [vmem:[%s1978_s22 + $0x10] sm:$0xff]  ;;  %vm623_vm2 = vcmp.gt.bf16.partialorder %v607_v33, 0  ;;  %v2018_v47 = vsel %vm622_vm0, 65537, %v1898_v0  ;;  %v484_v51 = vunpack.c.l.bf16 %v2006_v40 }
  0x1b   : > { %v1989_v31 = vld [vmem:[%s1978_s22] sm:$0xff]  ;;  %v494_v37 = vunpack.c.l.bf16 %v1986_v30  ;;  %v495_v38 = vunpack.c.h.bf16 %v1986_v30  ;;  %v2003_v39 = vld [vmem:[%s1978_s22 + $0x8] sm:$0xff]  ;;  %v608_v45 = vld [vmem:[%s1972_s18 + $0x10] sm:$0xff]  ;;  %v2022_v48 = vsel %vm630_vm1, 65537, %v1898_v0  ;;  %vm631_vm3 = vcmp.gt.bf16.partialorder %v615_v34, 0 }
  0x1c   : > { %356 = vperm.xlu1 %1713, %v325_v5   ;;  %v478_v41 = vunpack.c.l.bf16 %v1989_v31  ;;  %v479_v42 = vunpack.c.h.bf16 %v1989_v31  ;;  %v480_v49 = vunpack.c.l.bf16 %v2003_v39  ;;  %v481_v50 = vunpack.c.h.bf16 %v2003_v39  ;;  %v2029_v53 = vld [vmem:[%s1978_s22 + $0x58] sm:$0xff]  ;;  %v2035_v57 = vld [vmem:[%s1978_s22 + $0x50] sm:$0xff]  ;;  %v2050_v3 = vld [vmem:[%s1978_s22 + $0x28] sm:$0xff] }
  0x1d   : > { %351 = vperm.xlu0 %1712, %v324_v6   ;;  %v485_v52 = vunpack.c.h.bf16 %v2006_v40  ;;  %v609_v54 = vld [vmem:[%s1972_s18 + $0x18] sm:$0xff]  ;;  %v482_v55 = vunpack.c.l.bf16 %v2012_v44  ;;  %v2038_v58 = vsel %vm623_vm2, 65537, %v1898_v0  ;;  %vm624_vm4 = vcmp.gt.bf16.partialorder %v608_v45, 0  ;;  %v616_v63 = vld [vmem:[%s1972_s18 + $0x50] sm:$0xff]  ;;  %v2074_v18 = vld [vmem:[%s1978_s22 + $0x60] sm:$0xff] }
  0x1e   : > { %v654_v59 = vunpack.c.l.b16 %v2018_v47  ;;  %v655_v60 = vunpack.c.h.b16 %v2018_v47  ;;  %v670_v61 = vunpack.c.l.b16 %v2022_v48  ;;  %v2044_v62 = vsel %vm631_vm3, 65537, %v1898_v0  ;;  %v617_v5 = vld [vmem:[%s1972_s18 + $0x58] sm:$0xff]  ;;  %v611_v24 = vld [vmem:[%s1972_s18 + $0x28] sm:$0xff]  ;;  %v618_v29 = vld [vmem:[%s1972_s18 + $0x60] sm:$0xff] }
  0x1f   : > { %v671_v4 = vunpack.c.h.b16 %v2022_v48  ;;  %vm625_vm5 = vcmp.gt.bf16.partialorder %v609_v54, 0  ;;  %vm632_vm6 = vcmp.gt.bf16.partialorder %v616_v63, 0  ;;  %vm633_vm7 = vcmp.gt.bf16.partialorder %v617_v5, 0  ;;  %v2084_v23 = vld [vmem:[%s1978_s22 + $0x38] sm:$0xff]  ;;  %v2098_v54 = vld [vmem:[%s1978_s22 + $0x30] sm:$0xff] }
  0x20   : > { %396 = vperm.xlu1 %1713, %v333_v7   ;;  %v656_v7 = vunpack.c.l.b16 %v2038_v58  ;;  %v2078_v19 = vsel %vm625_vm5, 65537, %v1898_v0  ;;  %v2091_v28 = vsel %vm632_vm6, 65537, %v1898_v0  ;;  %v2102_v63 = vsel %vm633_vm7, 65537, %v1898_v0  ;;  %v2114_v17 = vld [vmem:[%s1978_s22 + $0x78] sm:$0xff]  ;;  %v2127_v2 = vld [vmem:[%s1978_s22 + $0x70] sm:$0xff] }
  0x21   : > { %391 = vperm.xlu0 %1712, %v332_v8   ;;  %v657_v8 = vunpack.c.h.b16 %v2038_v58  ;;  %vm627_vm9 = vcmp.gt.bf16.partialorder %v611_v24, 0  ;;  %vm634_vm10 = vcmp.gt.bf16.partialorder %v618_v29, 0  ;;  %v613_v45 = vld [vmem:[%s1972_s18 + $0x38] sm:$0xff]  ;;  %vm2155_vm0 = vcmp.ne.s32.totalorder %v654_v59, 0 }
  0x22   : > { %v621_v6 = vld [vmem:[%s1972_s18 + $0x78] sm:$0xff]  ;;  %v2131_v29 = vsel %vm627_vm9, 65537, %v1898_v0  ;;  %v2135_v25 = vsel %vm634_vm10, 65537, %v1898_v0  ;;  %vm629_vm13 = vcmp.gt.bf16.partialorder %v613_v45, 0  ;;  %vm2173_vm1 = vcmp.ne.s32.totalorder %v655_v60, 0 }
  0x23   : > { %vm637_vm15 = vcmp.gt.bf16.partialorder %v621_v6, 0  ;;  %vm2179_vm2 = vcmp.ne.s32.totalorder %v670_v61, 0  ;;  %vm2185_vm3 = vcmp.ne.s32.totalorder %v671_v4, 0  ;;  %vm2229_vm5 = vcmp.ne.s32.totalorder %v657_v8, 0 }
  0x24   : > { %366 = vperm.xlu1 %1713, %v327_v9   ;;  %v2058_v9 = vld [vmem:[%s1978_s22 + $0x20] sm:$0xff]  ;;  %v2165_v26 = vsel %vm637_vm15, 65537, %v1898_v0 }
  0x25   : > { %361 = vperm.xlu0 %1712, %v326_v10   ;;  %v2062_v10 = vsel %vm624_vm4, 65537, %v1898_v0  ;;  %vm2215_vm4 = vcmp.ne.s32.totalorder %v656_v7, 0  ;;  %v3201_v7 = vunpack.c.h.b16 %v2091_v28 }
  0x28   : > { %406 = vperm.xlu1 %1713, %v335_v11   ;;  %v610_v11 = vld [vmem:[%s1972_s18 + $0x20] sm:$0xff] }
  0x29   : > { %401 = vperm.xlu0 %1712, %v334_v12   ;;  %vm626_vm8 = vcmp.gt.bf16.partialorder %v610_v11, 0  ;;  %v619_v11 = vld [vmem:[%s1972_s18 + $0x68] sm:$0xff]  ;;  %v620_v12 = vld [vmem:[%s1972_s18 + $0x70] sm:$0xff] }
  0x2a   : > { %v2108_v33 = vsel %vm626_vm8, 65537, %v1898_v0  ;;  %vm635_vm11 = vcmp.gt.bf16.partialorder %v619_v11, 0  ;;  %vm636_vm14 = vcmp.gt.bf16.partialorder %v620_v12, 0  ;;  %v2151_v11 = vsel %vm629_vm13, 65537, %v1898_v0 }
  0x2b   : > { %v2139_v21 = vsel %vm635_vm11, 65537, %v1898_v0  ;;  %vm2397_vm13 = vcmp.ne.s32.totalorder %v3201_v7, 0 }
  0x2c   : > { %376 = vperm.xlu1 %1713, %v329_v13   ;;  %v2067_v13 = vld [vmem:[%s1978_s22 + $0x68] sm:$0xff] }
  0x2d   : > { %371 = vperm.xlu0 %1712, %v328_v14   ;;  %v672_v14 = vunpack.c.l.b16 %v2044_v62 }
  0x2f   : > { %vm2261_vm6 = vcmp.ne.s32.totalorder %v672_v14, 0 }
  0x30   : > { %416 = vperm.xlu1 %1713, %v337_v15   ;;  %v3194_v15 = vunpack.c.l.bf16 %v2050_v3 }
  0x31   : > { %411 = vperm.xlu0 %1712, %v336_v16   ;;  %v612_v16 = vld [vmem:[%s1972_s18 + $0x30] sm:$0xff] }
  0x32   : > { %vm628_vm12 = vcmp.gt.bf16.partialorder %v612_v16, 0  ;;  %v2162_v16 = vsel %vm636_vm14, 65537, %v1898_v0 }
  0x33   : > { %v2148_v45 = vsel %vm628_vm12, 65537, %v1898_v0 }
  0x93   : > { %v382_v12 = vpop.permute.xlu1 %381 }
  0x94   : > { %v342_v6 = vpop.permute.xlu0 %341  ;;  %v446_v20 = vadd.f32 %v1996_v35, %v382_v12  ;;  %v447_v27 = vadd.f32 %v1998_v36, %v382_v12 }
  0x95   : > { %v430_v1 = vadd.f32 %v1996_v35, %v342_v6  ;;  %v431_v59 = vadd.f32 %v1998_v36, %v342_v6 }
  0x96   : > { %v526_v61 = vmul.f32 %v494_v37, %v446_v20  ;;  %v527_v22 = vmul.f32 %v495_v38, %v447_v27 }
  0x97   : > { %v510_v48 = vmul.f32 %v478_v41, %v430_v1  ;;  %v511_v4 = vmul.f32 %v479_v42, %v431_v59  ;;  %v387_v56 = vpop.permute.xlu1 %386 }
  0x98   : > { %v347_v12 = vpop.permute.xlu0 %346  ;;  %v558_v37 = vmul.f32 0.2, %v526_v61  ;;  %v559_v20 = vmul.f32 0.2, %v527_v22  ;;  %v448_v38 = vadd.f32 %v1996_v35, %v387_v56  ;;  %v449_v41 = vadd.f32 %v1998_v36, %v387_v56 }
  0x99   : > { %v542_v30 = vmul.f32 0.2, %v510_v48  ;;  %v543_v27 = vmul.f32 0.2, %v511_v4  ;;  %v432_v31 = vadd.f32 %v1996_v35, %v347_v12  ;;  %v433_v42 = vadd.f32 %v1998_v36, %v347_v12 }
  0x9a   : > { %v2211_v1 = vmul.f32 %v496_v43, %v448_v38  ;;  %v590_v6 = vmax.f32 %v526_v61, %v558_v37  ;;  %v591_v60 = vmax.f32 %v527_v22, %v559_v20  ;;  %v2221_v56 = vmul.f32 %v497_v46, %v449_v41 }
  0x9b   : > { %v574_v59 = vmax.f32 %v510_v48, %v542_v30  ;;  %v512_v12 = vmul.f32 %v480_v49, %v432_v31  ;;  %v513_v43 = vmul.f32 %v481_v50, %v433_v42  ;;  %v357_v38 = vpop.permute.xlu1 %356  ;;  %v575_v61 = vmax.f32 %v511_v4, %v543_v27 }
  0x9c   : > { %v352_v48 = vpop.permute.xlu0 %351  ;;  %v2234_v22 = vmul.f32 0.2, %v2211_v1  ;;  %v436_v32 = vadd.f32 %v1996_v35, %v357_v38  ;;  %v437_v46 = vadd.f32 %v1998_v36, %v357_v38  ;;  %v2240_v39 = vmul.f32 0.2, %v2221_v56 }
  0x9d   : > { %v434_v49 = vadd.f32 %v1996_v35, %v352_v48  ;;  %v544_v50 = vmul.f32 0.2, %v512_v12  ;;  %v545_v4 = vmul.f32 0.2, %v513_v43  ;;  %v435_v58 = vadd.f32 %v1998_v36, %v352_v48 }
  0x9e   : > { %v2245_v8 = vmul.f32 %v484_v51, %v436_v32  ;;  %v2249_v37 = vmul.f32 %v485_v52, %v437_v46  ;;  %v2257_v30 = vsel %vm2155_vm0, %v574_v59, -9e+15  ;;  %v3171_v51 = vunpack.c.h.b16 %v2044_v62 }
  0x9f   : > { %v2253_v20 = vmul.f32 %v482_v55, %v434_v49  ;;  %v3174_v52 = vunpack.c.h.bf16 %v2012_v44  ;;  %v397_v41 = vpop.permute.xlu1 %396  ;;  %v2277_v24 = vsel %vm2173_vm1, %v575_v61, -9e+15  ;;  %v2281_v14 = vsel %vm2179_vm2, %v590_v6, -9e+15 }
  0xa0   : > { %vm2267_vm7 = vcmp.ne.s32.totalorder %v3171_v51, 0  ;;  %3175 = vst [vmem:[#allocation2_spill] sm:$0xff] %v2277_v24  ;;  %v392_v31 = vpop.permute.xlu0 %391  ;;  %v2285_v62 = vsel %vm2185_vm3, %v591_v60, -9e+15  ;;  %v2288_v42 = vmul.f32 0.2, %v2245_v8  ;;  %v452_v5 = vadd.f32 %v1996_v35, %v397_v41 }
  0xa1   : > { %v2273_v55 = vmul.f32 %v3174_v52, %v435_v58  ;;  %3176 = vst [vmem:[#allocation3_spill] sm:$0xff] %v2285_v62  ;;  %v2291_v44 = vmul.f32 0.2, %v2249_v37  ;;  %v2294_v59 = vmul.f32 0.2, %v2253_v20  ;;  %v453_v34 = vadd.f32 %v1998_v36, %v397_v41 }
  0xa2   : > { %v750_v0 = vmax.f32 %v2257_v30, %v2277_v24  ;;  %v450_v60 = vadd.f32 %v1996_v35, %v392_v31  ;;  %v3177_v6 = vunpack.c.l.b16 %v2062_v10  ;;  %v3180_v61 = vunpack.c.l.bf16 %v2029_v53 }
  0xa3   : > { %v2298_v38 = vmul.f32 0.2, %v2273_v55  ;;  %v451_v46 = vadd.f32 %v1998_v36, %v392_v31  ;;  %v774_v49 = vmax.f32 %v2281_v14, %v2285_v62  ;;  %v576_v58 = vmax.f32 %v512_v12, %v544_v50  ;;  %v367_v31 = vpop.permute.xlu1 %366 }
  0xa4   : > { %vm2306_vm8 = vcmp.ne.s32.totalorder %v3177_v6, 0  ;;  %v2312_v32 = vmul.f32 %v3180_v61, %v452_v5  ;;  %v3181_v51 = vunpack.c.h.b16 %v2062_v10  ;;  %v3184_v41 = vunpack.c.h.bf16 %v2029_v53  ;;  %751 = vmax.xlane.f32.xlu0 %v750_v0  ;;  %v362_v24 = vpop.permute.xlu0 %361 }
  0xa5   : > { %v3185_v5 = vunpack.c.l.bf16 %v2035_v57  ;;  %v577_v47 = vmax.f32 %v513_v43, %v545_v4  ;;  %v592_v12 = vmax.f32 %v2211_v1, %v2234_v22  ;;  %v3186_v50 = vunpack.c.h.bf16 %v2035_v57 }
  0xa6   : > { %vm2319_vm9 = vcmp.ne.s32.totalorder %v3181_v51, 0  ;;  %v2325_v6 = vmul.f32 %v3184_v41, %v453_v34  ;;  %v2334_v10 = vmul.f32 0.2, %v2312_v32  ;;  %v440_v53 = vadd.f32 %v1996_v35, %v367_v31 }
  0xa7   : > { %v2329_v61 = vmul.f32 %v3185_v5, %v450_v60  ;;  %v2338_v51 = vmul.f32 %v3186_v50, %v451_v46  ;;  %v441_v34 = vadd.f32 %v1998_v36, %v367_v31  ;;  %v2350_v1 = vsel %vm2215_vm4, %v576_v58, -9e+15 }
  0xa8   : > { %v2343_v0 = vmul.f32 0.2, %v2325_v6  ;;  %3187 = vst [vmem:[#allocation4_spill] sm:$0xff] %v2350_v1  ;;  %v438_v22 = vadd.f32 %v1996_v35, %v362_v24  ;;  %v3188_v57 = vunpack.c.l.b16 %v2078_v19  ;;  %v3191_v60 = vunpack.c.h.b16 %v2078_v19  ;;  %775 = vmax.xlane.f32.xlu0 %v774_v49 }
  0xa9   : > { %v2346_v43 = vmul.f32 0.2, %v2329_v61  ;;  %v2366_v41 = vmul.f32 0.2, %v2338_v51  ;;  %v2370_v58 = vmul.f32 %v3194_v15, %v440_v53  ;;  %v3195_v5 = vunpack.c.h.bf16 %v2050_v3  ;;  %v407_v15 = vpop.permute.xlu1 %406 }
  0xaa   : > { %vm2355_vm10 = vcmp.ne.s32.totalorder %v3188_v57, 0  ;;  %vm2361_vm11 = vcmp.ne.s32.totalorder %v3191_v60, 0  ;;  %v2378_v50 = vsel %vm2229_vm5, %v577_v47, -9e+15  ;;  %v3197_v19 = vunpack.c.l.b16 %v2091_v28 }
  0xab   : > { %v2374_v31 = vmul.f32 %v3195_v5, %v441_v34  ;;  %3196 = vst [vmem:[#allocation5_spill] sm:$0xff] %v2378_v50  ;;  %v753_v60 = vmax.f32 %v2350_v1, %v2378_v50  ;;  %v439_v53 = vadd.f32 %v1998_v36, %v362_v24  ;;  %v3200_v3 = vunpack.c.l.bf16 %v2058_v9 }
  0xac   : > { %vm2382_vm12 = vcmp.ne.s32.totalorder %v3197_v19, 0  ;;  %v593_v47 = vmax.f32 %v2221_v56, %v2240_v39  ;;  %v2402_v49 = vmul.f32 0.2, %v2370_v58  ;;  %v456_v24 = vadd.f32 %v1996_v35, %v407_v15 }
  0xad   : > { %v2391_v34 = vmul.f32 %v3200_v3, %v438_v22  ;;  %v2405_v19 = vmul.f32 0.2, %v2374_v31  ;;  %v457_v22 = vadd.f32 %v1998_v36, %v407_v15  ;;  %v402_v3 = vpop.permute.xlu0 %401  ;;  %754 = vmax.xlane.f32.xlu1 %v753_v60  ;;  %v3204_v56 = vunpack.c.h.bf16 %v2058_v9 }
  0xae   : > { %v2418_v7 = vsel %vm2261_vm6, %v592_v12, -9e+15  ;;  %v2422_v50 = vsel %vm2267_vm7, %v593_v47, -9e+15  ;;  %v3207_v1 = vunpack.c.l.bf16 %v2067_v13  ;;  %v3208_v60 = vunpack.c.h.bf16 %v2067_v13 }
  0xaf   : > { %v2411_v39 = vmul.f32 %v3204_v56, %v439_v53  ;;  %v2414_v28 = vmul.f32 0.2, %v2391_v34  ;;  %3205 = vst [vmem:[#allocation6_spill] sm:$0xff] %v2418_v7  ;;  %3206 = vst [vmem:[#allocation7_spill] sm:$0xff] %v2422_v50  ;;  %v777_v53 = vmax.f32 %v2418_v7, %v2422_v50  ;;  %v578_v27 = vmax.f32 %v2253_v20, %v2294_v59 }
  0xb0   : > { %v2426_v15 = vmul.f32 %v3207_v1, %v456_v24  ;;  %v2430_v9 = vmul.f32 %v3208_v60, %v457_v22  ;;  %v3209_v12 = vunpack.c.l.b16 %v2102_v63  ;;  %v3212_v47 = vunpack.c.h.b16 %v2102_v63  ;;  %v377_v22 = vpop.permute.xlu1 %376 }
  0xb1   : > { %v2449_v13 = vmul.f32 0.2, %v2411_v39  ;;  %v579_v24 = vmax.f32 %v2273_v55, %v2298_v38  ;;  %v454_v20 = vadd.f32 %v1996_v35, %v402_v3  ;;  %v455_v59 = vadd.f32 %v1998_v36, %v402_v3  ;;  %778 = vmax.xlane.f32.xlu0 %v777_v53 }
  0xb2   : > { %vm2438_vm14 = vcmp.ne.s32.totalorder %v3209_v12, 0  ;;  %vm2444_vm15 = vcmp.ne.s32.totalorder %v3212_v47, 0  ;;  %v2456_v56 = vmul.f32 0.2, %v2426_v15  ;;  %v2459_v63 = vmul.f32 0.2, %v2430_v9 }
  0xb3   : > { %v2463_v60 = vsel %vm2306_vm8, %v578_v27, -9e+15  ;;  %v444_v12 = vadd.f32 %v1996_v35, %v377_v22  ;;  %v3215_v55 = vunpack.c.l.b16 %v2108_v33  ;;  %v3218_v3 = vunpack.c.h.b16 %v2108_v33 }
  0xb4   : > { %v2480_v53 = vsel %vm2319_vm9, %v579_v24, -9e+15  ;;  %v3221_v48 = vunpack.c.l.bf16 %v2074_v18  ;;  %v3222_v50 = vunpack.c.h.bf16 %v2074_v18  ;;  %v445_v7 = vadd.f32 %v1998_v36, %v377_v22 }
  0xb5   : > { %vm2468_vm0 = vcmp.ne.s32.totalorder %v3215_v55, 0  ;;  %vm2474_vm1 = vcmp.ne.s32.totalorder %v3218_v3, 0  ;;  %v756_v33 = vmax.f32 %v2463_v60, %v2480_v53  ;;  %v3223_v3 = vunpack.c.l.bf16 %v2084_v23 }
  0xb6   : > { %v2484_v27 = vmul.f32 %v3221_v48, %v454_v20  ;;  %v2488_v55 = vmul.f32 %v3222_v50, %v455_v59  ;;  %v580_v52 = vmax.f32 %v2245_v8, %v2288_v42  ;;  %v581_v24 = vmax.f32 %v2249_v37, %v2291_v44  ;;  %v372_v20 = vpop.permute.xlu0 %371  ;;  %v417_v48 = vpop.permute.xlu1 %416  ;;  %v1723_v42 = vld [vmem:[%s3145_s2 + $0x20] sm:$0xff]  }
  0xb7   : > { %v2495_v62 = vmul.f32 %v3223_v3, %v444_v12  ;;  %v3224_v59 = vunpack.c.h.bf16 %v2084_v23  ;;  %v594_v12 = vmax.f32 %v2329_v61, %v2346_v43  ;;  %v3225_v8 = vunpack.c.l.b16 %v2131_v29  ;;  %757 = vmax.xlane.f32.xlu1 %v756_v33 }
  0xb8   : > { %v2502_v18 = vmul.f32 0.2, %v2484_v27  ;;  %v2505_v50 = vmul.f32 0.2, %v2488_v55  ;;  %v3228_v37 = vunpack.c.h.b16 %v2131_v29  ;;  %v3231_v23 = vunpack.c.l.b16 %v2135_v25 }
  0xb9   : > { %v2509_v22 = vmul.f32 %v3224_v59, %v445_v7  ;;  %vm2515_vm2 = vcmp.ne.s32.totalorder %v3225_v8, 0  ;;  %v2532_v61 = vmul.f32 0.2, %v2495_v62  ;;  %v2536_v43 = vsel %vm2355_vm10, %v580_v52, -9e+15 }
  0xba   : > { %vm2521_vm3 = vcmp.ne.s32.totalorder %v3228_v37, 0  ;;  %vm2527_vm4 = vcmp.ne.s32.totalorder %v3231_v23, 0  ;;  %v2540_v29 = vsel %vm2361_vm11, %v581_v24, -9e+15  ;;  %v595_v3 = vmax.f32 %v2338_v51, %v2366_v41 }
  0xbb   : > { %v3234_v59 = vunpack.c.h.b16 %v2135_v25  ;;  %v2551_v33 = vmul.f32 0.2, %v2509_v22  ;;  %v759_v4 = vmax.f32 %v2536_v43, %v2540_v29  ;;  %v2557_v46 = vsel %vm2382_vm12, %v594_v12, -9e+15 }
  0xbc   : > { %v442_v52 = vadd.f32 %v1996_v35, %v372_v20  ;;  %v3237_v51 = vunpack.c.l.b16 %v2139_v21  ;;  %v3240_v41 = vunpack.c.h.b16 %v2139_v21  ;;  %v2574_v37 = vsel %vm2397_vm13, %v595_v3, -9e+15 }
  0xbd   : > { %vm2546_vm5 = vcmp.ne.s32.totalorder %v3234_v59, 0  ;;  %3243 = vst [vmem:[#allocation8_spill] sm:$0xff] %v2574_v37  ;;  %v443_v57 = vadd.f32 %v1998_v36, %v372_v20  ;;  %v460_v12 = vadd.f32 %v1996_v35, %v417_v48  ;;  %v461_v23 = vadd.f32 %v1998_v36, %v417_v48  ;;  %760 = vmax.xlane.f32.xlu0 %v759_v4 }
  0xbe   : > { %vm2562_vm6 = vcmp.ne.s32.totalorder %v3237_v51, 0  ;;  %vm2568_vm7 = vcmp.ne.s32.totalorder %v3240_v41, 0  ;;  %v780_v59 = vmax.f32 %v2557_v46, %v2574_v37  ;;  %v3244_v21 = vunpack.c.l.bf16 %v2098_v54 }
  0xbf   : > { %v596_v41 = vmax.f32 %v2312_v32, %v2334_v10  ;;  %v597_v5 = vmax.f32 %v2325_v6, %v2343_v0  ;;  %v3245_v20 = vunpack.c.l.b16 %v2148_v45  ;;  %v3248_v48 = vunpack.c.h.bf16 %v2098_v54  ;;  %v412_v10 = vpop.permute.xlu0 %411 }
  0xc0   : > { %v2583_v51 = vmul.f32 %v3244_v21, %v442_v52  ;;  %v3249_v37 = vunpack.c.l.bf16 %v2114_v17  ;;  %v3250_v21 = vunpack.c.h.bf16 %v2114_v17  ;;  %v582_v6 = vmax.f32 %v2391_v34, %v2414_v28  ;;  %781 = vmax.xlane.f32.xlu1 %v780_v59 }
  0xc1   : > { %vm2591_vm8 = vcmp.ne.s32.totalorder %v3245_v20, 0  ;;  %v2597_v4 = vmul.f32 %v3248_v48, %v443_v57  ;;  %v3251_v0 = vunpack.c.h.b16 %v2148_v45  ;;  %v3254_v54 = vunpack.c.l.b16 %v2151_v11 }
  0xc2   : > { %v2601_v52 = vmul.f32 %v3249_v37, %v460_v12  ;;  %v2605_v32 = vmul.f32 %v3250_v21, %v461_v23  ;;  %v3257_v17 = vunpack.c.h.b16 %v2151_v11  ;;  %v554_v34 = vmul.f32 0.2, %v2583_v51  ;;  %v1720_v21 = vld [vmem:[%s3145_s2 + $0x58] sm:$0xff]  }
  0xc3   : > { %vm2611_vm9 = vcmp.ne.s32.totalorder %v3251_v0, 0  ;;  %vm2617_vm10 = vcmp.ne.s32.totalorder %v3254_v54, 0  ;;  %v2630_v45 = vsel %vm2438_vm14, %v596_v41, -9e+15  ;;  %v2634_v28 = vsel %vm2444_vm15, %v597_v5, -9e+15  ;;  %1629 = vmatprep.subr.bf16.mxu0 %v1720_v21  ;;  %1690 = vmatprep.subr.bf16.mxu1 %v1720_v21 }
  0xc4   : > { %vm2623_vm11 = vcmp.ne.s32.totalorder %v3257_v17, 0  ;;  %v583_v12 = vmax.f32 %v2411_v39, %v2449_v13  ;;  %v3260_v11 = vunpack.c.l.b16 %v2162_v16  ;;  %v555_v59 = vmul.f32 0.2, %v2597_v4  ;;  %v1721_v0 = vld [vmem:[%s3145_s2 + $0x18] sm:$0xff]  }
  0xc5   : > { %v2646_v48 = vmul.f32 0.2, %v2601_v52  ;;  %v2649_v40 = vmul.f32 0.2, %v2605_v32  ;;  %v783_v1 = vmax.f32 %v2630_v45, %v2634_v28  ;;  %v2655_v39 = vsel %vm2468_vm0, %v582_v6, -9e+15  ;;  %1630 = vmatpush3.bf16.msra.mxu0 %v1721_v0  ;;  %1698 = vmatpush3.bf16.msra.mxu1 %v1721_v0 }
  0xc6   : > { %vm2640_vm12 = vcmp.ne.s32.totalorder %v3260_v11, 0  ;;  %v2659_v13 = vsel %vm2474_vm1, %v583_v12, -9e+15  ;;  %v458_v41 = vadd.f32 %v1996_v35, %v412_v10  ;;  %v459_v5 = vadd.f32 %v1998_v36, %v412_v10  ;;  %v1728_v21 = vld [vmem:[%s3145_s2 + $0x78] sm:$0xff]  }
  0xc7   : > { %784 = vmax.xlane.f32.xlu0 %v783_v1  ;;  %v762_v38 = vmax.f32 %v2655_v39, %v2659_v13  ;;  %v584_v47 = vmax.f32 %v2370_v58, %v2402_v49  ;;  %v585_v35 = vmax.f32 %v2374_v31, %v2405_v19  ;;  %v598_v36 = vmax.f32 %v2484_v27, %v2502_v18  ;;  %v1729_v0 = vld [vmem:[%s3145_s2 + $0x38] sm:$0xff]  }
  0xc8   : > { %v3263_v6 = vunpack.c.l.bf16 %v2127_v2  ;;  %v3264_v54 = vunpack.c.h.bf16 %v2127_v2  ;;  %v599_v12 = vmax.f32 %v2488_v55, %v2505_v50  ;;  %v600_v11 = vmax.f32 %v2426_v15, %v2456_v56  ;;  %v1722_v50 = vld [vmem:[%s3145_s2 + $0x60] sm:$0xff]  }
  0xc9   : > { %763 = vmax.xlane.f32.xlu1 %v762_v38  ;;  %v2687_v58 = vsel %vm2515_vm2, %v584_v47, -9e+15  ;;  %v2691_v31 = vsel %vm2521_vm3, %v585_v35, -9e+15  ;;  %v2695_v2 = vsel %vm2527_vm4, %v598_v36, -9e+15  ;;  %v601_v49 = vmax.f32 %v2430_v9, %v2459_v63  ;;  %1631 = vmatprep.subr.bf16.mxu0 %v1722_v50 }
  0xca   : > { %v538_v10 = vmul.f32 %v3263_v6, %v458_v41  ;;  %v539_v17 = vmul.f32 %v3264_v54, %v459_v5  ;;  %v765_v56 = vmax.f32 %v2687_v58, %v2691_v31  ;;  %v2703_v27 = vsel %vm2546_vm5, %v599_v12, -9e+15  ;;  %1632 = vmatpush3.bf16.msra.mxu0 %v1723_v42  ;;  %1691 = vmatprep.subr.bf16.mxu1 %v1722_v50  ;;  %v1726_v41 = vld [vmem:[%s3145_s2 + $0x70] sm:$0xff]   ;;  %v3268_v35 = vld [vmem:[#allocation2_spill] sm:$0xff]  ;;  %v3269_v12 = vld [vmem:[#allocation3_spill] sm:$0xff] }
  0xcb   : > { %v786_v55 = vmax.f32 %v2695_v2, %v2703_v27  ;;  %v2709_v18 = vsel %vm2562_vm6, %v600_v11, -9e+15  ;;  %v2713_v9 = vsel %vm2568_vm7, %v601_v49, -9e+15  ;;  %v586_v63 = vmax.f32 %v2583_v51, %v554_v34  ;;  %1699 = vmatpush3.bf16.msra.mxu1 %v1723_v42  ;;  %v1727_v5 = vld [vmem:[%s3145_s2 + $0x30] sm:$0xff]  }
  0xcc   : > { %v570_v19 = vmul.f32 0.2, %v538_v10  ;;  %v571_v15 = vmul.f32 0.2, %v539_v17  ;;  %766 = vmax.xlane.f32.xlu0 %v765_v56  ;;  %v587_v44 = vmax.f32 %v2597_v4, %v555_v59  ;;  %v588_v7 = vmax.f32 %v2495_v62, %v2532_v61  ;;  %v1724_v59 = vld [vmem:[%s3145_s2 + $0x68] sm:$0xff]   ;;  %v3271_v56 = vld [vmem:[#allocation5_spill] sm:$0xff] }
  0xcd   : > { %v589_v8 = vmax.f32 %v2509_v22, %v2551_v33  ;;  %v3265_v25 = vunpack.c.h.b16 %v2162_v16  ;;  %787 = vmax.xlane.f32.xlu1 %v786_v55  ;;  %v789_v24 = vmax.f32 %v2709_v18, %v2713_v9  ;;  %v2733_v51 = vsel %vm2591_vm8, %v586_v63, -9e+15  ;;  %1633 = vmatprep.subr.bf16.mxu0 %v1724_v59 }
  0xce   : > { %v602_v34 = vmax.f32 %v538_v10, %v570_v19  ;;  %v603_v1 = vmax.f32 %v539_v17, %v571_v15  ;;  %v2737_v62 = vsel %vm2611_vm9, %v587_v44, -9e+15  ;;  %v2741_v22 = vsel %vm2617_vm10, %v588_v7, -9e+15  ;;  %1692 = vmatprep.subr.bf16.mxu1 %v1724_v59  ;;  %v3270_v19 = vld [vmem:[#allocation4_spill] sm:$0xff]  ;;  %v3272_v7 = vld [vmem:[#allocation6_spill] sm:$0xff] }
  0xcf   : > { %vm715_vm13 = vcmp.ne.s32.totalorder %v3265_v25, 0  ;;  %v2745_v16 = vsel %vm2623_vm11, %v589_v8, -9e+15  ;;  %v604_v61 = vmax.f32 %v2601_v52, %v2646_v48  ;;  %v768_v33 = vmax.f32 %v2733_v51, %v2737_v62  ;;  %v3273_v25 = vld [vmem:[#allocation7_spill] sm:$0xff] }
  0xd0   : > { %v2753_v3 = vsel %vm2640_vm12, %v602_v34, -9e+15  ;;  %v2755_v4 = vsel %vm715_vm13, %v603_v1, -9e+15  ;;  %v605_v20 = vmax.f32 %v2605_v32, %v2649_v40  ;;  %790 = vmax.xlane.f32.xlu0 %v789_v24  ;;  %v3266_v57 = vunpack.c.l.b16 %v2165_v26  ;;  %v1725_v32 = vld [vmem:[%s3145_s2 + $0x28] sm:$0xff]  }
  0xd1   : > { %v3267_v52 = vunpack.c.h.b16 %v2165_v26  ;;  %769 = vmax.xlane.f32.xlu1 %v768_v33  ;;  %v792_v37 = vmax.f32 %v2753_v3, %v2755_v4  ;;  %v771_v23 = vmax.f32 %v2741_v22, %v2745_v16  ;;  %1634 = vmatpush3.bf16.msra.mxu0 %v1725_v32  ;;  %vm1327_vm0 = vcmask 523264  }
  0xd2   : > { %vm716_vm14 = vcmp.ne.s32.totalorder %v3266_v57, 0  ;;  %1700 = vmatpush3.bf16.msra.mxu1 %v1725_v32  ;;  %1635 = vmatprep.subr.bf16.mxu0 %v1726_v41 }
  0xd3   : > { %vm717_vm15 = vcmp.ne.s32.totalorder %v3267_v52, 0  ;;  %v2773_v48 = vsel %vm716_vm14, %v604_v61, -9e+15  ;;  %1693 = vmatprep.subr.bf16.mxu1 %v1726_v41 }
  0xd4   : > { %v2775_v40 = vsel %vm717_vm15, %v605_v20, -9e+15  ;;  %772 = vmax.xlane.f32.xlu0 %v771_v23 }
  0xd5   : > { %793 = vmax.xlane.f32.xlu1 %v792_v37  ;;  %v795_v26 = vmax.f32 %v2773_v48, %v2775_v40  ;;  %1636 = vmatpush3.bf16.msra.mxu0 %v1727_v5 }
  0xd6   : > { %1701 = vmatpush3.bf16.msra.mxu1 %v1727_v5  ;;  %1637 = vmatprep.subr.bf16.mxu0 %v1728_v21 }
  0xd7   : > { %1694 = vmatprep.subr.bf16.mxu1 %v1728_v21 }
  0xd8   : > { %796 = vmax.xlane.f32.xlu0 %v795_v26 }
  0xd9   : > { %1638 = vmatpush3.bf16.msra.mxu0 %v1729_v0 }
  0xda   : > { %1702 = vmatpush3.bf16.msra.mxu1 %v1729_v0 }
 0x131   : > { %v752_v38 = vpop.xlane.xlu0 %751 }
 0x132   : > { %v798_v47 = vsub.f32 %v2257_v30, %v752_v38  ;;  %v799_v36 = vsub.f32 %v3268_v35, %v752_v38 }
 0x134   : > { %v830_v6 = vmul.f32 1.442695, %v798_v47  ;;  %v832_v10 = vmul.f32 1.442695, %v799_v36 }
 0x135   : > { %v776_v54 = vpop.xlane.xlu0 %775 }
 0x136   : > { %1730 = vpow2.f32 %v830_v6  ;;  %v814_v17 = vsub.f32 %v2281_v14, %v776_v54  ;;  %v815_v11 = vsub.f32 %v3269_v12, %v776_v54 }
 0x137   : > { %1732 = vpow2.f32 %v832_v10 }
 0x138   : > { %v862_v63 = vmul.f32 1.442695, %v814_v17  ;;  %v864_v30 = vmul.f32 1.442695, %v815_v11 }
 0x13a   : > { %v755_v49 = vpop.xlane.xlu1 %754  ;;  %1734 = vpow2.f32 %v862_v63 }
 0x13b   : > { %v800_v15 = vsub.f32 %v3270_v19, %v755_v49  ;;  %v801_v55 = vsub.f32 %v3271_v56, %v755_v49 }
 0x13d   : > { %v834_v50 = vmul.f32 1.442695, %v800_v15  ;;  %v836_v42 = vmul.f32 1.442695, %v801_v55 }
 0x13e   : > { %v779_v44 = vpop.xlane.xlu0 %778 }
 0x13f   : > { %v816_v8 = vsub.f32 %v3272_v7, %v779_v44  ;;  %v817_v24 = vsub.f32 %v3273_v25, %v779_v44  ;;  %1736 = vpow2.f32 %v834_v50 }
 0x140   : > { %1738 = vpow2.f32 %v836_v42  ;;  %v1731_v20 = vpop.eup %1730 }
 0x141   : > { %v866_v14 = vmul.f32 1.442695, %v816_v8  ;;  %v868_v34 = vmul.f32 1.442695, %v817_v24  ;;  %1740 = vpow2.f32 %v864_v30  ;;  %v1733_v57 = vpop.eup %1732 }
 0x142   : > { %v894_v26 = vadd.f32 %v1733_v57, %v1731_v20 }
 0x143   : > { %1742 = vpow2.f32 %v866_v14 }
 0x144   : > { %v758_v1 = vpop.xlane.xlu1 %757  ;;  %1744 = vpow2.f32 %v868_v34  ;;  %895 = vadd.xlane.f32.xlu1 %v894_v26  ;;  %v2805_v0 = vpop.eup %1734 }
 0x145   : > { %v802_v61 = vsub.f32 %v2463_v60, %v758_v1  ;;  %v803_v33 = vsub.f32 %v2480_v53, %v758_v1  ;;  %v3274_v60 = vld [vmem:[#allocation8_spill] sm:$0xff] }
 0x147   : > { %v838_v52 = vmul.f32 1.442695, %v802_v61  ;;  %v840_v37 = vmul.f32 1.442695, %v803_v33 }
 0x149   : > { %1746 = vpow2.f32 %v838_v52  ;;  %v1737_v47 = vpop.eup %1736 }
 0x14a   : > { %v761_v23 = vpop.xlane.xlu0 %760  ;;  %1748 = vpow2.f32 %v840_v37  ;;  %v1739_v6 = vpop.eup %1738  ;;  %v958_v54 = vpack.c.bf16 %v1737_v47, %v1731_v20 }
 0x14b   : > { %v804_v59 = vsub.f32 %v2536_v43, %v761_v23  ;;  %v805_v32 = vsub.f32 %v2540_v29, %v761_v23  ;;  %v897_v12 = vadd.f32 %v1739_v6, %v1737_v47  ;;  %v959_v11 = vpack.c.bf16 %v1739_v6, %v1733_v57 }
 0x14d   : > { %v782_v41 = vpop.xlane.xlu1 %781  ;;  %v842_v53 = vmul.f32 1.442695, %v804_v59  ;;  %v844_v38 = vmul.f32 1.442695, %v805_v32  ;;  %898 = vadd.xlane.f32.xlu0 %v897_v12  ;;  %1134 = vmatprep.mubr.bf16.mxu0 %v959_v11 }
 0x14e   : > { %v818_v5 = vsub.f32 %v2557_v46, %v782_v41  ;;  %v819_v21 = vsub.f32 %v3274_v60, %v782_v41  ;;  %v2809_v46 = vpop.eup %1740  ;;  %1135 = vmatmul.mubr.bf16.vlgmr.msra.gmra.mrb[0].mxu0 %v958_v54 }
 0x14f   : > { %1750 = vpow2.f32 %v842_v53  ;;  %v2811_v49 = vpop.eup %1742 }
 0x150   : > { %v870_v35 = vmul.f32 1.442695, %v818_v5  ;;  %v872_v36 = vmul.f32 1.442695, %v819_v21  ;;  %1752 = vpow2.f32 %v844_v38  ;;  %v2815_v55 = vpop.eup %1744 }
 0x152   : > { %1754 = vpow2.f32 %v870_v35 }
 0x153   : > { %1756 = vpow2.f32 %v872_v36  ;;  %v1747_v7 = vpop.eup %1746 }
 0x154   : > { %v785_v43 = vpop.xlane.xlu0 %784  ;;  %v1749_v24 = vpop.eup %1748 }
 0x155   : > { %v820_v29 = vsub.f32 %v2630_v45, %v785_v43  ;;  %v821_v10 = vsub.f32 %v2634_v28, %v785_v43  ;;  %v966_v28 = vpack.c.bf16 %v2811_v49, %v2805_v0  ;;  %v900_v20 = vadd.f32 %v1749_v24, %v1747_v7 }
 0x156   : > { %v764_v17 = vpop.xlane.xlu1 %763 }
 0x157   : > { %v806_v19 = vsub.f32 %v2655_v39, %v764_v17  ;;  %v807_v15 = vsub.f32 %v2659_v13, %v764_v17  ;;  %v874_v56 = vmul.f32 1.442695, %v820_v29  ;;  %v876_v45 = vmul.f32 1.442695, %v821_v10  ;;  %901 = vadd.xlane.f32.xlu1 %v900_v20 }
 0x158   : > { %v967_v39 = vpack.c.bf16 %v2815_v55, %v2809_v46 }
 0x159   : > { %v846_v63 = vmul.f32 1.442695, %v806_v19  ;;  %v848_v50 = vmul.f32 1.442695, %v807_v15  ;;  %1758 = vpow2.f32 %v874_v56  ;;  %v767_v42 = vpop.xlane.xlu0 %766  ;;  %v1751_v57 = vpop.eup %1750 }
 0x15a   : > { %1760 = vpow2.f32 %v876_v45  ;;  %v788_v13 = vpop.xlane.xlu1 %787  ;;  %v808_v30 = vsub.f32 %v2687_v58, %v767_v42  ;;  %v809_v44 = vsub.f32 %v2691_v31, %v767_v42  ;;  %1166 = vmatprep.mubr.bf16.mxu1 %v967_v39  ;;  %v960_v23 = vpack.c.bf16 %v1751_v57, %v1747_v7 }
 0x15b   : > { %1762 = vpow2.f32 %v846_v63  ;;  %v822_v8 = vsub.f32 %v2695_v2, %v788_v13  ;;  %v823_v25 = vsub.f32 %v2703_v27, %v788_v13  ;;  %1167 = vmatmul.mubr.bf16.vlgmr.msra.gmra.mrb[0].mxu1 %v966_v28  ;;  %v1753_v2 = vpop.eup %1752 }
 0x15c   : > { %1764 = vpow2.f32 %v848_v50  ;;  %v850_v14 = vmul.f32 1.442695, %v808_v30  ;;  %v852_v61 = vmul.f32 1.442695, %v809_v44  ;;  %v961_v26 = vpack.c.bf16 %v1753_v2, %v1749_v24  ;;  %v2829_v41 = vpop.eup %1754 }
 0x15d   : > { %v878_v34 = vmul.f32 1.442695, %v822_v8  ;;  %v880_v1 = vmul.f32 1.442695, %v823_v25  ;;  %v791_v33 = vpop.xlane.xlu0 %790  ;;  %v903_v21 = vadd.f32 %v1753_v2, %v1751_v57 }
 0x15e   : > { %1766 = vpow2.f32 %v850_v14  ;;  %v770_v58 = vpop.xlane.xlu1 %769  ;;  %v824_v31 = vsub.f32 %v2709_v18, %v791_v33  ;;  %v825_v52 = vsub.f32 %v2713_v9, %v791_v33  ;;  %v2831_v9 = vpop.eup %1756  ;;  %1142 = vmatprep.mubr.bf16.mxu0 %v961_v26 }
 0x15f   : > { %1768 = vpow2.f32 %v878_v34  ;;  %v810_v27 = vsub.f32 %v2733_v51, %v770_v58  ;;  %v811_v37 = vsub.f32 %v2737_v62, %v770_v58  ;;  %904 = vadd.xlane.f32.xlu0 %v903_v21  ;;  %1143 = vmatmul.mubr.bf16.gmra.mrb[4].mxu0 %v960_v23  ;;  %v918_v34 = vadd.f32 %v2809_v46, %v2805_v0 }
 0x160   : > { %1770 = vpow2.f32 %v880_v1  ;;  %v882_v59 = vmul.f32 1.442695, %v824_v31  ;;  %v884_v32 = vmul.f32 1.442695, %v825_v52  ;;  %v924_v52 = vadd.f32 %v2831_v9, %v2829_v41 }
 0x161   : > { %1772 = vpow2.f32 %v852_v61  ;;  %v854_v5 = vmul.f32 1.442695, %v810_v27  ;;  %v856_v60 = vmul.f32 1.442695, %v811_v37  ;;  %v773_v18 = vpop.xlane.xlu0 %772  ;;  %v921_v27 = vadd.f32 %v2815_v55, %v2811_v49 }
 0x162   : > { %1774 = vpow2.f32 %v882_v59  ;;  %v794_v53 = vpop.xlane.xlu1 %793  ;;  %v812_v51 = vsub.f32 %v2741_v22, %v773_v18  ;;  %v813_v62 = vsub.f32 %v2745_v16, %v773_v18 }
 0x163   : > { %v2835_v38 = vpop.eup %1758  ;;  %1776 = vpow2.f32 %v854_v5  ;;  %v827_v47 = vsub.f32 %v2755_v4, %v794_v53  ;;  %v826_v36 = vsub.f32 %v2753_v3, %v794_v53 }
 0x164   : > { %v2838_v35 = vpop.eup %1760  ;;  %1778 = vpow2.f32 %v856_v60  ;;  %v858_v43 = vmul.f32 1.442695, %v812_v51  ;;  %v968_v6 = vpack.c.bf16 %v2835_v38, %v2829_v41  ;;  %v860_v29 = vmul.f32 1.442695, %v813_v62 }
 0x165   : > { %v1763_v22 = vpop.eup %1762  ;;  %1780 = vpow2.f32 %v884_v32  ;;  %v888_v16 = vmul.f32 1.442695, %v827_v47  ;;  %v797_v10 = vpop.xlane.xlu0 %796  ;;  %v969_v54 = vpack.c.bf16 %v2838_v35, %v2831_v9  ;;  %v886_v19 = vmul.f32 1.442695, %v826_v36 }
 0x166   : > { %v1765_v4 = vpop.eup %1764  ;;  %1782 = vpow2.f32 %v858_v43  ;;  %v828_v17 = vsub.f32 %v2773_v48, %v797_v10  ;;  %v829_v12 = vsub.f32 %v2775_v40, %v797_v10  ;;  %v927_v46 = vadd.f32 %v2838_v35, %v2835_v38 }
 0x167   : > { %v906_v11 = vadd.f32 %v1765_v4, %v1763_v22  ;;  %1174 = vmatprep.mubr.bf16.mxu1 %v969_v54  ;;  %1784 = vpow2.f32 %v888_v16 }
 0x168   : > { %v1767_v3 = vpop.eup %1766  ;;  %v890_v15 = vmul.f32 1.442695, %v828_v17  ;;  %v892_v56 = vmul.f32 1.442695, %v829_v12  ;;  %1175 = vmatmul.mubr.bf16.gmra.mrb[4].mxu1 %v968_v6  ;;  %1786 = vpow2.f32 %v860_v29 }
 0x169   : > { %v1769_v45 = vpop.eup %1768  ;;  %907 = vadd.xlane.f32.xlu1 %v906_v11  ;;  %v962_v50 = vpack.c.bf16 %v1767_v3, %v1763_v22 }
 0x16a   : > { %v1771_v28 = vpop.eup %1770  ;;  %1788 = vpow2.f32 %v890_v15 }
 0x16b   : > { %v1773_v63 = vpop.eup %1772  ;;  %1790 = vpow2.f32 %v892_v56  ;;  %v930_v0 = vadd.f32 %v1771_v28, %v1769_v45 }
 0x16c   : > { %v1775_v42 = vpop.eup %1774  ;;  %1792 = vpow2.f32 %v886_v19  ;;  %v963_v48 = vpack.c.bf16 %v1773_v63, %v1765_v4  ;;  %v909_v40 = vadd.f32 %v1773_v63, %v1767_v3 }
 0x16d   : > { %v1777_v39 = vpop.eup %1776  ;;  %v970_v7 = vpack.c.bf16 %v1775_v42, %v1769_v45 }
 0x16e   : > { %v1779_v13 = vpop.eup %1778  ;;  %1150 = vmatprep.mubr.bf16.mxu0 %v963_v48  ;;  %910 = vadd.xlane.f32.xlu0 %v909_v40 }
 0x16f   : > { %v1781_v30 = vpop.eup %1780  ;;  %1151 = vmatmul.mubr.bf16.gmra.mrb[8].mxu0 %v962_v50  ;;  %v912_v44 = vadd.f32 %v1779_v13, %v1777_v39 }
 0x170   : > { %v1783_v8 = vpop.eup %1782  ;;  %v971_v25 = vpack.c.bf16 %v1781_v30, %v1771_v28  ;;  %v933_v23 = vadd.f32 %v1781_v30, %v1775_v42 }
 0x171   : > { %913 = vadd.xlane.f32.xlu1 %v912_v44  ;;  %v1785_v24 = vpop.eup %1784  ;;  %v964_v1 = vpack.c.bf16 %v1783_v8, %v1777_v39 }
 0x172   : > { %1182 = vmatprep.mubr.bf16.mxu1 %v971_v25  ;;  %v1787_v14 = vpop.eup %1786 }
 0x173   : > { %1183 = vmatmul.mubr.bf16.gmra.mrb[8].mxu1 %v970_v7  ;;  %v965_v33 = vpack.c.bf16 %v1787_v14, %v1779_v13  ;;  %v915_v20 = vadd.f32 %v1787_v14, %v1783_v8 }
 0x174   : > { %v1789_v61 = vpop.eup %1788 }
 0x175   : > { %v1791_v57 = vpop.eup %1790  ;;  %919 = vadd.xlane.f32.xlu1 %v918_v34  ;;  %1158 = vmatprep.mubr.bf16.mxu0 %v965_v33 }
 0x176   : > { %v1793_v58 = vpop.eup %1792  ;;  %916 = vadd.xlane.f32.xlu0 %v915_v20  ;;  %v973_v31 = vpack.c.bf16 %v1791_v57, %v1785_v24  ;;  %v939_v59 = vadd.f32 %v1791_v57, %v1789_v61 }
 0x177   : > { %1159 = vmatmul.mubr.bf16.gmra.mrb[12].mxu0 %v964_v1  ;;  %v972_v2 = vpack.c.bf16 %v1789_v61, %v1793_v58  ;;  %v936_v37 = vadd.f32 %v1793_v58, %v1785_v24 }
 0x178   : > { %1190 = vmatprep.mubr.bf16.mxu1 %v973_v31 }
 0x179   : > { %925 = vadd.xlane.f32.xlu1 %v924_v52 }
 0x17a   : > { %922 = vadd.xlane.f32.xlu0 %v921_v27 }
 0x17b   : > { %1191 = vmatmul.mubr.bf16.gmra.mrb[12].mxu1 %v972_v2 }
 0x17d   : > { %931 = vadd.xlane.f32.xlu1 %v930_v0 }
 0x17e   : > { %928 = vadd.xlane.f32.xlu0 %v927_v46 }
 0x181   : > { %937 = vadd.xlane.f32.xlu1 %v936_v37 }
 0x182   : > { %934 = vadd.xlane.f32.xlu0 %v933_v23 }
 0x186   : > { %940 = vadd.xlane.f32.xlu0 %v939_v59 }
 0x1d1   : > { %v896_v32 = vpop.xlane.xlu1 %895 }
 0x1d2   : > { %1794 = vrcp.f32 %v896_v32 }
 0x1da   : > { %v899_v26 = vpop.xlane.xlu0 %898 }
 0x1db   : > { %1796 = vrcp.f32 %v899_v26 }
 0x1dc   : > { %v1795_v35 = vpop.eup %1794 }
 0x1e4   : > { %v902_v41 = vpop.xlane.xlu1 %901 }
 0x1e5   : > { %v1797_v29 = vpop.eup %1796 }
 0x1ec   : > { %v905_v49 = vpop.xlane.xlu0 %904 }
 0x1f6   : > { %v908_v55 = vpop.xlane.xlu1 %907 }
 0x1fb   : > { %v911_v5 = vpop.xlane.xlu0 %910 }
 0x1fe   : > { %v914_v60 = vpop.xlane.xlu1 %913 }
 0x202   : > { %v920_v21 = vpop.xlane.xlu1 %919 }
 0x203   : > { %v917_v18 = vpop.xlane.xlu0 %916  ;;  %1798 = vrcp.f32 %v920_v21 }
 0x206   : > { %v926_v62 = vpop.xlane.xlu1 %925 }
 0x207   : > { %v923_v9 = vpop.xlane.xlu0 %922 }
 0x208   : > { %1800 = vrcp.f32 %v923_v9 }
 0x209   : > { %1802 = vrcp.f32 %v902_v41 }
 0x20a   : > { %1804 = vrcp.f32 %v905_v49  ;;  %v932_v63 = vpop.xlane.xlu1 %931 }
 0x20b   : > { %v929_v17 = vpop.xlane.xlu0 %928  ;;  %1806 = vrcp.f32 %v908_v55 }
 0x20c   : > { %1808 = vrcp.f32 %v926_v62 }
 0x20d   : > { %v1799_v4 = vpop.eup %1798  ;;  %1810 = vrcp.f32 %v929_v17 }
 0x20e   : > { %v938_v33 = vpop.xlane.xlu1 %937 }
 0x20f   : > { %v935_v44 = vpop.xlane.xlu0 %934 }
 0x212   : > { %v1801_v56 = vpop.eup %1800 }
 0x213   : > { %v1803_v25 = vpop.eup %1802  ;;  %v941_v46 = vpop.xlane.xlu0 %940 }
 0x214   : > { %v1805_v61 = vpop.eup %1804 }
 0x215   : > { %v1807_v52 = vpop.eup %1806 }
 0x216   : > { %v1809_v0 = vpop.eup %1808 }
 0x217   : > { %v1811_v32 = vpop.eup %1810 }
 0x221   : > { %v1639_v53 = vpop.f32.mrb[0].mxu0 }
 0x222   : > { %v1640_v51 = vpop.f32.mrb[1].mxu0 }
 0x223   : > { %v1641_v38 = vadd.f32 %v1640_v51, %v1639_v53  ;;  %v1642_v47 = vpop.f32.mrb[2].mxu0 }
 0x224   : > { %v1643_v36 = vpop.f32.mrb[3].mxu0 }
 0x225   : > { %v2855_v6 = vmul.f32 %v1795_v35, %v1641_v38  ;;  %v1644_v22 = vadd.f32 %v1643_v36, %v1642_v47 }
 0x227   : > { %v1231_v12 = vmin.f32 %v2855_v6, 0.0  ;;  %v2858_v11 = vmul.f32 %v1797_v29, %v1644_v22  ;;  %vm1215_vm1 = vcmp.gt.f32.partialorder %v2855_v6, 0.0 }
 0x229   : > { %v1247_v45 = vmul.f32 1.442695, %v1231_v12  ;;  %v1232_v28 = vmin.f32 %v2858_v11, 0.0  ;;  %vm1216_vm2 = vcmp.gt.f32.partialorder %v2858_v11, 0.0 }
 0x22b   : > { %1812 = vpow2.f32 %v1247_v45  ;;  %v1249_v48 = vmul.f32 1.442695, %v1232_v28 }
 0x22c   : > { %1814 = vrcp.f32 %v911_v5 }
 0x22d   : > { %1816 = vpow2.f32 %v1249_v48 }
 0x22e   : > { %v1663_v43 = vpop.f32.mrb[0].mxu1 }
 0x22f   : > { %v1664_v16 = vpop.f32.mrb[1].mxu1 }
 0x230   : > { %v1665_v10 = vadd.f32 %v1664_v16, %v1663_v43  ;;  %v1666_v54 = vpop.f32.mrb[2].mxu1 }
 0x231   : > { %v1667_v3 = vpop.f32.mrb[3].mxu1 }
 0x232   : > { %v2860_v19 = vmul.f32 %v1799_v4, %v1665_v10  ;;  %v1668_v15 = vadd.f32 %v1667_v3, %v1666_v54  ;;  %v1645_v40 = vpop.f32.mrb[4].mxu0 }
 0x233   : > { %v1646_v30 = vpop.f32.mrb[5].mxu0 }
 0x234   : > { %v1239_v50 = vmin.f32 %v2860_v19, 0.0  ;;  %v2864_v42 = vmul.f32 %v1801_v56, %v1668_v15  ;;  %v1647_v7 = vadd.f32 %v1646_v30, %v1645_v40  ;;  %v1648_v8 = vpop.f32.mrb[6].mxu0  ;;  %vm1223_vm3 = vcmp.gt.f32.partialorder %v2860_v19, 0.0 }
 0x235   : > { %v1649_v14 = vpop.f32.mrb[7].mxu0  ;;  %v1813_v49 = vpop.eup %1812 }
 0x236   : > { %v1263_v39 = vmul.f32 1.442695, %v1239_v50  ;;  %v1240_v13 = vmin.f32 %v2864_v42, 0.0  ;;  %v2867_v34 = vmul.f32 %v1803_v25, %v1647_v7  ;;  %v1650_v1 = vadd.f32 %v1649_v14, %v1648_v8  ;;  %v1815_v5 = vpop.eup %1814 }
 0x237   : > { %v1603_v21 = vadd.f32 -1.0, %v1813_v49  ;;  %v1817_v9 = vpop.eup %1816  ;;  %vm1224_vm4 = vcmp.gt.f32.partialorder %v2864_v42, 0.0 }
 0x238   : > { %1818 = vpow2.f32 %v1263_v39  ;;  %v1265_v24 = vmul.f32 1.442695, %v1240_v13  ;;  %v1233_v57 = vmin.f32 %v2867_v34, 0.0  ;;  %v2870_v58 = vmul.f32 %v1805_v61, %v1650_v1 }
 0x239   : > { %1820 = vrcp.f32 %v914_v60  ;;  %v2887_v35 = vsel %vm1215_vm1, %v2855_v6, %v1603_v21  ;;  %v1604_v36 = vadd.f32 -1.0, %v1817_v9  ;;  %vm1217_vm5 = vcmp.gt.f32.partialorder %v2867_v34, 0.0 }
 0x23a   : > { %1822 = vpow2.f32 %v1265_v24  ;;  %v1251_v37 = vmul.f32 1.442695, %v1233_v57  ;;  %v1234_v23 = vmin.f32 %v2870_v58, 0.0  ;;  %v1311_v29 = vmul.f32 %v2887_v35, %v2887_v35  ;;  %1424 = vst.msk [vmem:[%s2882_s26] sm:$0xff] %vm1327_vm0, %v2887_v35 }
 0x23b   : > { %v1669_v20 = vpop.f32.mrb[4].mxu1  ;;  %1824 = vrcp.f32 %v917_v18  ;;  %v2898_v17 = vsel %vm1216_vm2, %v2858_v11, %v1604_v36  ;;  %vm1218_vm6 = vcmp.gt.f32.partialorder %v2870_v58, 0.0 }
 0x23c   : > { %v1670_v31 = vpop.f32.mrb[5].mxu1  ;;  %1826 = vrcp.f32 %v932_v63  ;;  %v1253_v55 = vmul.f32 1.442695, %v1234_v23  ;;  %v1328_v45 = vsel %vm1327_vm0, %v1311_v29, 0.0  ;;  %v1312_v28 = vmul.f32 %v2898_v17, %v2898_v17  ;;  %1425 = vst.msk [vmem:[%s2882_s26 + $0x8] sm:$0xff] %vm1327_vm0, %v2898_v17 }
 0x23d   : > { %v1671_v2 = vadd.f32 %v1670_v31, %v1669_v20  ;;  %v1672_v27 = vpop.f32.mrb[6].mxu1  ;;  %1828 = vrcp.f32 %v938_v33  ;;  %1329 = vadd.xlane.f32.xlu1 %v1328_v45 }
 0x23e   : > { %v1673_v59 = vpop.f32.mrb[7].mxu1  ;;  %1830 = vrcp.f32 %v935_v44  ;;  %v1331_v7 = vsel %vm1327_vm0, %v1312_v28, 0.0 }
 0x23f   : > { %v2873_v26 = vmul.f32 %v1809_v0, %v1671_v2  ;;  %v1674_v41 = vadd.f32 %v1673_v59, %v1672_v27  ;;  %1832 = vpow2.f32 %v1251_v37  ;;  %1332 = vadd.xlane.f32.xlu0 %v1331_v7 }
 0x240   : > { %1834 = vrcp.f32 %v941_v46 }
 0x241   : > { %v1241_v60 = vmin.f32 %v2873_v26, 0.0  ;;  %v2876_v18 = vmul.f32 %v1811_v32, %v1674_v41  ;;  %1836 = vpow2.f32 %v1253_v55  ;;  %vm1225_vm7 = vcmp.gt.f32.partialorder %v2873_v26, 0.0 }
 0x242   : > { %v1651_v53 = vpop.f32.mrb[8].mxu0  ;;  %v1819_v51 = vpop.eup %1818 }
 0x243   : > { %v1267_v62 = vmul.f32 1.442695, %v1241_v60  ;;  %v1242_v38 = vmin.f32 %v2876_v18, 0.0  ;;  %v1652_v47 = vpop.f32.mrb[9].mxu0  ;;  %v2889_v43 = vpop.eup %1820  ;;  %v1611_v10 = vadd.f32 -1.0, %v1819_v51  ;;  %vm1226_vm8 = vcmp.gt.f32.partialorder %v2876_v18, 0.0 }
 0x244   : > { %v1653_v22 = vadd.f32 %v1652_v47, %v1651_v53  ;;  %v1654_v16 = vpop.f32.mrb[10].mxu0  ;;  %v1823_v54 = vpop.eup %1822 }
 0x245   : > { %1838 = vpow2.f32 %v1267_v62  ;;  %v1269_v4 = vmul.f32 1.442695, %v1242_v38  ;;  %v1655_v6 = vpop.f32.mrb[11].mxu0  ;;  %v2901_v12 = vpop.eup %1824  ;;  %v2912_v50 = vsel %vm1223_vm3, %v2860_v19, %v1611_v10  ;;  %v1612_v48 = vadd.f32 -1.0, %v1823_v54 }
 0x246   : > { %v2903_v3 = vmul.f32 %v1807_v52, %v1653_v22  ;;  %v1656_v15 = vadd.f32 %v1655_v6, %v1654_v16  ;;  %v1675_v56 = vpop.f32.mrb[8].mxu1  ;;  %v1827_v63 = vpop.eup %1826  ;;  %1432 = vst.msk [vmem:[%s2882_s26 + $0x40] sm:$0xff] %vm1327_vm0, %v2912_v50  ;;  %v1319_v25 = vmul.f32 %v2912_v50, %v2912_v50 }
 0x247   : > { %1840 = vpow2.f32 %v1269_v4  ;;  %v1676_v11 = vpop.f32.mrb[9].mxu1  ;;  %v2915_v40 = vpop.eup %1828  ;;  %v2927_v24 = vsel %vm1224_vm4, %v2864_v42, %v1612_v48 }
 0x248   : > { %v1235_v39 = vmin.f32 %v2903_v3, 0.0  ;;  %v2918_v13 = vmul.f32 %v1815_v5, %v1656_v15  ;;  %v1677_v30 = vadd.f32 %v1676_v11, %v1675_v56  ;;  %v1678_v44 = vpop.f32.mrb[10].mxu1  ;;  %v1831_v8 = vpop.eup %1830  ;;  %1433 = vst.msk [vmem:[%s2882_s26 + $0x48] sm:$0xff] %vm1327_vm0, %v2927_v24  ;;  %v1352_v42 = vsel %vm1327_vm0, %v1319_v25, 0.0 }
 0x249   : > { %v1679_v19 = vpop.f32.mrb[11].mxu1  ;;  %v1833_v14 = vpop.eup %1832  ;;  %v1320_v2 = vmul.f32 %v2927_v24, %v2927_v24  ;;  %1353 = vadd.xlane.f32.xlu1 %v1352_v42  ;;  %vm1219_vm9 = vcmp.gt.f32.partialorder %v2903_v3, 0.0 }
 0x24a   : > { %v1255_v1 = vmul.f32 1.442695, %v1235_v39  ;;  %v1236_v61 = vmin.f32 %v2918_v13, 0.0  ;;  %v2932_v33 = vmul.f32 %v1827_v63, %v1677_v30  ;;  %v1680_v20 = vadd.f32 %v1679_v19, %v1678_v44  ;;  %v1657_v57 = vpop.f32.mrb[12].mxu0  ;;  %v1835_v31 = vpop.eup %1834 }
 0x24b   : > { %v1658_v52 = vpop.f32.mrb[13].mxu0  ;;  %v1605_v27 = vadd.f32 -1.0, %v1833_v14  ;;  %v1837_v0 = vpop.eup %1836  ;;  %v1355_v49 = vsel %vm1327_vm0, %v1320_v2, 0.0  ;;  %vm1220_vm10 = vcmp.gt.f32.partialorder %v2918_v13, 0.0 }
 0x24c   : > { %1842 = vpow2.f32 %v1255_v1  ;;  %v1257_v46 = vmul.f32 1.442695, %v1236_v61  ;;  %v1243_v37 = vmin.f32 %v2932_v33, 0.0  ;;  %v2942_v23 = vmul.f32 %v1831_v8, %v1680_v20  ;;  %v1660_v59 = vpop.f32.mrb[14].mxu0  ;;  %1356 = vadd.xlane.f32.xlu0 %v1355_v49 }
 0x24d   : > { %v1659_v32 = vadd.f32 %v1658_v52, %v1657_v57  ;;  %v1661_v41 = vpop.f32.mrb[15].mxu0  ;;  %v2948_v55 = vsel %vm1217_vm5, %v2867_v34, %v1605_v27  ;;  %v1606_v5 = vadd.f32 -1.0, %v1837_v0  ;;  %vm1227_vm11 = vcmp.gt.f32.partialorder %v2932_v33, 0.0 }
 0x24e   : > { %1844 = vpow2.f32 %v1257_v46  ;;  %v1271_v60 = vmul.f32 1.442695, %v1243_v37  ;;  %v1244_v21 = vmin.f32 %v2942_v23, 0.0  ;;  %v1662_v9 = vadd.f32 %v1661_v41, %v1660_v59  ;;  %v1681_v53 = vpop.f32.mrb[12].mxu1  ;;  %1426 = vst.msk [vmem:[%s2882_s26 + $0x10] sm:$0xff] %vm1327_vm0, %v2948_v55 }
 0x24f   : > { %v1839_v51 = vpop.eup %1838  ;;  %v2955_v62 = vmul.f32 %v2889_v43, %v1659_v32  ;;  %v1682_v38 = vpop.f32.mrb[13].mxu1  ;;  %v1313_v34 = vmul.f32 %v2948_v55, %v2948_v55  ;;  %v2962_v47 = vsel %vm1218_vm6, %v2870_v58, %v1606_v5  ;;  %vm1228_vm12 = vcmp.gt.f32.partialorder %v2942_v23, 0.0 }
 0x250   : > { %1846 = vpow2.f32 %v1271_v60  ;;  %v1273_v36 = vmul.f32 1.442695, %v1244_v21  ;;  %v2966_v22 = vmul.f32 %v2901_v12, %v1662_v9  ;;  %v1683_v16 = vadd.f32 %v1682_v38, %v1681_v53  ;;  %v1684_v29 = vpop.f32.mrb[14].mxu1  ;;  %1427 = vst.msk [vmem:[%s2882_s26 + $0x18] sm:$0xff] %vm1327_vm0, %v2962_v47 }
 0x251   : > { %v1841_v43 = vpop.eup %1840  ;;  %v1237_v10 = vmin.f32 %v2955_v62, 0.0  ;;  %v1685_v54 = vpop.f32.mrb[15].mxu1  ;;  %v1334_v4 = vsel %vm1327_vm0, %v1313_v34, 0.0  ;;  %v1314_v58 = vmul.f32 %v2962_v47, %v2962_v47  ;;  %v1613_v6 = vadd.f32 -1.0, %v1839_v51 }
 0x252   : > { %1848 = vpow2.f32 %v1273_v36  ;;  %v1238_v12 = vmin.f32 %v2966_v22, 0.0  ;;  %v2977_v15 = vmul.f32 %v2915_v40, %v1683_v16  ;;  %v1686_v56 = vadd.f32 %v1685_v54, %v1684_v29  ;;  %1335 = vadd.xlane.f32.xlu1 %v1334_v4 }
 0x253   : > { %v1259_v45 = vmul.f32 1.442695, %v1237_v10  ;;  %v1337_v28 = vsel %vm1327_vm0, %v1314_v58, 0.0  ;;  %v2983_v63 = vsel %vm1225_vm7, %v2873_v26, %v1613_v6  ;;  %v1614_v11 = vadd.f32 -1.0, %v1841_v43 }
 0x254   : > { %v1261_v48 = vmul.f32 1.442695, %v1238_v12  ;;  %v1245_v39 = vmin.f32 %v2977_v15, 0.0  ;;  %v2986_v30 = vmul.f32 %v1835_v31, %v1686_v56  ;;  %1338 = vadd.xlane.f32.xlu0 %v1337_v28  ;;  %v1321_v40 = vmul.f32 %v2983_v63, %v2983_v63  ;;  %1434 = vst.msk [vmem:[%s2882_s26 + $0x50] sm:$0xff] %vm1327_vm0, %v2983_v63 }
 0x255   : > { %1850 = vpow2.f32 %v1259_v45  ;;  %v2996_v44 = vsel %vm1226_vm8, %v2876_v18, %v1614_v11  ;;  %vm1221_vm13 = vcmp.gt.f32.partialorder %v2955_v62, 0.0  ;;  %vm1222_vm14 = vcmp.gt.f32.partialorder %v2966_v22, 0.0 }
 0x256   : > { %v1843_v26 = vpop.eup %1842  ;;  %1852 = vpow2.f32 %v1261_v48  ;;  %v1275_v7 = vmul.f32 1.442695, %v1245_v39  ;;  %v1246_v8 = vmin.f32 %v2986_v30, 0.0  ;;  %v1358_v19 = vsel %vm1327_vm0, %v1321_v40, 0.0  ;;  %1435 = vst.msk [vmem:[%s2882_s26 + $0x58] sm:$0xff] %vm1327_vm0, %v2996_v44 }
 0x257   : > { %1359 = vadd.xlane.f32.xlu1 %v1358_v19  ;;  %v1322_v25 = vmul.f32 %v2996_v44, %v2996_v44  ;;  %v1607_v14 = vadd.f32 -1.0, %v1843_v26  ;;  %vm1229_vm15 = vcmp.gt.f32.partialorder %v2977_v15, 0.0  ;;  %vm1230_vm1 = vcmp.gt.f32.partialorder %v2986_v30, 0.0 }
 0x258   : > { %v1845_v1 = vpop.eup %1844  ;;  %1854 = vpow2.f32 %v1275_v7  ;;  %v1277_v18 = vmul.f32 1.442695, %v1246_v8 }
 0x259   : > { %v1361_v61 = vsel %vm1327_vm0, %v1322_v25, 0.0  ;;  %v3008_v20 = vsel %vm1219_vm9, %v2903_v3, %v1607_v14  ;;  %v1608_v57 = vadd.f32 -1.0, %v1845_v1 }
 0x25a   : > { %v1847_v31 = vpop.eup %1846  ;;  %1856 = vpow2.f32 %v1277_v18  ;;  %1362 = vadd.xlane.f32.xlu0 %v1361_v61  ;;  %v1315_v52 = vmul.f32 %v3008_v20, %v3008_v20  ;;  %1428 = vst.msk [vmem:[%s2882_s26 + $0x20] sm:$0xff] %vm1327_vm0, %v3008_v20 }
 0x25b   : > { %v3017_v42 = vsel %vm1220_vm10, %v2918_v13, %v1608_v57  ;;  %v1615_v2 = vadd.f32 -1.0, %v1847_v31 }
 0x25c   : > { %v1849_v27 = vpop.eup %1848  ;;  %v1340_v3 = vsel %vm1327_vm0, %v1315_v52, 0.0  ;;  %v1316_v0 = vmul.f32 %v3017_v42, %v3017_v42  ;;  %1429 = vst.msk [vmem:[%s2882_s26 + $0x28] sm:$0xff] %vm1327_vm0, %v3017_v42 }
 0x25d   : > { %1341 = vadd.xlane.f32.xlu1 %v1340_v3  ;;  %v3027_v46 = vsel %vm1227_vm11, %v2932_v33, %v1615_v2  ;;  %v1616_v37 = vadd.f32 -1.0, %v1849_v27 }
 0x25e   : > { %v1343_v13 = vsel %vm1327_vm0, %v1316_v0, 0.0  ;;  %v1323_v59 = vmul.f32 %v3027_v46, %v3027_v46  ;;  %1436 = vst.msk [vmem:[%s2882_s26 + $0x60] sm:$0xff] %vm1327_vm0, %v3027_v46 }
 0x25f   : > { %v1851_v32 = vpop.eup %1850  ;;  %1344 = vadd.xlane.f32.xlu0 %v1343_v13  ;;  %v3037_v41 = vsel %vm1228_vm12, %v2942_v23, %v1616_v37 }
 0x260   : > { %v1853_v49 = vpop.eup %1852  ;;  %v1364_v33 = vsel %vm1327_vm0, %v1323_v59, 0.0  ;;  %v1324_v5 = vmul.f32 %v3037_v41, %v3037_v41  ;;  %1437 = vst.msk [vmem:[%s2882_s26 + $0x68] sm:$0xff] %vm1327_vm0, %v3037_v41  ;;  %v1609_v60 = vadd.f32 -1.0, %v1851_v32 }
 0x261   : > { %1365 = vadd.xlane.f32.xlu1 %v1364_v33  ;;  %v1610_v21 = vadd.f32 -1.0, %v1853_v49 }
 0x262   : > { %v1855_v9 = vpop.eup %1854  ;;  %v1367_v53 = vsel %vm1327_vm0, %v1324_v5, 0.0  ;;  %v3048_v23 = vsel %vm1221_vm13, %v2955_v62, %v1609_v60 }
 0x263   : > { %1368 = vadd.xlane.f32.xlu0 %v1367_v53  ;;  %v1317_v51 = vmul.f32 %v3048_v23, %v3048_v23  ;;  %1430 = vst.msk [vmem:[%s2882_s26 + $0x30] sm:$0xff] %vm1327_vm0, %v3048_v23  ;;  %v3057_v38 = vsel %vm1222_vm14, %v2966_v22, %v1610_v21  ;;  %v1617_v34 = vadd.f32 -1.0, %v1855_v9 }
 0x264   : > { %v1857_v36 = vpop.eup %1856  ;;  %v1318_v62 = vmul.f32 %v3057_v38, %v3057_v38  ;;  %1431 = vst.msk [vmem:[%s2882_s26 + $0x38] sm:$0xff] %vm1327_vm0, %v3057_v38 }
 0x265   : > { %v1346_v16 = vsel %vm1327_vm0, %v1317_v51, 0.0  ;;  %v3067_v29 = vsel %vm1229_vm15, %v2977_v15, %v1617_v34  ;;  %v1618_v43 = vadd.f32 -1.0, %v1857_v36 }
 0x266   : > { %1347 = vadd.xlane.f32.xlu1 %v1346_v16  ;;  %v1349_v22 = vsel %vm1327_vm0, %v1318_v62, 0.0  ;;  %v1325_v10 = vmul.f32 %v3067_v29, %v3067_v29  ;;  %1438 = vst.msk [vmem:[%s2882_s26 + $0x70] sm:$0xff] %vm1327_vm0, %v3067_v29 }
 0x267   : > { %1350 = vadd.xlane.f32.xlu0 %v1349_v22  ;;  %v3077_v54 = vsel %vm1230_vm1, %v2986_v30, %v1618_v43 }
 0x268   : > { %v1370_v4 = vsel %vm1327_vm0, %v1325_v10, 0.0  ;;  %v1326_v58 = vmul.f32 %v3077_v54, %v3077_v54  ;;  %1439 = vst.msk [vmem:[%s2882_s26 + $0x78] sm:$0xff] %vm1327_vm0, %v3077_v54 }
 0x26a   : > { %1371 = vadd.xlane.f32.xlu1 %v1370_v4  ;;  %v1373_v6 = vsel %vm1327_vm0, %v1326_v58, 0.0 }
 0x26b   : > { %1374 = vadd.xlane.f32.xlu0 %v1373_v6 }
 0x2ca   : > { %v1330_v12 = vpop.xlane.xlu1 %1329 }
 0x2cb   : > { %v1376_v15 = vmax.f32 %v1330_v12, 1e-24 }
 0x2cc   : > { %v1333_v56 = vpop.xlane.xlu0 %1332 }
 0x2cd   : > { %1858 = vrsqrt.f32 %v1376_v15  ;;  %v1377_v45 = vmax.f32 %v1333_v56, 1e-24 }
 0x2cf   : > { %1860 = vrsqrt.f32 %v1377_v45 }
 0x2d6   : > { %v1354_v28 = vpop.xlane.xlu1 %1353 }
 0x2d7   : > { %v1384_v11 = vmax.f32 %v1354_v28, 1e-24  ;;  %v1859_v26 = vpop.eup %1858 }
 0x2d8   : > { %v1408_v8 = vmul.f32 %v1859_v26, %v2887_v35 }
 0x2d9   : > { %v1357_v48 = vpop.xlane.xlu0 %1356  ;;  %1862 = vrsqrt.f32 %v1384_v11  ;;  %v1861_v25 = vpop.eup %1860 }
 0x2da   : > { %v1385_v39 = vmax.f32 %v1357_v48, 1e-24  ;;  %1440 = vst.msk [vmem:[%s3090_s29] sm:$0xff] %vm1327_vm0, %v1408_v8  ;;  %v1409_v14 = vmul.f32 %v1861_v25, %v2898_v17 }
 0x2dc   : > { %1864 = vrsqrt.f32 %v1385_v39  ;;  %1441 = vst.msk [vmem:[%s3090_s29 + $0x8] sm:$0xff] %vm1327_vm0, %v1409_v14 }
 0x2df   : > { %v1336_v30 = vpop.xlane.xlu1 %1335 }
 0x2e0   : > { %v1378_v40 = vmax.f32 %v1336_v30, 1e-24 }
 0x2e1   : > { %v1339_v7 = vpop.xlane.xlu0 %1338 }
 0x2e2   : > { %1866 = vrsqrt.f32 %v1378_v40  ;;  %v1379_v19 = vmax.f32 %v1339_v7, 1e-24 }
 0x2e3   : > { %v1863_v61 = vpop.eup %1862 }
 0x2e4   : > { %1868 = vrsqrt.f32 %v1379_v19  ;;  %v1360_v1 = vpop.xlane.xlu1 %1359  ;;  %v1416_v57 = vmul.f32 %v1863_v61, %v2912_v50 }
 0x2e5   : > { %v1386_v18 = vmax.f32 %v1360_v1, 1e-24 }
 0x2e6   : > { %v1865_v35 = vpop.eup %1864  ;;  %1448 = vst.msk [vmem:[%s3090_s29 + $0x40] sm:$0xff] %vm1327_vm0, %v1416_v57 }
 0x2e7   : > { %1870 = vrsqrt.f32 %v1386_v18  ;;  %v1363_v31 = vpop.xlane.xlu0 %1362  ;;  %v1417_v2 = vmul.f32 %v1865_v35, %v2927_v24 }
 0x2e8   : > { %v1387_v52 = vmax.f32 %v1363_v31, 1e-24 }
 0x2e9   : > { %1449 = vst.msk [vmem:[%s3090_s29 + $0x48] sm:$0xff] %vm1327_vm0, %v1417_v2 }
 0x2ea   : > { %1872 = vrsqrt.f32 %v1387_v52  ;;  %v1342_v27 = vpop.xlane.xlu1 %1341 }
 0x2eb   : > { %v1380_v17 = vmax.f32 %v1342_v27, 1e-24 }
 0x2ec   : > { %v1867_v3 = vpop.eup %1866  ;;  %v1345_v0 = vpop.xlane.xlu0 %1344 }
 0x2ed   : > { %v1410_v37 = vmul.f32 %v1867_v3, %v2948_v55  ;;  %1874 = vrsqrt.f32 %v1380_v17  ;;  %v1381_v50 = vmax.f32 %v1345_v0, 1e-24 }
 0x2ee   : > { %v1869_v13 = vpop.eup %1868  ;;  %v1366_v59 = vpop.xlane.xlu1 %1365 }
 0x2ef   : > { %1442 = vst.msk [vmem:[%s3090_s29 + $0x10] sm:$0xff] %vm1327_vm0, %v1410_v37  ;;  %v1411_v32 = vmul.f32 %v1869_v13, %v2962_v47  ;;  %1876 = vrsqrt.f32 %v1381_v50  ;;  %v1388_v24 = vmax.f32 %v1366_v59, 1e-24 }
 0x2f0   : > { %v1369_v49 = vpop.xlane.xlu0 %1368 }
 0x2f1   : > { %v1871_v33 = vpop.eup %1870  ;;  %1443 = vst.msk [vmem:[%s3090_s29 + $0x18] sm:$0xff] %vm1327_vm0, %v1411_v32  ;;  %1878 = vrsqrt.f32 %v1388_v24  ;;  %v1389_v5 = vmax.f32 %v1369_v49, 1e-24 }
 0x2f2   : > { %v1418_v55 = vmul.f32 %v1871_v33, %v2983_v63 }
 0x2f3   : > { %1880 = vrsqrt.f32 %v1389_v5  ;;  %v1348_v60 = vpop.xlane.xlu1 %1347 }
 0x2f4   : > { %v1873_v21 = vpop.eup %1872  ;;  %1450 = vst.msk [vmem:[%s3090_s29 + $0x50] sm:$0xff] %vm1327_vm0, %v1418_v55  ;;  %v1382_v9 = vmax.f32 %v1348_v60, 1e-24  ;;  %v1351_v53 = vpop.xlane.xlu0 %1350 }
 0x2f5   : > { %v1419_v47 = vmul.f32 %v1873_v21, %v2996_v44  ;;  %v1383_v51 = vmax.f32 %v1351_v53, 1e-24 }
 0x2f6   : > { %1882 = vrsqrt.f32 %v1382_v9 }
 0x2f7   : > { %v1875_v34 = vpop.eup %1874  ;;  %1451 = vst.msk [vmem:[%s3090_s29 + $0x58] sm:$0xff] %vm1327_vm0, %v1419_v47  ;;  %1884 = vrsqrt.f32 %v1383_v51  ;;  %v1372_v36 = vpop.xlane.xlu1 %1371 }
 0x2f8   : > { %v1412_v63 = vmul.f32 %v1875_v34, %v3008_v20  ;;  %v1390_v62 = vmax.f32 %v1372_v36, 1e-24  ;;  %v1375_v16 = vpop.xlane.xlu0 %1374 }
 0x2f9   : > { %v1877_v43 = vpop.eup %1876  ;;  %v1391_v22 = vmax.f32 %v1375_v16, 1e-24 }
 0x2fa   : > { %1444 = vst.msk [vmem:[%s3090_s29 + $0x20] sm:$0xff] %vm1327_vm0, %v1412_v63  ;;  %v1413_v44 = vmul.f32 %v1877_v43, %v3017_v42  ;;  %1886 = vrsqrt.f32 %v1390_v62 }
 0x2fb   : > { %v1879_v10 = vpop.eup %1878  ;;  %1888 = vrsqrt.f32 %v1391_v22 }
 0x2fc   : > { %1445 = vst.msk [vmem:[%s3090_s29 + $0x28] sm:$0xff] %vm1327_vm0, %v1413_v44  ;;  %v1420_v4 = vmul.f32 %v1879_v10, %v3027_v46 }
 0x2fd   : > { %v1881_v20 = vpop.eup %1880 }
 0x2fe   : > { %1452 = vst.msk [vmem:[%s3090_s29 + $0x60] sm:$0xff] %vm1327_vm0, %v1420_v4  ;;  %v1421_v58 = vmul.f32 %v1881_v20, %v3037_v41 }
 0x300   : > { %v1883_v6 = vpop.eup %1882  ;;  %1453 = vst.msk [vmem:[%s3090_s29 + $0x68] sm:$0xff] %vm1327_vm0, %v1421_v58 }
 0x301   : > { %v1885_v12 = vpop.eup %1884  ;;  %v1414_v42 = vmul.f32 %v1883_v6, %v3048_v23 }
 0x302   : > { %v1415_v15 = vmul.f32 %v1885_v12, %v3057_v38 }
 0x303   : > { %1446 = vst.msk [vmem:[%s3090_s29 + $0x30] sm:$0xff] %vm1327_vm0, %v1414_v42 }
 0x304   : > { %v1887_v56 = vpop.eup %1886  ;;  %1447 = vst.msk [vmem:[%s3090_s29 + $0x38] sm:$0xff] %vm1327_vm0, %v1415_v15 }
 0x305   : > { %v1889_v46 = vpop.eup %1888  ;;  %v1422_v45 = vmul.f32 %v1887_v56, %v3067_v29 }
 0x306   : > { %v1423_v28 = vmul.f32 %v1889_v46, %v3077_v54 }
 0x307   : > { %1454 = vst.msk [vmem:[%s3090_s29 + $0x70] sm:$0xff] %vm1327_vm0, %v1422_v45 }
 0x308   : > { %1455 = vst.msk [vmem:[%s3090_s29 + $0x78] sm:$0xff] %vm1327_vm0, %v1423_v28 }
 0x309 PF: > { %s17_s21 = sadd.s32 1, %s1896_s21  }
 0x30a   : > { %p14_p4 = scmp.ge.s32.totalorder %s17_s21, 4  }
 0x30c   :  { %16 = sbr.rel (!%p14_p4) target bundleno = 1 (0x1), region = 88 }

// kernel: daegc_forward.8
= control target key start
LH: loop header
LB: loop body
LE: loop exit
PB: predicated region body
PF: predicated region fallthrough
CT: control target
= control target key end

     0   :  { %s1836_s18 = smov 0   ;;  %s3004_s0 = inlined_call_operand.vmem [shape: f32[256,1], index: 0, kind: input, shape index: {}]   ;;  %s3005_s1 = inlined_call_operand.vmem [shape: f32[1,256], index: 1, kind: input, shape index: {}]   ;;  %s3006_s2 = inlined_call_operand.vmem [shape: bf16[256,32], index: 2, kind: input, shape index: {}]   ;;  %s3007_s3 = inlined_call_operand.vmem [shape: bf16[256,256], index: 3, kind: input, shape index: {}]   ;;  %s3008_s4 = inlined_call_operand.vmem [shape: bf16[256,256], index: 4, kind: input, shape index: {}]   ;;  %s3009_s5 = inlined_call_operand.vmem [shape: f32[256,32], index: 5, kind: output, shape index: {}]  }
   0x1 LB: > { %s1479_s19 = sadd.s32 4294967295, %s1803_s18   ;;  %p1483_p0 = scmp.ge.s32.totalorder %s1803_s18, 1  ;;  %s1803_s18 = sphi %s1836_s18, %s15_s18  }
   0x2   : > { %p212_p1 = scmp.lt.s32.totalorder %s1803_s18, 3 }
   0x4   : > { %p213_p2 = pnand %p1483_p0, %p212_p1 }
   0x6   : > { %216 = sbr.rel (%p213_p2) target bundleno = 779 (0x30b), region = 40 }
   0xd   : > { %s1484_s20 = sshll.u32 %s1479_s19, 4  ;;  %v1805_v0 = vmov 0   ;;  %v1621_v49 = vld [vmem:[%s3006_s2 + $0x40] sm:$0xff]   ;;  %v1623_v51 = vld [vmem:[%s3006_s2 + $0x48] sm:$0xff]   ;;  %v1625_v53 = vld [vmem:[%s3006_s2 + $0x50] sm:$0xff]   ;;  %v379_v55 = vlaneseq }
   0xe   : > { %1620 = vset.pattern.permute.xlu1 %v1805_v0  ;;  %1619 = vset.pattern.permute.xlu0 %v1805_v0  ;;  %p253_p3 = scmp.lt.s32.totalorder %s1484_s20, 31  ;;  %v1622_v50 = vld [vmem:[%s3006_s2] sm:$0xff]   ;;  %v1624_v52 = vld [vmem:[%s3006_s2 + $0x8] sm:$0xff]   ;;  %v1626_v54 = vld [vmem:[%s3006_s2 + $0x10] sm:$0xff]  }
   0xf   : > { %1530 = vmatprep.subr.bf16.mxu0 %v1621_v49  ;;  %1594 = vmatprep.subr.bf16.mxu1 %v1621_v49  ;;  %v380_v56 = vshrl.u32 %v379_v55, 7  ;;  %v297_v59 = vld [vmem:[%s3005_s1] sm:$0x3] }
  0x10   : > { %s3142_s20 = smov (!%p253_p3, %s1484_s20), 31  ;;  %1531 = vmatpush3.bf16.msra.mxu0 %v1622_v50  ;;  %1602 = vmatpush3.bf16.msra.mxu1 %v1622_v50 }
  0x11   : > { %s1846_s21 = sshll.u32 %s3142_s20, 3  ;;  %1532 = vmatprep.subr.bf16.mxu0 %v1623_v51  ;;  %1595 = vmatprep.subr.bf16.mxu1 %v1623_v51  ;;  %v381_v57 = vsub.s32 0, %v380_v56  ;;  %v385_v58 = vsub.s32 1, %v380_v56 }
  0x12   : > { %s1852_s24 = scalar_lea.vmem %s3004_s0, %s1846_s21  ;;  %s1862_s27 = scalar_lea.vmem %s3007_s3, %s1846_s21 }
  0x13   : > { %v289_v1 = vld [vmem:[%s1852_s24 + $0x40] sm:$0xff]  ;;  %v290_v3 = vld [vmem:[%s1852_s24 + $0x48] sm:$0xff]  ;;  %v284_v5 = vld [vmem:[%s1852_s24 + $0x18] sm:$0xff]  ;;  %s1962_s17 = scalar_lea.vmem %s3008_s4, %s1846_s21  ;;  %s2951_s20 = scalar_lea.vmem %s3009_s5, %s1846_s21 }
  0x14   : > { %v281_v2 = vld [vmem:[%s1852_s24] sm:$0xff]  ;;  %340 = vperm.xlu1 %1620, %v289_v1   ;;  %v282_v4 = vld [vmem:[%s1852_s24 + $0x8] sm:$0xff]  ;;  %v283_v6 = vld [vmem:[%s1852_s24 + $0x10] sm:$0xff]  ;;  %1533 = vmatpush3.bf16.msra.mxu0 %v1624_v52  ;;  %v1981_v1 = vrot.slane %v297_v59, %v385_v58 }
  0x15   : > { %300 = vperm.xlu0 %1619, %v281_v2   ;;  %v565_v7 = vld [vmem:[%s1862_s27] sm:$0xff]  ;;  %v292_v8 = vld [vmem:[%s1852_s24 + $0x58] sm:$0xff]  ;;  %v291_v9 = vld [vmem:[%s1852_s24 + $0x50] sm:$0xff]  ;;  %1603 = vmatpush3.bf16.msra.mxu1 %v1624_v52 }
  0x16   : > { %vm581_vm0 = vcmp.gt.bf16.partialorder %v565_v7, 0  ;;  %v573_v11 = vld [vmem:[%s1862_s27 + $0x40] sm:$0xff]  ;;  %v566_v13 = vld [vmem:[%s1862_s27 + $0x8] sm:$0xff]  ;;  %v567_v21 = vld [vmem:[%s1862_s27 + $0x10] sm:$0xff]  ;;  %1534 = vmatprep.subr.bf16.mxu0 %v1625_v53  ;;  %1596 = vmatprep.subr.bf16.mxu1 %v1625_v53 }
  0x17   : > { %v1870_v10 = vsel %vm581_vm0, 65537, %v1805_v0  ;;  %vm589_vm1 = vcmp.gt.bf16.partialorder %v573_v11, 0  ;;  %v286_v14 = vld [vmem:[%s1852_s24 + $0x28] sm:$0xff]  ;;  %v285_v15 = vld [vmem:[%s1852_s24 + $0x20] sm:$0xff]  ;;  %vm582_vm2 = vcmp.gt.bf16.partialorder %v566_v13, 0  ;;  %vm583_vm4 = vcmp.gt.bf16.partialorder %v567_v21, 0 }
  0x18   : > { %345 = vperm.xlu1 %1620, %v290_v3   ;;  %v1874_v12 = vsel %vm589_vm1, 65537, %v1805_v0  ;;  %v1880_v16 = vsel %vm582_vm2, 65537, %v1805_v0  ;;  %v574_v17 = vld [vmem:[%s1862_s27 + $0x48] sm:$0xff]  ;;  %v293_v19 = vld [vmem:[%s1852_s24 + $0x60] sm:$0xff]  ;;  %v288_v22 = vld [vmem:[%s1852_s24 + $0x38] sm:$0xff]  ;;  %v1892_v24 = vsel %vm583_vm4, 65537, %v1805_v0  ;;  %1535 = vmatpush3.bf16.msra.mxu0 %v1626_v54 }
  0x19   : > { %305 = vperm.xlu0 %1619, %v282_v4   ;;  %vm590_vm3 = vcmp.gt.bf16.partialorder %v574_v17, 0  ;;  %v294_v18 = vld [vmem:[%s1852_s24 + $0x68] sm:$0xff]  ;;  %v287_v23 = vld [vmem:[%s1852_s24 + $0x30] sm:$0xff]  ;;  %v568_v25 = vld [vmem:[%s1862_s27 + $0x18] sm:$0xff]  ;;  %1604 = vmatpush3.bf16.msra.mxu1 %v1626_v54 }
  0x1a   : > { %v1886_v20 = vsel %vm590_vm3, 65537, %v1805_v0  ;;  %vm584_vm5 = vcmp.gt.bf16.partialorder %v568_v25, 0  ;;  %v296_v26 = vld [vmem:[%s1852_s24 + $0x78] sm:$0xff]  ;;  %v295_v27 = vld [vmem:[%s1852_s24 + $0x70] sm:$0xff]  ;;  %v569_v33 = vld [vmem:[%s1862_s27 + $0x20] sm:$0xff] }
  0x1b   : > { %v1898_v28 = vsel %vm584_vm5, 65537, %v1805_v0  ;;  %v575_v29 = vld [vmem:[%s1862_s27 + $0x50] sm:$0xff]  ;;  %v576_v30 = vld [vmem:[%s1862_s27 + $0x58] sm:$0xff]  ;;  %vm585_vm8 = vcmp.gt.bf16.partialorder %v569_v33, 0  ;;  %v570_v34 = vld [vmem:[%s1862_s27 + $0x28] sm:$0xff] }
  0x1c   : > { %315 = vperm.xlu1 %1620, %v284_v5   ;;  %vm591_vm6 = vcmp.gt.bf16.partialorder %v575_v29, 0  ;;  %vm592_vm7 = vcmp.gt.bf16.partialorder %v576_v30, 0  ;;  %v1911_v35 = vsel %vm585_vm8, 65537, %v1805_v0  ;;  %vm586_vm9 = vcmp.gt.bf16.partialorder %v570_v34, 0  ;;  %v577_v37 = vld [vmem:[%s1862_s27 + $0x60] sm:$0xff]  ;;  %v578_v38 = vld [vmem:[%s1862_s27 + $0x68] sm:$0xff] }
  0x1d   : > { %310 = vperm.xlu0 %1619, %v283_v6   ;;  %v1903_v31 = vsel %vm591_vm6, 65537, %v1805_v0  ;;  %v1906_v32 = vsel %vm592_vm7, 65537, %v1805_v0  ;;  %v1914_v36 = vsel %vm586_vm9, 65537, %v1805_v0  ;;  %vm593_vm10 = vcmp.gt.bf16.partialorder %v577_v37, 0  ;;  %v571_v41 = vld [vmem:[%s1862_s27 + $0x30] sm:$0xff]  ;;  %v572_v42 = vld [vmem:[%s1862_s27 + $0x38] sm:$0xff] }
  0x1e   : > { %vm594_vm11 = vcmp.gt.bf16.partialorder %v578_v38, 0  ;;  %v1919_v39 = vsel %vm593_vm10, 65537, %v1805_v0  ;;  %vm587_vm12 = vcmp.gt.bf16.partialorder %v571_v41, 0  ;;  %vm588_vm13 = vcmp.gt.bf16.partialorder %v572_v42, 0  ;;  %v579_v45 = vld [vmem:[%s1862_s27 + $0x70] sm:$0xff]  ;;  %v580_v46 = vld [vmem:[%s1862_s27 + $0x78] sm:$0xff] }
  0x1f   : > { %v1922_v40 = vsel %vm594_vm11, 65537, %v1805_v0  ;;  %v1927_v43 = vsel %vm587_vm12, 65537, %v1805_v0  ;;  %v1930_v44 = vsel %vm588_vm13, 65537, %v1805_v0  ;;  %vm595_vm14 = vcmp.gt.bf16.partialorder %v579_v45, 0  ;;  %v1968_v60 = vld [vmem:[%s1962_s17 + $0x40] sm:$0xff]  ;;  %v1974_v62 = vld [vmem:[%s1962_s17 + $0x48] sm:$0xff] }
  0x20   : > { %355 = vperm.xlu1 %1620, %v292_v8   ;;  %vm596_vm15 = vcmp.gt.bf16.partialorder %v580_v46, 0  ;;  %v1935_v47 = vsel %vm595_vm14, 65537, %v1805_v0  ;;  %v1971_v61 = vld [vmem:[%s1962_s17] sm:$0xff]  ;;  %v1977_v63 = vld [vmem:[%s1962_s17 + $0x8] sm:$0xff]  ;;  %v1984_v2 = vld [vmem:[%s1962_s17 + $0x18] sm:$0xff]  ;;  %v453_v4 = vunpack.c.l.bf16 %v1968_v60  ;;  %v454_v5 = vunpack.c.h.bf16 %v1968_v60 }
  0x21   : > { %350 = vperm.xlu0 %1619, %v291_v9   ;;  %v1938_v48 = vsel %vm596_vm15, 65537, %v1805_v0  ;;  %v1979_v0 = vrot.slane %v297_v59, %v381_v57  ;;  %v1987_v3 = vld [vmem:[%s1962_s17 + $0x10] sm:$0xff]  ;;  %v437_v6 = vunpack.c.l.bf16 %v1971_v61  ;;  %v438_v7 = vunpack.c.h.bf16 %v1971_v61  ;;  %v2010_v25 = vld [vmem:[%s1962_s17 + $0x28] sm:$0xff]  ;;  %v2015_v29 = vld [vmem:[%s1962_s17 + $0x20] sm:$0xff] }
  0x22   : > { %v455_v8 = vunpack.c.l.bf16 %v1974_v62  ;;  %v456_v9 = vunpack.c.h.bf16 %v1974_v62  ;;  %v439_v11 = vunpack.c.l.bf16 %v1977_v63  ;;  %v440_v13 = vunpack.c.h.bf16 %v1977_v63  ;;  %v2005_v21 = vld [vmem:[%s1962_s17 + $0x50] sm:$0xff]  ;;  %v2022_v38 = vld [vmem:[%s1962_s17 + $0x68] sm:$0xff]  ;;  %v2029_v45 = vld [vmem:[%s1962_s17 + $0x60] sm:$0xff] }
  0x23   : > { %v444_v17 = vunpack.c.h.bf16 %v1984_v2  ;;  %v615_v34 = vunpack.c.l.b16 %v1880_v16  ;;  %v616_v37 = vunpack.c.h.b16 %v1880_v16  ;;  %v2036_v52 = vld [vmem:[%s1962_s17 + $0x38] sm:$0xff]  ;;  %v2043_v57 = vld [vmem:[%s1962_s17 + $0x30] sm:$0xff]  ;;  %v3054_v42 = vunpack.c.l.bf16 %v2010_v25 }
  0x24   : > { %325 = vperm.xlu1 %1620, %v286_v14   ;;  %v1998_v14 = vld [vmem:[%s1962_s17 + $0x58] sm:$0xff] }
  0x25   : > { %320 = vperm.xlu0 %1619, %v285_v15   ;;  %v443_v15 = vunpack.c.l.bf16 %v1984_v2  ;;  %v2050_v49 = vld [vmem:[%s1962_s17 + $0x78] sm:$0xff]  ;;  %vm2121_vm4 = vcmp.ne.s32.totalorder %v615_v34, 0  ;;  %vm2135_vm5 = vcmp.ne.s32.totalorder %v616_v37, 0  ;;  %v3061_v34 = vunpack.c.h.b16 %v1903_v31 }
  0x27   : > { %vm2303_vm13 = vcmp.ne.s32.totalorder %v3061_v34, 0 }
  0x28   : > { %365 = vperm.xlu1 %1620, %v294_v18   ;;  %v441_v18 = vunpack.c.l.bf16 %v1987_v3 }
  0x29   : > { %360 = vperm.xlu0 %1619, %v293_v19  }
  0x2c   : > { %335 = vperm.xlu1 %1620, %v288_v22   ;;  %v613_v22 = vunpack.c.l.b16 %v1870_v10 }
  0x2d   : > { %330 = vperm.xlu0 %1619, %v287_v23   ;;  %v614_v23 = vunpack.c.h.b16 %v1870_v10  ;;  %v2057_v10 = vld [vmem:[%s1962_s17 + $0x70] sm:$0xff] }
  0x2e   : > { %vm2071_vm0 = vcmp.ne.s32.totalorder %v613_v22, 0 }
  0x2f   : > { %vm2083_vm1 = vcmp.ne.s32.totalorder %v614_v23, 0 }
  0x30   : > { %375 = vperm.xlu1 %1620, %v296_v26   ;;  %v629_v26 = vunpack.c.l.b16 %v1874_v12 }
  0x31   : > { %370 = vperm.xlu0 %1619, %v295_v27   ;;  %v630_v27 = vunpack.c.h.b16 %v1874_v12  ;;  %v631_v12 = vunpack.c.l.b16 %v1886_v20 }
  0x32   : > { %vm2087_vm2 = vcmp.ne.s32.totalorder %v629_v26, 0 }
  0x33   : > { %vm2091_vm3 = vcmp.ne.s32.totalorder %v630_v27, 0  ;;  %vm2167_vm6 = vcmp.ne.s32.totalorder %v631_v12, 0 }
  0x93   : > { %v341_v30 = vpop.permute.xlu1 %340 }
  0x94   : > { %v301_v50 = vpop.permute.xlu0 %300  ;;  %v405_v56 = vadd.f32 %v1979_v0, %v341_v30  ;;  %v406_v58 = vadd.f32 %v1981_v1, %v341_v30 }
  0x95   : > { %v389_v59 = vadd.f32 %v1979_v0, %v301_v50  ;;  %v390_v54 = vadd.f32 %v1981_v1, %v301_v50 }
  0x96   : > { %v485_v23 = vmul.f32 %v453_v4, %v405_v56  ;;  %v486_v26 = vmul.f32 %v454_v5, %v406_v58 }
  0x97   : > { %v469_v27 = vmul.f32 %v437_v6, %v389_v59  ;;  %v470_v55 = vmul.f32 %v438_v7, %v390_v54  ;;  %v346_v19 = vpop.permute.xlu1 %345 }
  0x98   : > { %v306_v41 = vpop.permute.xlu0 %305  ;;  %v517_v4 = vmul.f32 0.2, %v485_v23  ;;  %v518_v56 = vmul.f32 0.2, %v486_v26  ;;  %v407_v5 = vadd.f32 %v1979_v0, %v346_v19  ;;  %v408_v6 = vadd.f32 %v1981_v1, %v346_v19 }
  0x99   : > { %v501_v60 = vmul.f32 0.2, %v469_v27  ;;  %v502_v58 = vmul.f32 0.2, %v470_v55  ;;  %v391_v61 = vadd.f32 %v1979_v0, %v306_v41  ;;  %v392_v7 = vadd.f32 %v1981_v1, %v306_v41 }
  0x9a   : > { %v2117_v54 = vmul.f32 %v455_v8, %v407_v5  ;;  %v549_v50 = vmax.f32 %v485_v23, %v517_v4  ;;  %v550_v33 = vmax.f32 %v486_v26, %v518_v56  ;;  %v2127_v19 = vmul.f32 %v456_v9, %v408_v6 }
  0x9b   : > { %v533_v59 = vmax.f32 %v469_v27, %v501_v60  ;;  %v471_v41 = vmul.f32 %v439_v11, %v391_v61  ;;  %v472_v8 = vmul.f32 %v440_v13, %v392_v7  ;;  %v316_v5 = vpop.permute.xlu1 %315  ;;  %v534_v23 = vmax.f32 %v470_v55, %v502_v58 }
  0x9c   : > { %v311_v27 = vpop.permute.xlu0 %310  ;;  %v2140_v26 = vmul.f32 0.2, %v2117_v54  ;;  %v395_v62 = vadd.f32 %v1979_v0, %v316_v5  ;;  %v396_v9 = vadd.f32 %v1981_v1, %v316_v5  ;;  %v2146_v63 = vmul.f32 0.2, %v2127_v19 }
  0x9d   : > { %v393_v11 = vadd.f32 %v1979_v0, %v311_v27  ;;  %v503_v13 = vmul.f32 0.2, %v471_v41  ;;  %v504_v55 = vmul.f32 0.2, %v472_v8  ;;  %v394_v16 = vadd.f32 %v1981_v1, %v311_v27 }
  0x9e   : > { %v2151_v37 = vmul.f32 %v443_v15, %v395_v62  ;;  %v2155_v4 = vmul.f32 %v444_v17, %v396_v9  ;;  %v2163_v60 = vsel %vm2071_vm0, %v533_v59, -9e+15  ;;  %v3031_v15 = vunpack.c.h.b16 %v1886_v20 }
  0x9f   : > { %v2159_v56 = vmul.f32 %v441_v18, %v393_v11  ;;  %v3034_v17 = vunpack.c.h.bf16 %v1987_v3  ;;  %v356_v6 = vpop.permute.xlu1 %355  ;;  %v2183_v51 = vsel %vm2083_vm1, %v534_v23, -9e+15  ;;  %v2187_v12 = vsel %vm2087_vm2, %v549_v50, -9e+15 }
  0xa0   : > { %vm2173_vm7 = vcmp.ne.s32.totalorder %v3031_v15, 0  ;;  %3035 = vst [vmem:[#allocation2_spill] sm:$0xff] %v2183_v51  ;;  %v351_v61 = vpop.permute.xlu0 %350  ;;  %v2191_v20 = vsel %vm2091_vm3, %v550_v33, -9e+15  ;;  %v2194_v7 = vmul.f32 0.2, %v2151_v37  ;;  %v411_v22 = vadd.f32 %v1979_v0, %v356_v6 }
  0xa1   : > { %v2179_v18 = vmul.f32 %v3034_v17, %v394_v16  ;;  %3036 = vst [vmem:[#allocation3_spill] sm:$0xff] %v2191_v20  ;;  %v2197_v3 = vmul.f32 0.2, %v2155_v4  ;;  %v2200_v59 = vmul.f32 0.2, %v2159_v56  ;;  %v412_v53 = vadd.f32 %v1981_v1, %v356_v6 }
  0xa2   : > { %v709_v33 = vmax.f32 %v2163_v60, %v2183_v51  ;;  %v409_v46 = vadd.f32 %v1979_v0, %v351_v61  ;;  %v3037_v50 = vunpack.c.l.b16 %v1892_v24  ;;  %v3040_v23 = vunpack.c.l.bf16 %v1998_v14 }
  0xa3   : > { %v2204_v5 = vmul.f32 0.2, %v2179_v18  ;;  %v410_v9 = vadd.f32 %v1981_v1, %v351_v61  ;;  %v733_v11 = vmax.f32 %v2187_v12, %v2191_v20  ;;  %v535_v16 = vmax.f32 %v471_v41, %v503_v13  ;;  %v326_v61 = vpop.permute.xlu1 %325 }
  0xa4   : > { %vm2212_vm8 = vcmp.ne.s32.totalorder %v3037_v50, 0  ;;  %v2218_v62 = vmul.f32 %v3040_v23, %v411_v22  ;;  %v3041_v15 = vunpack.c.h.b16 %v1892_v24  ;;  %v3044_v6 = vunpack.c.h.bf16 %v1998_v14  ;;  %710 = vmax.xlane.f32.xlu0 %v709_v33  ;;  %v321_v51 = vpop.permute.xlu0 %320 }
  0xa5   : > { %v3045_v22 = vunpack.c.l.bf16 %v2005_v21  ;;  %v536_v30 = vmax.f32 %v472_v8, %v504_v55  ;;  %v551_v41 = vmax.f32 %v2117_v54, %v2140_v26  ;;  %v3046_v13 = vunpack.c.h.bf16 %v2005_v21 }
  0xa6   : > { %vm2225_vm9 = vcmp.ne.s32.totalorder %v3041_v15, 0  ;;  %v2231_v50 = vmul.f32 %v3044_v6, %v412_v53  ;;  %v2240_v24 = vmul.f32 0.2, %v2218_v62  ;;  %v399_v14 = vadd.f32 %v1979_v0, %v326_v61 }
  0xa7   : > { %v2235_v23 = vmul.f32 %v3045_v22, %v409_v46  ;;  %v2244_v15 = vmul.f32 %v3046_v13, %v410_v9  ;;  %v400_v53 = vadd.f32 %v1981_v1, %v326_v61  ;;  %v2256_v54 = vsel %vm2121_vm4, %v535_v16, -9e+15 }
  0xa8   : > { %v2249_v33 = vmul.f32 0.2, %v2231_v50  ;;  %3047 = vst [vmem:[#allocation4_spill] sm:$0xff] %v2256_v54  ;;  %v397_v26 = vadd.f32 %v1979_v0, %v321_v51  ;;  %v3048_v21 = vunpack.c.l.b16 %v1898_v28  ;;  %v3051_v46 = vunpack.c.h.b16 %v1898_v28  ;;  %734 = vmax.xlane.f32.xlu0 %v733_v11 }
  0xa9   : > { %v2252_v8 = vmul.f32 0.2, %v2235_v23  ;;  %v2272_v6 = vmul.f32 0.2, %v2244_v15  ;;  %v2276_v16 = vmul.f32 %v3054_v42, %v399_v14  ;;  %v3055_v22 = vunpack.c.h.bf16 %v2010_v25  ;;  %v366_v42 = vpop.permute.xlu1 %365 }
  0xaa   : > { %vm2261_vm10 = vcmp.ne.s32.totalorder %v3048_v21, 0  ;;  %vm2267_vm11 = vcmp.ne.s32.totalorder %v3051_v46, 0  ;;  %v2284_v13 = vsel %vm2135_vm5, %v536_v30, -9e+15  ;;  %v3057_v28 = vunpack.c.l.b16 %v1903_v31 }
  0xab   : > { %v2280_v61 = vmul.f32 %v3055_v22, %v400_v53  ;;  %3056 = vst [vmem:[#allocation5_spill] sm:$0xff] %v2284_v13  ;;  %v712_v46 = vmax.f32 %v2256_v54, %v2284_v13  ;;  %v398_v14 = vadd.f32 %v1981_v1, %v321_v51  ;;  %v3060_v25 = vunpack.c.l.bf16 %v2015_v29 }
  0xac   : > { %vm2288_vm12 = vcmp.ne.s32.totalorder %v3057_v28, 0  ;;  %v552_v30 = vmax.f32 %v2127_v19, %v2146_v63  ;;  %v2308_v11 = vmul.f32 0.2, %v2276_v16  ;;  %v415_v51 = vadd.f32 %v1979_v0, %v366_v42 }
  0xad   : > { %v2297_v53 = vmul.f32 %v3060_v25, %v397_v26  ;;  %v2311_v28 = vmul.f32 0.2, %v2280_v61  ;;  %v416_v26 = vadd.f32 %v1981_v1, %v366_v42  ;;  %v361_v25 = vpop.permute.xlu0 %360  ;;  %713 = vmax.xlane.f32.xlu1 %v712_v46  ;;  %v3064_v19 = vunpack.c.h.bf16 %v2015_v29 }
  0xae   : > { %v2324_v34 = vsel %vm2167_vm6, %v551_v41, -9e+15  ;;  %v2328_v13 = vsel %vm2173_vm7, %v552_v30, -9e+15  ;;  %v3067_v54 = vunpack.c.l.bf16 %v2022_v38  ;;  %v3068_v46 = vunpack.c.h.bf16 %v2022_v38 }
  0xaf   : > { %v2317_v63 = vmul.f32 %v3064_v19, %v398_v14  ;;  %v2320_v31 = vmul.f32 0.2, %v2297_v53  ;;  %3065 = vst [vmem:[#allocation6_spill] sm:$0xff] %v2324_v34  ;;  %3066 = vst [vmem:[#allocation7_spill] sm:$0xff] %v2328_v13  ;;  %v736_v14 = vmax.f32 %v2324_v34, %v2328_v13  ;;  %v537_v58 = vmax.f32 %v2159_v56, %v2200_v59 }
  0xb0   : > { %v2332_v42 = vmul.f32 %v3067_v54, %v415_v51  ;;  %v2336_v29 = vmul.f32 %v3068_v46, %v416_v26  ;;  %v3069_v41 = vunpack.c.l.b16 %v1906_v32  ;;  %v3072_v30 = vunpack.c.h.b16 %v1906_v32  ;;  %v336_v26 = vpop.permute.xlu1 %335 }
  0xb1   : > { %v2355_v38 = vmul.f32 0.2, %v2317_v63  ;;  %v538_v51 = vmax.f32 %v2179_v18, %v2204_v5  ;;  %v413_v56 = vadd.f32 %v1979_v0, %v361_v25  ;;  %v414_v59 = vadd.f32 %v1981_v1, %v361_v25  ;;  %737 = vmax.xlane.f32.xlu0 %v736_v14 }
  0xb2   : > { %vm2344_vm14 = vcmp.ne.s32.totalorder %v3069_v41, 0  ;;  %vm2350_vm15 = vcmp.ne.s32.totalorder %v3072_v30, 0  ;;  %v2362_v19 = vmul.f32 0.2, %v2332_v42  ;;  %v2365_v32 = vmul.f32 0.2, %v2336_v29 }
  0xb3   : > { %v2369_v46 = vsel %vm2212_vm8, %v537_v58, -9e+15  ;;  %v403_v41 = vadd.f32 %v1979_v0, %v336_v26  ;;  %v3075_v18 = vunpack.c.l.b16 %v1911_v35  ;;  %v3078_v25 = vunpack.c.h.b16 %v1911_v35 }
  0xb4   : > { %v2386_v14 = vsel %vm2225_vm9, %v538_v51, -9e+15  ;;  %v3081_v27 = vunpack.c.l.bf16 %v2029_v45  ;;  %v3082_v13 = vunpack.c.h.bf16 %v2029_v45  ;;  %v404_v34 = vadd.f32 %v1981_v1, %v336_v26 }
  0xb5   : > { %vm2374_vm0 = vcmp.ne.s32.totalorder %v3075_v18, 0  ;;  %vm2380_vm1 = vcmp.ne.s32.totalorder %v3078_v25, 0  ;;  %v715_v35 = vmax.f32 %v2369_v46, %v2386_v14  ;;  %v3083_v25 = vunpack.c.l.bf16 %v2036_v52 }
  0xb6   : > { %v2390_v58 = vmul.f32 %v3081_v27, %v413_v56  ;;  %v2394_v18 = vmul.f32 %v3082_v13, %v414_v59  ;;  %v539_v17 = vmax.f32 %v2151_v37, %v2194_v7  ;;  %v540_v51 = vmax.f32 %v2155_v4, %v2197_v3  ;;  %v331_v56 = vpop.permute.xlu0 %330  ;;  %v376_v27 = vpop.permute.xlu1 %375  ;;  %v1630_v7 = vld [vmem:[%s3006_s2 + $0x20] sm:$0xff]  }
  0xb7   : > { %v2401_v20 = vmul.f32 %v3083_v25, %v403_v41  ;;  %v3084_v59 = vunpack.c.h.bf16 %v2036_v52  ;;  %v553_v41 = vmax.f32 %v2235_v23, %v2252_v8  ;;  %v3085_v37 = vunpack.c.l.b16 %v1914_v36  ;;  %716 = vmax.xlane.f32.xlu1 %v715_v35 }
  0xb8   : > { %v2408_v45 = vmul.f32 0.2, %v2390_v58  ;;  %v2411_v13 = vmul.f32 0.2, %v2394_v18  ;;  %v3088_v4 = vunpack.c.h.b16 %v1914_v36  ;;  %v3091_v52 = vunpack.c.l.b16 %v1919_v39 }
  0xb9   : > { %v2415_v26 = vmul.f32 %v3084_v59, %v404_v34  ;;  %vm2421_vm2 = vcmp.ne.s32.totalorder %v3085_v37, 0  ;;  %v2438_v23 = vmul.f32 0.2, %v2401_v20  ;;  %v2442_v8 = vsel %vm2261_vm10, %v539_v17, -9e+15 }
  0xba   : > { %vm2427_vm3 = vcmp.ne.s32.totalorder %v3088_v4, 0  ;;  %vm2433_vm4 = vcmp.ne.s32.totalorder %v3091_v52, 0  ;;  %v2446_v36 = vsel %vm2267_vm11, %v540_v51, -9e+15  ;;  %v554_v25 = vmax.f32 %v2244_v15, %v2272_v6 }
  0xbb   : > { %v3094_v59 = vunpack.c.h.b16 %v1919_v39  ;;  %v2457_v35 = vmul.f32 0.2, %v2415_v26  ;;  %v718_v55 = vmax.f32 %v2442_v8, %v2446_v36  ;;  %v2463_v9 = vsel %vm2288_vm12, %v553_v41, -9e+15 }
  0xbc   : > { %v401_v17 = vadd.f32 %v1979_v0, %v331_v56  ;;  %v3097_v15 = vunpack.c.l.b16 %v1922_v40  ;;  %v3100_v6 = vunpack.c.h.b16 %v1922_v40  ;;  %v2480_v4 = vsel %vm2303_vm13, %v554_v25, -9e+15 }
  0xbd   : > { %vm2452_vm5 = vcmp.ne.s32.totalorder %v3094_v59, 0  ;;  %3103 = vst [vmem:[#allocation8_spill] sm:$0xff] %v2480_v4  ;;  %v402_v21 = vadd.f32 %v1981_v1, %v331_v56  ;;  %v419_v41 = vadd.f32 %v1979_v0, %v376_v27  ;;  %v420_v52 = vadd.f32 %v1981_v1, %v376_v27  ;;  %719 = vmax.xlane.f32.xlu0 %v718_v55 }
  0xbe   : > { %vm2468_vm6 = vcmp.ne.s32.totalorder %v3097_v15, 0  ;;  %vm2474_vm7 = vcmp.ne.s32.totalorder %v3100_v6, 0  ;;  %v739_v59 = vmax.f32 %v2463_v9, %v2480_v4  ;;  %v3104_v40 = vunpack.c.l.bf16 %v2043_v57 }
  0xbf   : > { %v555_v6 = vmax.f32 %v2218_v62, %v2240_v24  ;;  %v556_v22 = vmax.f32 %v2231_v50, %v2249_v33  ;;  %v3105_v56 = vunpack.c.l.b16 %v1927_v43  ;;  %v3108_v27 = vunpack.c.h.bf16 %v2043_v57  ;;  %v371_v24 = vpop.permute.xlu0 %370 }
  0xc0   : > { %v2489_v15 = vmul.f32 %v3104_v40, %v401_v17  ;;  %v3109_v4 = vunpack.c.l.bf16 %v2050_v49  ;;  %v3110_v40 = vunpack.c.h.bf16 %v2050_v49  ;;  %v541_v50 = vmax.f32 %v2297_v53, %v2320_v31  ;;  %740 = vmax.xlane.f32.xlu1 %v739_v59 }
  0xc1   : > { %vm2497_vm8 = vcmp.ne.s32.totalorder %v3105_v56, 0  ;;  %v2503_v55 = vmul.f32 %v3108_v27, %v402_v21  ;;  %v3111_v33 = vunpack.c.h.b16 %v1927_v43  ;;  %v3114_v57 = vunpack.c.l.b16 %v1930_v44 }
  0xc2   : > { %v2507_v17 = vmul.f32 %v3109_v4, %v419_v41  ;;  %v2511_v62 = vmul.f32 %v3110_v40, %v420_v52  ;;  %v3117_v49 = vunpack.c.h.b16 %v1930_v44  ;;  %v513_v53 = vmul.f32 0.2, %v2489_v15  ;;  %v1631_v4 = vld [vmem:[%s3006_s2 + $0x68] sm:$0xff]  }
  0xc3   : > { %vm2517_vm9 = vcmp.ne.s32.totalorder %v3111_v33, 0  ;;  %vm2523_vm10 = vcmp.ne.s32.totalorder %v3114_v57, 0  ;;  %v2536_v43 = vsel %vm2344_vm14, %v555_v6, -9e+15  ;;  %v2540_v31 = vsel %vm2350_vm15, %v556_v22, -9e+15 }
  0xc4   : > { %vm2529_vm11 = vcmp.ne.s32.totalorder %v3117_v49, 0  ;;  %v542_v41 = vmax.f32 %v2317_v63, %v2355_v38  ;;  %v3120_v44 = vunpack.c.l.b16 %v1935_v47  ;;  %v3123_v59 = vunpack.c.h.b16 %v1935_v47  ;;  %v1632_v52 = vld [vmem:[%s3006_s2 + $0x28] sm:$0xff]   ;;  %v1636_v22 = vld [vmem:[%s3006_s2 + $0x38] sm:$0xff]  }
  0xc5   : > { %v514_v2 = vmul.f32 0.2, %v2503_v55  ;;  %v531_v54 = vmul.f32 0.2, %v2507_v17  ;;  %v532_v6 = vmul.f32 0.2, %v2511_v62  ;;  %v742_v63 = vmax.f32 %v2536_v43, %v2540_v31 }
  0xc6   : > { %vm2546_vm12 = vcmp.ne.s32.totalorder %v3120_v44, 0  ;;  %vm2552_vm13 = vcmp.ne.s32.totalorder %v3123_v59, 0  ;;  %v3126_v38 = vunpack.c.l.b16 %v1938_v48  ;;  %v3129_v47 = vunpack.c.h.b16 %v1938_v48  ;;  %v1627_v48 = vld [vmem:[%s3006_s2 + $0x58] sm:$0xff]  }
  0xc7   : > { %v2575_v33 = vsel %vm2374_vm0, %v541_v50, -9e+15  ;;  %v2579_v57 = vsel %vm2380_vm1, %v542_v41, -9e+15  ;;  %v417_v49 = vadd.f32 %v1979_v0, %v371_v24  ;;  %v418_v44 = vadd.f32 %v1981_v1, %v371_v24  ;;  %v1628_v59 = vld [vmem:[%s3006_s2 + $0x18] sm:$0xff]   ;;  %743 = vmax.xlane.f32.xlu0 %v742_v63  ;;  %1536 = vmatprep.subr.bf16.mxu0 %v1627_v48 }
  0xc8   : > { %vm2563_vm14 = vcmp.ne.s32.totalorder %v3126_v38, 0  ;;  %vm2569_vm15 = vcmp.ne.s32.totalorder %v3129_v47, 0  ;;  %v721_v5 = vmax.f32 %v2575_v33, %v2579_v57  ;;  %v543_v30 = vmax.f32 %v2276_v16, %v2308_v11  ;;  %1537 = vmatpush3.bf16.msra.mxu0 %v1628_v59  ;;  %1597 = vmatprep.subr.bf16.mxu1 %v1627_v48 }
  0xc9   : > { %v544_v0 = vmax.f32 %v2280_v61, %v2311_v28  ;;  %v557_v1 = vmax.f32 %v2390_v58, %v2408_v45  ;;  %v3132_v50 = vunpack.c.l.bf16 %v2057_v10  ;;  %v3133_v41 = vunpack.c.h.bf16 %v2057_v10  ;;  %1605 = vmatpush3.bf16.msra.mxu1 %v1628_v59  ;;  %v3134_v59 = vld [vmem:[#allocation2_spill] sm:$0xff] }
  0xca   : > { %v558_v63 = vmax.f32 %v2394_v18, %v2411_v13  ;;  %v559_v47 = vmax.f32 %v2332_v42, %v2362_v19  ;;  %722 = vmax.xlane.f32.xlu1 %v721_v5  ;;  %v2607_v16 = vsel %vm2421_vm2, %v543_v30, -9e+15  ;;  %v560_v11 = vmax.f32 %v2336_v29, %v2365_v32  ;;  %v1629_v13 = vld [vmem:[%s3006_s2 + $0x60] sm:$0xff]  }
  0xcb   : > { %v497_v24 = vmul.f32 %v3132_v50, %v417_v49  ;;  %v498_v38 = vmul.f32 %v3133_v41, %v418_v44  ;;  %v2611_v61 = vsel %vm2427_vm3, %v544_v0, -9e+15  ;;  %v2615_v10 = vsel %vm2433_vm4, %v557_v1, -9e+15  ;;  %1538 = vmatprep.subr.bf16.mxu0 %v1629_v13  ;;  %1598 = vmatprep.subr.bf16.mxu1 %v1629_v13  ;;  %v3138_v13 = vld [vmem:[#allocation6_spill] sm:$0xff] }
  0xcc   : > { %v724_v19 = vmax.f32 %v2607_v16, %v2611_v61  ;;  %v2623_v58 = vsel %vm2452_vm5, %v558_v63, -9e+15  ;;  %v2629_v45 = vsel %vm2468_vm6, %v559_v47, -9e+15  ;;  %v2633_v29 = vsel %vm2474_vm7, %v560_v11, -9e+15  ;;  %1539 = vmatpush3.bf16.msra.mxu0 %v1630_v7 }
  0xcd   : > { %v529_v28 = vmul.f32 0.2, %v497_v24  ;;  %v530_v42 = vmul.f32 0.2, %v498_v38  ;;  %v745_v18 = vmax.f32 %v2615_v10, %v2623_v58  ;;  %v545_v32 = vmax.f32 %v2489_v15, %v513_v53  ;;  %1606 = vmatpush3.bf16.msra.mxu1 %v1630_v7  ;;  %1540 = vmatprep.subr.bf16.mxu0 %v1631_v4  ;;  %v3136_v63 = vld [vmem:[#allocation4_spill] sm:$0xff]  ;;  %v3137_v11 = vld [vmem:[#allocation5_spill] sm:$0xff] }
  0xce   : > { %725 = vmax.xlane.f32.xlu0 %v724_v19  ;;  %v748_v3 = vmax.f32 %v2629_v45, %v2633_v29  ;;  %v546_v34 = vmax.f32 %v2503_v55, %v514_v2  ;;  %v547_v37 = vmax.f32 %v2401_v20, %v2438_v23  ;;  %v548_v39 = vmax.f32 %v2415_v26, %v2457_v35  ;;  %v1633_v2 = vld [vmem:[%s3006_s2 + $0x70] sm:$0xff]  }
  0xcf   : > { %746 = vmax.xlane.f32.xlu1 %v745_v18  ;;  %v2651_v51 = vsel %vm2497_vm8, %v545_v32, -9e+15  ;;  %v561_v15 = vmax.f32 %v497_v24, %v529_v28  ;;  %v562_v53 = vmax.f32 %v498_v38, %v530_v42  ;;  %v563_v49 = vmax.f32 %v2507_v17, %v531_v54  ;;  %1599 = vmatprep.subr.bf16.mxu1 %v1631_v4  ;;  %v1634_v54 = vld [vmem:[%s3006_s2 + $0x30] sm:$0xff]   ;;  %v3135_v24 = vld [vmem:[#allocation3_spill] sm:$0xff] }
  0xd0   : > { %v2656_v44 = vsel %vm2517_vm9, %v546_v34, -9e+15  ;;  %v2660_v20 = vsel %vm2523_vm10, %v547_v37, -9e+15  ;;  %v2664_v26 = vsel %vm2529_vm11, %v548_v39, -9e+15  ;;  %v564_v23 = vmax.f32 %v2511_v62, %v532_v6  ;;  %1541 = vmatpush3.bf16.msra.mxu0 %v1632_v52 }
  0xd1   : > { %v727_v35 = vmax.f32 %v2651_v51, %v2656_v44  ;;  %v2671_v25 = vsel %vm2546_vm12, %v561_v15, -9e+15  ;;  %v2675_v55 = vsel %vm2552_vm13, %v562_v53, -9e+15  ;;  %v2679_v17 = vsel %vm2563_vm14, %v563_v49, -9e+15  ;;  %1607 = vmatpush3.bf16.msra.mxu1 %v1632_v52  ;;  %1542 = vmatprep.subr.bf16.mxu0 %v1633_v2 }
  0xd2   : > { %749 = vmax.xlane.f32.xlu0 %v748_v3  ;;  %v2683_v62 = vsel %vm2569_vm15, %v564_v23, -9e+15  ;;  %v751_v56 = vmax.f32 %v2671_v25, %v2675_v55  ;;  %v730_v21 = vmax.f32 %v2660_v20, %v2664_v26  ;;  %1600 = vmatprep.subr.bf16.mxu1 %v1633_v2  ;;  %v1635_v6 = vld [vmem:[%s3006_s2 + $0x78] sm:$0xff]   ;;  %v3139_v3 = vld [vmem:[#allocation7_spill] sm:$0xff]  ;;  %vm1286_vm1 = vcmask 261120  }
  0xd3   : > { %728 = vmax.xlane.f32.xlu1 %v727_v35  ;;  %v754_v27 = vmax.f32 %v2679_v17, %v2683_v62 }
  0xd4   : > { %1543 = vmatpush3.bf16.msra.mxu0 %v1634_v54 }
  0xd5   : > { %1608 = vmatpush3.bf16.msra.mxu1 %v1634_v54  ;;  %1544 = vmatprep.subr.bf16.mxu0 %v1635_v6 }
  0xd6   : > { %731 = vmax.xlane.f32.xlu0 %v730_v21  ;;  %1601 = vmatprep.subr.bf16.mxu1 %v1635_v6 }
  0xd7   : > { %752 = vmax.xlane.f32.xlu1 %v751_v56 }
  0xd8   : > { %1545 = vmatpush3.bf16.msra.mxu0 %v1636_v22 }
  0xd9   : > { %1609 = vmatpush3.bf16.msra.mxu1 %v1636_v22 }
  0xda   : > { %755 = vmax.xlane.f32.xlu0 %v754_v27 }
 0x131   : > { %v711_v40 = vpop.xlane.xlu0 %710 }
 0x132   : > { %v757_v48 = vsub.f32 %v2163_v60, %v711_v40  ;;  %v758_v5 = vsub.f32 %v3134_v59, %v711_v40 }
 0x134   : > { %v789_v30 = vmul.f32 1.442695, %v757_v48  ;;  %v791_v0 = vmul.f32 1.442695, %v758_v5 }
 0x135   : > { %v735_v1 = vpop.xlane.xlu0 %734 }
 0x136   : > { %1637 = vpow2.f32 %v789_v30  ;;  %v773_v50 = vsub.f32 %v2187_v12, %v735_v1  ;;  %v774_v41 = vsub.f32 %v3135_v24, %v735_v1 }
 0x137   : > { %1639 = vpow2.f32 %v791_v0 }
 0x138   : > { %v821_v42 = vmul.f32 1.442695, %v773_v50  ;;  %v823_v60 = vmul.f32 1.442695, %v774_v41 }
 0x13a   : > { %v714_v38 = vpop.xlane.xlu1 %713  ;;  %1641 = vpow2.f32 %v821_v42 }
 0x13b   : > { %v759_v47 = vsub.f32 %v3136_v63, %v714_v38  ;;  %v760_v28 = vsub.f32 %v3137_v11, %v714_v38 }
 0x13d   : > { %v793_v19 = vmul.f32 1.442695, %v759_v47  ;;  %v795_v18 = vmul.f32 1.442695, %v760_v28 }
 0x13e   : > { %v738_v32 = vpop.xlane.xlu0 %737 }
 0x13f   : > { %v775_v7 = vsub.f32 %v3138_v13, %v738_v32  ;;  %v776_v34 = vsub.f32 %v3139_v3, %v738_v32  ;;  %1643 = vpow2.f32 %v793_v19 }
 0x140   : > { %1645 = vpow2.f32 %v795_v18  ;;  %v1638_v49 = vpop.eup %1637 }
 0x141   : > { %v825_v12 = vmul.f32 1.442695, %v775_v7  ;;  %v827_v37 = vmul.f32 1.442695, %v776_v34  ;;  %1647 = vpow2.f32 %v823_v60  ;;  %v1640_v23 = vpop.eup %1639 }
 0x142   : > { %v853_v27 = vadd.f32 %v1640_v23, %v1638_v49 }
 0x143   : > { %1649 = vpow2.f32 %v825_v12 }
 0x144   : > { %v717_v39 = vpop.xlane.xlu1 %716  ;;  %1651 = vpow2.f32 %v827_v37  ;;  %854 = vadd.xlane.f32.xlu1 %v853_v27  ;;  %v2723_v22 = vpop.eup %1641 }
 0x145   : > { %v761_v15 = vsub.f32 %v2369_v46, %v717_v39  ;;  %v762_v53 = vsub.f32 %v2386_v14, %v717_v39  ;;  %v3140_v46 = vld [vmem:[#allocation8_spill] sm:$0xff] }
 0x147   : > { %v797_v35 = vmul.f32 1.442695, %v761_v15  ;;  %v799_v56 = vmul.f32 1.442695, %v762_v53 }
 0x149   : > { %1653 = vpow2.f32 %v797_v35  ;;  %v1644_v48 = vpop.eup %1643 }
 0x14a   : > { %v720_v21 = vpop.xlane.xlu0 %719  ;;  %1655 = vpow2.f32 %v799_v56  ;;  %v1646_v30 = vpop.eup %1645  ;;  %v917_v1 = vpack.c.bf16 %v1644_v48, %v1638_v49 }
 0x14b   : > { %v763_v4 = vsub.f32 %v2442_v8, %v720_v21  ;;  %v764_v52 = vsub.f32 %v2446_v36, %v720_v21  ;;  %v856_v24 = vadd.f32 %v1646_v30, %v1644_v48  ;;  %v918_v41 = vpack.c.bf16 %v1646_v30, %v1640_v23 }
 0x14d   : > { %v741_v2 = vpop.xlane.xlu1 %740  ;;  %v801_v14 = vmul.f32 1.442695, %v763_v4  ;;  %v803_v40 = vmul.f32 1.442695, %v764_v52  ;;  %857 = vadd.xlane.f32.xlu0 %v856_v24  ;;  %1093 = vmatprep.mubr.bf16.mxu0 %v918_v41 }
 0x14e   : > { %v777_v54 = vsub.f32 %v2463_v9, %v741_v2  ;;  %v778_v6 = vsub.f32 %v3140_v46, %v741_v2  ;;  %v2727_v9 = vpop.eup %1647  ;;  %1094 = vmatmul.mubr.bf16.vlgmr.msra.gmra.mrb[0].mxu0 %v917_v1 }
 0x14f   : > { %1657 = vpow2.f32 %v801_v14  ;;  %v2729_v38 = vpop.eup %1649 }
 0x150   : > { %v829_v59 = vmul.f32 1.442695, %v777_v54  ;;  %v831_v5 = vmul.f32 1.442695, %v778_v6  ;;  %1659 = vpow2.f32 %v803_v40  ;;  %v2733_v28 = vpop.eup %1651 }
 0x152   : > { %1661 = vpow2.f32 %v829_v59 }
 0x153   : > { %1663 = vpow2.f32 %v831_v5  ;;  %v1654_v13 = vpop.eup %1653 }
 0x154   : > { %v744_v8 = vpop.xlane.xlu0 %743  ;;  %v1656_v34 = vpop.eup %1655 }
 0x155   : > { %v779_v36 = vsub.f32 %v2536_v43, %v744_v8  ;;  %v780_v0 = vsub.f32 %v2540_v31, %v744_v8  ;;  %v925_v31 = vpack.c.bf16 %v2729_v38, %v2723_v22  ;;  %v859_v49 = vadd.f32 %v1656_v34, %v1654_v13 }
 0x157   : > { %v723_v50 = vpop.xlane.xlu1 %722  ;;  %v833_v11 = vmul.f32 1.442695, %v779_v36  ;;  %v835_v43 = vmul.f32 1.442695, %v780_v0  ;;  %860 = vadd.xlane.f32.xlu1 %v859_v49 }
 0x158   : > { %v765_v63 = vsub.f32 %v2575_v33, %v723_v50  ;;  %v766_v47 = vsub.f32 %v2579_v57, %v723_v50  ;;  %v926_v33 = vpack.c.bf16 %v2733_v28, %v2727_v9 }
 0x159   : > { %1665 = vpow2.f32 %v833_v11  ;;  %v1658_v23 = vpop.eup %1657 }
 0x15a   : > { %v805_v42 = vmul.f32 1.442695, %v765_v63  ;;  %v807_v19 = vmul.f32 1.442695, %v766_v47  ;;  %1667 = vpow2.f32 %v835_v43  ;;  %1125 = vmatprep.mubr.bf16.mxu1 %v926_v33  ;;  %v919_v21 = vpack.c.bf16 %v1658_v23, %v1654_v13 }
 0x15b   : > { %v726_v18 = vpop.xlane.xlu0 %725  ;;  %1126 = vmatmul.mubr.bf16.vlgmr.msra.gmra.mrb[0].mxu1 %v925_v31 }
 0x15c   : > { %v747_v57 = vpop.xlane.xlu1 %746  ;;  %v767_v60 = vsub.f32 %v2607_v16, %v726_v18  ;;  %v768_v32 = vsub.f32 %v2611_v61, %v726_v18  ;;  %1669 = vpow2.f32 %v805_v42 }
 0x15d   : > { %v781_v7 = vsub.f32 %v2615_v10, %v747_v57  ;;  %v782_v3 = vsub.f32 %v2623_v58, %v747_v57  ;;  %1671 = vpow2.f32 %v807_v19  ;;  %v1660_v10 = vpop.eup %1659 }
 0x15e   : > { %v809_v12 = vmul.f32 1.442695, %v767_v60  ;;  %v811_v15 = vmul.f32 1.442695, %v768_v32  ;;  %v920_v27 = vpack.c.bf16 %v1660_v10, %v1656_v34  ;;  %v2747_v2 = vpop.eup %1661  ;;  %v862_v6 = vadd.f32 %v1660_v10, %v1658_v23 }
 0x15f   : > { %v837_v37 = vmul.f32 1.442695, %v781_v7  ;;  %v839_v39 = vmul.f32 1.442695, %v782_v3  ;;  %v750_v53 = vpop.xlane.xlu0 %749 }
 0x160   : > { %1673 = vpow2.f32 %v809_v12  ;;  %v729_v16 = vpop.xlane.xlu1 %728  ;;  %v783_v61 = vsub.f32 %v2629_v45, %v750_v53  ;;  %v784_v35 = vsub.f32 %v2633_v29, %v750_v53  ;;  %v2749_v29 = vpop.eup %1663  ;;  %1101 = vmatprep.mubr.bf16.mxu0 %v920_v27  ;;  %863 = vadd.xlane.f32.xlu0 %v862_v6 }
 0x161   : > { %1675 = vpow2.f32 %v837_v37  ;;  %v769_v58 = vsub.f32 %v2651_v51, %v729_v16  ;;  %v770_v56 = vsub.f32 %v2656_v44, %v729_v16  ;;  %1102 = vmatmul.mubr.bf16.gmra.mrb[4].mxu0 %v919_v21  ;;  %v877_v37 = vadd.f32 %v2727_v9, %v2723_v22 }
 0x162   : > { %1677 = vpow2.f32 %v839_v39  ;;  %v841_v4 = vmul.f32 1.442695, %v783_v61  ;;  %v843_v52 = vmul.f32 1.442695, %v784_v35  ;;  %v883_v35 = vadd.f32 %v2749_v29, %v2747_v2 }
 0x163   : > { %1679 = vpow2.f32 %v811_v15  ;;  %v813_v54 = vmul.f32 1.442695, %v769_v58  ;;  %v815_v46 = vmul.f32 1.442695, %v770_v56  ;;  %v732_v45 = vpop.xlane.xlu0 %731  ;;  %v2753_v40 = vpop.eup %1665  ;;  %v880_v58 = vadd.f32 %v2733_v28, %v2729_v38 }
 0x164   : > { %1681 = vpow2.f32 %v841_v4  ;;  %v753_v14 = vpop.xlane.xlu1 %752  ;;  %v771_v51 = vsub.f32 %v2660_v20, %v732_v45  ;;  %v772_v44 = vsub.f32 %v2664_v26, %v732_v45  ;;  %v2756_v59 = vpop.eup %1667  ;;  %v927_v30 = vpack.c.bf16 %v2753_v40, %v2747_v2 }
 0x165   : > { %1683 = vpow2.f32 %v813_v54  ;;  %v786_v48 = vsub.f32 %v2675_v55, %v753_v14  ;;  %v785_v5 = vsub.f32 %v2671_v25, %v753_v14  ;;  %v928_v1 = vpack.c.bf16 %v2756_v59, %v2749_v29 }
 0x166   : > { %1685 = vpow2.f32 %v815_v46  ;;  %v817_v8 = vmul.f32 1.442695, %v771_v51  ;;  %v1670_v20 = vpop.eup %1669  ;;  %v819_v36 = vmul.f32 1.442695, %v772_v44  ;;  %v886_v9 = vadd.f32 %v2756_v59, %v2753_v40 }
 0x167   : > { %1687 = vpow2.f32 %v843_v52  ;;  %v847_v26 = vmul.f32 1.442695, %v786_v48  ;;  %v756_v0 = vpop.xlane.xlu0 %755  ;;  %v1672_v55 = vpop.eup %1671  ;;  %1133 = vmatprep.mubr.bf16.mxu1 %v928_v1  ;;  %v845_v63 = vmul.f32 1.442695, %v785_v5 }
 0x168   : > { %1689 = vpow2.f32 %v817_v8  ;;  %v787_v50 = vsub.f32 %v2679_v17, %v756_v0  ;;  %v788_v24 = vsub.f32 %v2683_v62, %v756_v0  ;;  %v865_v41 = vadd.f32 %v1672_v55, %v1670_v20  ;;  %1134 = vmatmul.mubr.bf16.gmra.mrb[4].mxu1 %v927_v30 }
 0x169   : > { %1691 = vpow2.f32 %v847_v26 }
 0x16a   : > { %v1674_v25 = vpop.eup %1673  ;;  %v849_v47 = vmul.f32 1.442695, %v787_v50  ;;  %v851_v11 = vmul.f32 1.442695, %v788_v24  ;;  %1693 = vpow2.f32 %v819_v36  ;;  %866 = vadd.xlane.f32.xlu1 %v865_v41 }
 0x16b   : > { %v1676_v43 = vpop.eup %1675  ;;  %v921_v19 = vpack.c.bf16 %v1674_v25, %v1670_v20 }
 0x16c   : > { %v1678_v31 = vpop.eup %1677  ;;  %1695 = vpow2.f32 %v849_v47 }
 0x16d   : > { %v1680_v42 = vpop.eup %1679  ;;  %1697 = vpow2.f32 %v851_v11  ;;  %v889_v22 = vadd.f32 %v1678_v31, %v1676_v43 }
 0x16e   : > { %v1682_v18 = vpop.eup %1681  ;;  %1699 = vpow2.f32 %v845_v63  ;;  %v922_v17 = vpack.c.bf16 %v1680_v42, %v1672_v55  ;;  %v868_v62 = vadd.f32 %v1680_v42, %v1674_v25 }
 0x16f   : > { %v1684_v33 = vpop.eup %1683  ;;  %v929_v13 = vpack.c.bf16 %v1682_v18, %v1676_v43 }
 0x170   : > { %v1686_v57 = vpop.eup %1685  ;;  %1109 = vmatprep.mubr.bf16.mxu0 %v922_v17  ;;  %869 = vadd.xlane.f32.xlu0 %v868_v62 }
 0x171   : > { %v1688_v60 = vpop.eup %1687  ;;  %1110 = vmatmul.mubr.bf16.gmra.mrb[8].mxu0 %v921_v19  ;;  %v871_v32 = vadd.f32 %v1686_v57, %v1684_v33 }
 0x172   : > { %v1690_v7 = vpop.eup %1689  ;;  %v930_v3 = vpack.c.bf16 %v1688_v60, %v1678_v31  ;;  %v892_v21 = vadd.f32 %v1688_v60, %v1682_v18 }
 0x173   : > { %872 = vadd.xlane.f32.xlu1 %v871_v32  ;;  %v1692_v34 = vpop.eup %1691  ;;  %v923_v39 = vpack.c.bf16 %v1690_v7, %v1684_v33 }
 0x174   : > { %1141 = vmatprep.mubr.bf16.mxu1 %v930_v3  ;;  %v1694_v12 = vpop.eup %1693 }
 0x175   : > { %1142 = vmatmul.mubr.bf16.gmra.mrb[8].mxu1 %v929_v13  ;;  %v924_v53 = vpack.c.bf16 %v1694_v12, %v1686_v57  ;;  %v874_v49 = vadd.f32 %v1694_v12, %v1690_v7 }
 0x176   : > { %v1696_v15 = vpop.eup %1695 }
 0x177   : > { %v1698_v23 = vpop.eup %1697  ;;  %878 = vadd.xlane.f32.xlu1 %v877_v37  ;;  %1117 = vmatprep.mubr.bf16.mxu0 %v924_v53 }
 0x178   : > { %v1700_v16 = vpop.eup %1699  ;;  %875 = vadd.xlane.f32.xlu0 %v874_v49  ;;  %v932_v61 = vpack.c.bf16 %v1698_v23, %v1692_v34  ;;  %v898_v4 = vadd.f32 %v1698_v23, %v1696_v15 }
 0x179   : > { %1118 = vmatmul.mubr.bf16.gmra.mrb[12].mxu0 %v923_v39  ;;  %v931_v10 = vpack.c.bf16 %v1696_v15, %v1700_v16  ;;  %v895_v56 = vadd.f32 %v1700_v16, %v1692_v34 }
 0x17a   : > { %1149 = vmatprep.mubr.bf16.mxu1 %v932_v61 }
 0x17b   : > { %884 = vadd.xlane.f32.xlu1 %v883_v35 }
 0x17c   : > { %881 = vadd.xlane.f32.xlu0 %v880_v58 }
 0x17d   : > { %1150 = vmatmul.mubr.bf16.gmra.mrb[12].mxu1 %v931_v10 }
 0x17f   : > { %890 = vadd.xlane.f32.xlu1 %v889_v22 }
 0x180   : > { %887 = vadd.xlane.f32.xlu0 %v886_v9 }
 0x183   : > { %896 = vadd.xlane.f32.xlu1 %v895_v56 }
 0x184   : > { %893 = vadd.xlane.f32.xlu0 %v892_v21 }
 0x188   : > { %899 = vadd.xlane.f32.xlu0 %v898_v4 }
 0x1d1   : > { %v855_v52 = vpop.xlane.xlu1 %854 }
 0x1d2   : > { %1701 = vrcp.f32 %v855_v52 }
 0x1da   : > { %v858_v27 = vpop.xlane.xlu0 %857 }
 0x1db   : > { %1703 = vrcp.f32 %v858_v27 }
 0x1dc   : > { %v1702_v59 = vpop.eup %1701 }
 0x1e4   : > { %v861_v2 = vpop.xlane.xlu1 %860 }
 0x1e5   : > { %v1704_v36 = vpop.eup %1703 }
 0x1ed   : > { %v864_v38 = vpop.xlane.xlu0 %863 }
 0x1f7   : > { %v867_v28 = vpop.xlane.xlu1 %866 }
 0x1fd   : > { %v870_v54 = vpop.xlane.xlu0 %869 }
 0x200   : > { %v873_v46 = vpop.xlane.xlu1 %872 }
 0x204   : > { %v879_v6 = vpop.xlane.xlu1 %878 }
 0x205   : > { %v876_v45 = vpop.xlane.xlu0 %875  ;;  %1705 = vrcp.f32 %v879_v6 }
 0x208   : > { %v885_v44 = vpop.xlane.xlu1 %884 }
 0x209   : > { %v882_v29 = vpop.xlane.xlu0 %881 }
 0x20a   : > { %1707 = vrcp.f32 %v882_v29 }
 0x20b   : > { %1709 = vrcp.f32 %v861_v2 }
 0x20c   : > { %1711 = vrcp.f32 %v864_v38  ;;  %v891_v42 = vpop.xlane.xlu1 %890 }
 0x20d   : > { %v888_v50 = vpop.xlane.xlu0 %887  ;;  %1713 = vrcp.f32 %v867_v28 }
 0x20e   : > { %1715 = vrcp.f32 %v885_v44 }
 0x20f   : > { %v1706_v55 = vpop.eup %1705  ;;  %1717 = vrcp.f32 %v888_v50 }
 0x210   : > { %v897_v53 = vpop.xlane.xlu1 %896 }
 0x211   : > { %v894_v32 = vpop.xlane.xlu0 %893 }
 0x214   : > { %v1708_v11 = vpop.eup %1707 }
 0x215   : > { %v1710_v3 = vpop.eup %1709  ;;  %v900_v9 = vpop.xlane.xlu0 %899 }
 0x216   : > { %v1712_v15 = vpop.eup %1711 }
 0x217   : > { %v1714_v35 = vpop.eup %1713 }
 0x218   : > { %v1716_v22 = vpop.eup %1715 }
 0x219   : > { %v1718_v52 = vpop.eup %1717 }
 0x221   : > { %v1546_v14 = vpop.f32.mrb[0].mxu0 }
 0x222   : > { %v1547_v51 = vpop.f32.mrb[1].mxu0 }
 0x223   : > { %v1548_v40 = vadd.f32 %v1547_v51, %v1546_v14  ;;  %v1549_v48 = vpop.f32.mrb[2].mxu0 }
 0x224   : > { %v1550_v5 = vpop.f32.mrb[3].mxu0 }
 0x225   : > { %v2773_v30 = vmul.f32 %v1702_v59, %v1548_v40  ;;  %v1551_v20 = vadd.f32 %v1550_v5, %v1549_v48 }
 0x227   : > { %v1190_v24 = vmin.f32 %v2773_v30, 0.0  ;;  %v2776_v41 = vmul.f32 %v1704_v36, %v1551_v20  ;;  %vm1174_vm0 = vcmp.gt.f32.partialorder %v2773_v30, 0.0 }
 0x229   : > { %v1206_v43 = vmul.f32 1.442695, %v1190_v24  ;;  %v1191_v31 = vmin.f32 %v2776_v41, 0.0  ;;  %vm1175_vm2 = vcmp.gt.f32.partialorder %v2776_v41, 0.0 }
 0x22b   : > { %1719 = vpow2.f32 %v1206_v43  ;;  %v1208_v17 = vmul.f32 1.442695, %v1191_v31 }
 0x22c   : > { %1721 = vrcp.f32 %v870_v54 }
 0x22d   : > { %1723 = vpow2.f32 %v1208_v17 }
 0x22e   : > { %v1570_v8 = vpop.f32.mrb[0].mxu1 }
 0x22f   : > { %v1571_v26 = vpop.f32.mrb[1].mxu1 }
 0x230   : > { %v1572_v0 = vadd.f32 %v1571_v26, %v1570_v8  ;;  %v1573_v1 = vpop.f32.mrb[2].mxu1 }
 0x231   : > { %v1574_v25 = vpop.f32.mrb[3].mxu1 }
 0x232   : > { %v2778_v63 = vmul.f32 %v1706_v55, %v1572_v0  ;;  %v1575_v47 = vadd.f32 %v1574_v25, %v1573_v1 }
 0x234   : > { %v1198_v19 = vmin.f32 %v2778_v63, 0.0  ;;  %v2782_v18 = vmul.f32 %v1708_v11, %v1575_v47  ;;  %v1552_v62 = vpop.f32.mrb[4].mxu0  ;;  %vm1182_vm3 = vcmp.gt.f32.partialorder %v2778_v63, 0.0 }
 0x235   : > { %v1553_v60 = vpop.f32.mrb[5].mxu0  ;;  %v1720_v38 = vpop.eup %1719 }
 0x236   : > { %v1222_v33 = vmul.f32 1.442695, %v1198_v19  ;;  %v1199_v57 = vmin.f32 %v2782_v18, 0.0  ;;  %v1554_v13 = vadd.f32 %v1553_v60, %v1552_v62  ;;  %v1555_v7 = vpop.f32.mrb[6].mxu0  ;;  %v1722_v54 = vpop.eup %1721  ;;  %v1510_v6 = vadd.f32 -1.0, %v1720_v38 }
 0x237   : > { %v1556_v12 = vpop.f32.mrb[7].mxu0  ;;  %v1724_v29 = vpop.eup %1723  ;;  %vm1183_vm4 = vcmp.gt.f32.partialorder %v2782_v18, 0.0 }
 0x238   : > { %1725 = vpow2.f32 %v1222_v33  ;;  %v1224_v34 = vmul.f32 1.442695, %v1199_v57  ;;  %v2785_v37 = vmul.f32 %v1710_v3, %v1554_v13  ;;  %v1557_v39 = vadd.f32 %v1556_v12, %v1555_v7 }
 0x239   : > { %1727 = vrcp.f32 %v873_v46  ;;  %v2799_v59 = vsel %vm1174_vm0, %v2773_v30, %v1510_v6  ;;  %v1511_v5 = vadd.f32 -1.0, %v1724_v29 }
 0x23a   : > { %1729 = vpow2.f32 %v1224_v34  ;;  %v1192_v23 = vmin.f32 %v2785_v37, 0.0  ;;  %v2788_v16 = vmul.f32 %v1712_v15, %v1557_v39  ;;  %v1270_v36 = vmul.f32 %v2799_v59, %v2799_v59 }
 0x23b   : > { %v1576_v49 = vpop.f32.mrb[4].mxu1  ;;  %1731 = vrcp.f32 %v876_v45  ;;  %v2807_v24 = vsel %vm1175_vm2, %v2776_v41, %v1511_v5  ;;  %vm1176_vm5 = vcmp.gt.f32.partialorder %v2785_v37, 0.0 }
 0x23c   : > { %v1577_v61 = vpop.f32.mrb[5].mxu1  ;;  %1733 = vrcp.f32 %v891_v42  ;;  %v1210_v56 = vmul.f32 1.442695, %v1192_v23  ;;  %v1193_v21 = vmin.f32 %v2788_v16, 0.0  ;;  %v1287_v43 = vsel %vm1286_vm1, %v1270_v36, 0.0 }
 0x23d   : > { %v1578_v10 = vadd.f32 %v1577_v61, %v1576_v49  ;;  %v1579_v58 = vpop.f32.mrb[6].mxu1  ;;  %1735 = vrcp.f32 %v897_v53  ;;  %v1271_v31 = vmul.f32 %v2807_v24, %v2807_v24  ;;  %1288 = vadd.xlane.f32.xlu1 %v1287_v43  ;;  %vm1177_vm6 = vcmp.gt.f32.partialorder %v2788_v16, 0.0 }
 0x23e   : > { %v1580_v4 = vpop.f32.mrb[7].mxu1  ;;  %1737 = vrcp.f32 %v894_v32  ;;  %v1212_v28 = vmul.f32 1.442695, %v1193_v21 }
 0x23f   : > { %v2791_v27 = vmul.f32 %v1716_v22, %v1578_v10  ;;  %v1581_v2 = vadd.f32 %v1580_v4, %v1579_v58  ;;  %1739 = vpow2.f32 %v1210_v56  ;;  %v1290_v13 = vsel %vm1286_vm1, %v1271_v31, 0.0 }
 0x240   : > { %1741 = vrcp.f32 %v900_v9  ;;  %1291 = vadd.xlane.f32.xlu0 %v1290_v13 }
 0x241   : > { %v1200_v46 = vmin.f32 %v2791_v27, 0.0  ;;  %v2794_v45 = vmul.f32 %v1718_v52, %v1581_v2  ;;  %1743 = vpow2.f32 %v1212_v28  ;;  %vm1184_vm7 = vcmp.gt.f32.partialorder %v2791_v27, 0.0 }
 0x242   : > { %v1726_v51 = vpop.eup %1725 }
 0x243   : > { %v1226_v44 = vmul.f32 1.442695, %v1200_v46  ;;  %v1201_v40 = vmin.f32 %v2794_v45, 0.0  ;;  %v2801_v8 = vpop.eup %1727  ;;  %v1518_v0 = vadd.f32 -1.0, %v1726_v51  ;;  %vm1185_vm8 = vcmp.gt.f32.partialorder %v2794_v45, 0.0 }
 0x244   : > { %v1558_v14 = vpop.f32.mrb[8].mxu0  ;;  %v1730_v1 = vpop.eup %1729 }
 0x245   : > { %v1559_v48 = vpop.f32.mrb[9].mxu0  ;;  %1745 = vpow2.f32 %v1226_v44  ;;  %v1228_v55 = vmul.f32 1.442695, %v1201_v40  ;;  %v2810_v30 = vpop.eup %1731  ;;  %v2818_v41 = vsel %vm1182_vm3, %v2778_v63, %v1518_v0  ;;  %v1519_v17 = vadd.f32 -1.0, %v1730_v1 }
 0x246   : > { %v1560_v20 = vadd.f32 %v1559_v48, %v1558_v14  ;;  %v1561_v26 = vpop.f32.mrb[10].mxu0  ;;  %v1734_v42 = vpop.eup %1733  ;;  %v1278_v34 = vmul.f32 %v2818_v41, %v2818_v41 }
 0x247   : > { %v1562_v50 = vpop.f32.mrb[11].mxu0  ;;  %1747 = vpow2.f32 %v1228_v55  ;;  %v1736_v62 = vpop.eup %1735  ;;  %v2828_v63 = vsel %vm1183_vm4, %v2782_v18, %v1519_v17 }
 0x248   : > { %v2812_v25 = vmul.f32 %v1714_v35, %v1560_v20  ;;  %v1563_v47 = vadd.f32 %v1562_v50, %v1561_v26  ;;  %v1582_v11 = vpop.f32.mrb[8].mxu1  ;;  %v1738_v7 = vpop.eup %1737  ;;  %v1311_v10 = vsel %vm1286_vm1, %v1278_v34, 0.0  ;;  %v1279_v18 = vmul.f32 %v2828_v63, %v2828_v63 }
 0x249   : > { %v1583_v19 = vpop.f32.mrb[9].mxu1  ;;  %v1740_v12 = vpop.eup %1739  ;;  %1312 = vadd.xlane.f32.xlu1 %v1311_v10 }
 0x24a   : > { %v1194_v33 = vmin.f32 %v2812_v25, 0.0  ;;  %v2822_v57 = vmul.f32 %v1722_v54, %v1563_v47  ;;  %v1584_v60 = vadd.f32 %v1583_v19, %v1582_v11  ;;  %v1585_v32 = vpop.f32.mrb[10].mxu1  ;;  %v1742_v61 = vpop.eup %1741  ;;  %v1512_v58 = vadd.f32 -1.0, %v1740_v12 }
 0x24b   : > { %v1586_v3 = vpop.f32.mrb[11].mxu1  ;;  %v1744_v22 = vpop.eup %1743  ;;  %v1314_v38 = vsel %vm1286_vm1, %v1279_v18, 0.0  ;;  %vm1178_vm9 = vcmp.gt.f32.partialorder %v2812_v25, 0.0 }
 0x24c   : > { %v1214_v39 = vmul.f32 1.442695, %v1194_v33  ;;  %v1195_v15 = vmin.f32 %v2822_v57, 0.0  ;;  %v2833_v53 = vmul.f32 %v1734_v42, %v1584_v60  ;;  %v1587_v49 = vadd.f32 %v1586_v3, %v1585_v32  ;;  %v1564_v23 = vpop.f32.mrb[12].mxu0  ;;  %1315 = vadd.xlane.f32.xlu0 %v1314_v38 }
 0x24d   : > { %v1565_v35 = vpop.f32.mrb[13].mxu0  ;;  %v2846_v28 = vsel %vm1176_vm5, %v2785_v37, %v1512_v58  ;;  %v1513_v54 = vadd.f32 -1.0, %v1744_v22  ;;  %vm1179_vm10 = vcmp.gt.f32.partialorder %v2822_v57, 0.0 }
 0x24e   : > { %1749 = vpow2.f32 %v1214_v39  ;;  %v1216_v9 = vmul.f32 1.442695, %v1195_v15  ;;  %v1202_v56 = vmin.f32 %v2833_v53, 0.0  ;;  %v2840_v21 = vmul.f32 %v1738_v7, %v1587_v49  ;;  %v1567_v4 = vpop.f32.mrb[14].mxu0 }
 0x24f   : > { %v1566_v52 = vadd.f32 %v1565_v35, %v1564_v23  ;;  %v1568_v2 = vpop.f32.mrb[15].mxu0  ;;  %v1746_v51 = vpop.eup %1745  ;;  %v1272_v48 = vmul.f32 %v2846_v28, %v2846_v28  ;;  %v2857_v37 = vsel %vm1177_vm6, %v2788_v16, %v1513_v54  ;;  %vm1186_vm11 = vcmp.gt.f32.partialorder %v2833_v53, 0.0 }
 0x250   : > { %1751 = vpow2.f32 %v1216_v9  ;;  %v1230_v46 = vmul.f32 1.442695, %v1202_v56  ;;  %v1203_v6 = vmin.f32 %v2840_v21, 0.0  ;;  %v1569_v29 = vadd.f32 %v1568_v2, %v1567_v4  ;;  %v1588_v14 = vpop.f32.mrb[12].mxu1 }
 0x251   : > { %v2850_v44 = vmul.f32 %v2801_v8, %v1566_v52  ;;  %v1589_v40 = vpop.f32.mrb[13].mxu1  ;;  %v1748_v8 = vpop.eup %1747  ;;  %v1293_v55 = vsel %vm1286_vm1, %v1272_v48, 0.0  ;;  %v1273_v50 = vmul.f32 %v2857_v37, %v2857_v37  ;;  %v1520_v16 = vadd.f32 -1.0, %v1746_v51 }
 0x252   : > { %1753 = vpow2.f32 %v1230_v46  ;;  %v1232_v5 = vmul.f32 1.442695, %v1203_v6  ;;  %v2861_v20 = vmul.f32 %v2810_v30, %v1569_v29  ;;  %v1590_v26 = vadd.f32 %v1589_v40, %v1588_v14  ;;  %v1591_v36 = vpop.f32.mrb[14].mxu1  ;;  %1294 = vadd.xlane.f32.xlu1 %v1293_v55 }
 0x253   : > { %v1196_v0 = vmin.f32 %v2850_v44, 0.0  ;;  %v1592_v1 = vpop.f32.mrb[15].mxu1  ;;  %v1296_v31 = vsel %vm1286_vm1, %v1273_v50, 0.0  ;;  %v2874_v42 = vsel %vm1184_vm7, %v2791_v27, %v1520_v16  ;;  %v1521_v19 = vadd.f32 -1.0, %v1748_v8 }
 0x254   : > { %1755 = vpow2.f32 %v1232_v5  ;;  %v1197_v47 = vmin.f32 %v2861_v20, 0.0  ;;  %v2868_v11 = vmul.f32 %v1736_v62, %v1590_v26  ;;  %v1593_v43 = vadd.f32 %v1592_v1, %v1591_v36  ;;  %1297 = vadd.xlane.f32.xlu0 %v1296_v31 }
 0x255   : > { %v1218_v30 = vmul.f32 1.442695, %v1196_v0  ;;  %v1280_v62 = vmul.f32 %v2874_v42, %v2874_v42  ;;  %v2884_v32 = vsel %vm1185_vm8, %v2794_v45, %v1521_v19  ;;  %vm1187_vm12 = vcmp.gt.f32.partialorder %v2840_v21, 0.0 }
 0x256   : > { %v1220_v17 = vmul.f32 1.442695, %v1197_v47  ;;  %v1204_v33 = vmin.f32 %v2868_v11, 0.0  ;;  %v2877_v60 = vmul.f32 %v1742_v61, %v1593_v43  ;;  %v1281_v34 = vmul.f32 %v2884_v32, %v2884_v32 }
 0x257   : > { %1757 = vpow2.f32 %v1218_v30  ;;  %v1317_v3 = vsel %vm1286_vm1, %v1280_v62, 0.0  ;;  %vm1180_vm13 = vcmp.gt.f32.partialorder %v2850_v44, 0.0  ;;  %vm1181_vm14 = vcmp.gt.f32.partialorder %v2861_v20, 0.0 }
 0x258   : > { %v1750_v13 = vpop.eup %1749  ;;  %1759 = vpow2.f32 %v1220_v17  ;;  %v1234_v27 = vmul.f32 1.442695, %v1204_v33  ;;  %v1205_v7 = vmin.f32 %v2877_v60, 0.0  ;;  %1318 = vadd.xlane.f32.xlu1 %v1317_v3  ;;  %v1320_v45 = vsel %vm1286_vm1, %v1281_v34, 0.0 }
 0x259   : > { %v1514_v12 = vadd.f32 -1.0, %v1750_v13  ;;  %1321 = vadd.xlane.f32.xlu0 %v1320_v45  ;;  %vm1188_vm15 = vcmp.gt.f32.partialorder %v2868_v11, 0.0  ;;  %vm1189_vm0 = vcmp.gt.f32.partialorder %v2877_v60, 0.0 }
 0x25a   : > { %v1752_v39 = vpop.eup %1751  ;;  %1761 = vpow2.f32 %v1234_v27  ;;  %v1236_v15 = vmul.f32 1.442695, %v1205_v7 }
 0x25b   : > { %v2893_v49 = vsel %vm1178_vm9, %v2812_v25, %v1514_v12  ;;  %v1515_v23 = vadd.f32 -1.0, %v1752_v39 }
 0x25c   : > { %v1754_v61 = vpop.eup %1753  ;;  %1763 = vpow2.f32 %v1236_v15  ;;  %v1274_v35 = vmul.f32 %v2893_v49, %v2893_v49 }
 0x25d   : > { %v2899_v10 = vsel %vm1179_vm10, %v2822_v57, %v1515_v23  ;;  %v1522_v18 = vadd.f32 -1.0, %v1754_v61 }
 0x25e   : > { %v1756_v58 = vpop.eup %1755  ;;  %v1299_v22 = vsel %vm1286_vm1, %v1274_v35, 0.0  ;;  %v1275_v25 = vmul.f32 %v2899_v10, %v2899_v10 }
 0x25f   : > { %1300 = vadd.xlane.f32.xlu1 %v1299_v22  ;;  %v2906_v9 = vsel %vm1186_vm11, %v2833_v53, %v1522_v18  ;;  %v1523_v56 = vadd.f32 -1.0, %v1756_v58 }
 0x260   : > { %v1302_v4 = vsel %vm1286_vm1, %v1275_v25, 0.0  ;;  %v1282_v57 = vmul.f32 %v2906_v9, %v2906_v9 }
 0x261   : > { %v1758_v52 = vpop.eup %1757  ;;  %1303 = vadd.xlane.f32.xlu0 %v1302_v4  ;;  %v2913_v2 = vsel %vm1187_vm12, %v2840_v21, %v1523_v56 }
 0x262   : > { %v1760_v38 = vpop.eup %1759  ;;  %v1323_v54 = vsel %vm1286_vm1, %v1282_v57, 0.0  ;;  %v1283_v53 = vmul.f32 %v2913_v2, %v2913_v2  ;;  %v1516_v46 = vadd.f32 -1.0, %v1758_v52 }
 0x263   : > { %1324 = vadd.xlane.f32.xlu1 %v1323_v54  ;;  %v1517_v6 = vadd.f32 -1.0, %v1760_v38 }
 0x264   : > { %v1762_v29 = vpop.eup %1761  ;;  %v1326_v14 = vsel %vm1286_vm1, %v1283_v53, 0.0  ;;  %v2921_v51 = vsel %vm1180_vm13, %v2850_v44, %v1516_v46 }
 0x265   : > { %1327 = vadd.xlane.f32.xlu0 %v1326_v14  ;;  %v1276_v21 = vmul.f32 %v2921_v51, %v2921_v51  ;;  %v2927_v40 = vsel %vm1181_vm14, %v2861_v20, %v1517_v6  ;;  %v1524_v48 = vadd.f32 -1.0, %v1762_v29 }
 0x266   : > { %v1764_v5 = vpop.eup %1763  ;;  %v1277_v26 = vmul.f32 %v2927_v40, %v2927_v40 }
 0x267   : > { %v1305_v36 = vsel %vm1286_vm1, %v1276_v21, 0.0  ;;  %v2934_v44 = vsel %vm1188_vm15, %v2868_v11, %v1524_v48  ;;  %v1525_v8 = vadd.f32 -1.0, %v1764_v5 }
 0x268   : > { %1306 = vadd.xlane.f32.xlu1 %v1305_v36  ;;  %v1308_v0 = vsel %vm1286_vm1, %v1277_v26, 0.0  ;;  %v1284_v20 = vmul.f32 %v2934_v44, %v2934_v44 }
 0x269   : > { %1309 = vadd.xlane.f32.xlu0 %v1308_v0  ;;  %v2941_v1 = vsel %vm1189_vm0, %v2877_v60, %v1525_v8 }
 0x26a   : > { %v1329_v55 = vsel %vm1286_vm1, %v1284_v20, 0.0  ;;  %v1285_v50 = vmul.f32 %v2941_v1, %v2941_v1 }
 0x26c   : > { %1330 = vadd.xlane.f32.xlu1 %v1329_v55  ;;  %v1332_v16 = vsel %vm1286_vm1, %v1285_v50, 0.0 }
 0x26d   : > { %1333 = vadd.xlane.f32.xlu0 %v1332_v16 }
 0x2ca   : > { %v1289_v47 = vpop.xlane.xlu1 %1288 }
 0x2cb   : > { %v1335_v11 = vmax.f32 %v1289_v47, 1e-24 }
 0x2cd   : > { %v1292_v43 = vpop.xlane.xlu0 %1291  ;;  %1765 = vrsqrt.f32 %v1335_v11 }
 0x2ce   : > { %v1336_v30 = vmax.f32 %v1292_v43, 1e-24 }
 0x2d0   : > { %1767 = vrsqrt.f32 %v1336_v30 }
 0x2d6   : > { %v1313_v31 = vpop.xlane.xlu1 %1312 }
 0x2d7   : > { %v1343_v19 = vmax.f32 %v1313_v31, 1e-24  ;;  %v1766_v13 = vpop.eup %1765 }
 0x2d8   : > { %v1367_v7 = vmul.f32 %v1766_v13, %v2799_v59 }
 0x2d9   : > { %v1316_v17 = vpop.xlane.xlu0 %1315  ;;  %1769 = vrsqrt.f32 %v1343_v19 }
 0x2da   : > { %v1344_v33 = vmax.f32 %v1316_v17, 1e-24  ;;  %v1768_v34 = vpop.eup %1767  ;;  %1383 = vst.msk [vmem:[%s2951_s20] sm:$0xff] %vm1286_vm1, %v1367_v7 }
 0x2db   : > { %v1368_v12 = vmul.f32 %v1768_v34, %v2807_v24 }
 0x2dc   : > { %1771 = vrsqrt.f32 %v1344_v33 }
 0x2dd   : > { %1384 = vst.msk [vmem:[%s2951_s20 + $0x8] sm:$0xff] %vm1286_vm1, %v1368_v12 }
 0x2df   : > { %v1295_v60 = vpop.xlane.xlu1 %1294 }
 0x2e0   : > { %v1337_v62 = vmax.f32 %v1295_v60, 1e-24 }
 0x2e1   : > { %v1298_v27 = vpop.xlane.xlu0 %1297 }
 0x2e2   : > { %1773 = vrsqrt.f32 %v1337_v62  ;;  %v1338_v3 = vmax.f32 %v1298_v27, 1e-24 }
 0x2e3   : > { %v1770_v45 = vpop.eup %1769 }
 0x2e4   : > { %1775 = vrsqrt.f32 %v1338_v3  ;;  %v1375_v23 = vmul.f32 %v1770_v45, %v2818_v41 }
 0x2e5   : > { %v1319_v39 = vpop.xlane.xlu1 %1318 }
 0x2e6   : > { %v1345_v15 = vmax.f32 %v1319_v39, 1e-24  ;;  %v1322_v61 = vpop.xlane.xlu0 %1321  ;;  %v1772_v59 = vpop.eup %1771  ;;  %1391 = vst.msk [vmem:[%s2951_s20 + $0x40] sm:$0xff] %vm1286_vm1, %v1375_v23 }
 0x2e7   : > { %v1346_v35 = vmax.f32 %v1322_v61, 1e-24  ;;  %v1376_v18 = vmul.f32 %v1772_v59, %v2828_v63 }
 0x2e8   : > { %1777 = vrsqrt.f32 %v1345_v15 }
 0x2e9   : > { %1779 = vrsqrt.f32 %v1346_v35  ;;  %1392 = vst.msk [vmem:[%s2951_s20 + $0x48] sm:$0xff] %vm1286_vm1, %v1376_v18 }
 0x2ec   : > { %v1301_v58 = vpop.xlane.xlu1 %1300  ;;  %v1774_v22 = vpop.eup %1773 }
 0x2ed   : > { %v1339_v24 = vmax.f32 %v1301_v58, 1e-24  ;;  %v1369_v56 = vmul.f32 %v1774_v22, %v2846_v28 }
 0x2ee   : > { %v1304_v25 = vpop.xlane.xlu0 %1303  ;;  %v1776_v4 = vpop.eup %1775 }
 0x2ef   : > { %1781 = vrsqrt.f32 %v1339_v24  ;;  %v1340_v41 = vmax.f32 %v1304_v25, 1e-24  ;;  %1385 = vst.msk [vmem:[%s2951_s20 + $0x10] sm:$0xff] %vm1286_vm1, %v1369_v56  ;;  %v1370_v52 = vmul.f32 %v1776_v4, %v2857_v37 }
 0x2f0   : > { %v1325_v57 = vpop.xlane.xlu1 %1324 }
 0x2f1   : > { %1783 = vrsqrt.f32 %v1340_v41  ;;  %v1347_v63 = vmax.f32 %v1325_v57, 1e-24  ;;  %1386 = vst.msk [vmem:[%s2951_s20 + $0x18] sm:$0xff] %vm1286_vm1, %v1370_v52 }
 0x2f2   : > { %v1328_v38 = vpop.xlane.xlu0 %1327  ;;  %v1778_v54 = vpop.eup %1777 }
 0x2f3   : > { %1785 = vrsqrt.f32 %v1347_v63  ;;  %v1348_v53 = vmax.f32 %v1328_v38, 1e-24  ;;  %v1377_v28 = vmul.f32 %v1778_v54, %v2874_v42  ;;  %v1780_v6 = vpop.eup %1779 }
 0x2f4   : > { %v1378_v37 = vmul.f32 %v1780_v6, %v2884_v32 }
 0x2f5   : > { %1787 = vrsqrt.f32 %v1348_v53  ;;  %v1307_v46 = vpop.xlane.xlu1 %1306  ;;  %1393 = vst.msk [vmem:[%s2951_s20 + $0x50] sm:$0xff] %vm1286_vm1, %v1377_v28 }
 0x2f6   : > { %v1341_v29 = vmax.f32 %v1307_v46, 1e-24  ;;  %v1310_v14 = vpop.xlane.xlu0 %1309  ;;  %1394 = vst.msk [vmem:[%s2951_s20 + $0x58] sm:$0xff] %vm1286_vm1, %v1378_v37 }
 0x2f7   : > { %v1342_v21 = vmax.f32 %v1310_v14, 1e-24 }
 0x2f8   : > { %1789 = vrsqrt.f32 %v1341_v29 }
 0x2f9   : > { %v1782_v48 = vpop.eup %1781  ;;  %1791 = vrsqrt.f32 %v1342_v21  ;;  %v1331_v5 = vpop.xlane.xlu1 %1330 }
 0x2fa   : > { %v1371_v42 = vmul.f32 %v1782_v48, %v2893_v49  ;;  %v1349_v26 = vmax.f32 %v1331_v5, 1e-24  ;;  %v1334_v36 = vpop.xlane.xlu0 %1333 }
 0x2fb   : > { %v1784_v8 = vpop.eup %1783  ;;  %v1350_v0 = vmax.f32 %v1334_v36, 1e-24 }
 0x2fc   : > { %1387 = vst.msk [vmem:[%s2951_s20 + $0x20] sm:$0xff] %vm1286_vm1, %v1371_v42  ;;  %v1372_v32 = vmul.f32 %v1784_v8, %v2899_v10  ;;  %1793 = vrsqrt.f32 %v1349_v26 }
 0x2fd   : > { %v1786_v20 = vpop.eup %1785  ;;  %1795 = vrsqrt.f32 %v1350_v0 }
 0x2fe   : > { %1388 = vst.msk [vmem:[%s2951_s20 + $0x28] sm:$0xff] %vm1286_vm1, %v1372_v32  ;;  %v1379_v55 = vmul.f32 %v1786_v20, %v2906_v9 }
 0x2ff   : > { %v1788_v49 = vpop.eup %1787 }
 0x300   : > { %1395 = vst.msk [vmem:[%s2951_s20 + $0x60] sm:$0xff] %vm1286_vm1, %v1379_v55  ;;  %v1380_v50 = vmul.f32 %v1788_v49, %v2913_v2 }
 0x302   : > { %v1790_v16 = vpop.eup %1789  ;;  %1396 = vst.msk [vmem:[%s2951_s20 + $0x68] sm:$0xff] %vm1286_vm1, %v1380_v50 }
 0x303   : > { %v1792_v47 = vpop.eup %1791  ;;  %v1373_v10 = vmul.f32 %v1790_v16, %v2921_v51 }
 0x304   : > { %v1374_v11 = vmul.f32 %v1792_v47, %v2927_v40 }
 0x305   : > { %1389 = vst.msk [vmem:[%s2951_s20 + $0x30] sm:$0xff] %vm1286_vm1, %v1373_v10 }
 0x306   : > { %v1794_v43 = vpop.eup %1793  ;;  %1390 = vst.msk [vmem:[%s2951_s20 + $0x38] sm:$0xff] %vm1286_vm1, %v1374_v11 }
 0x307   : > { %v1796_v9 = vpop.eup %1795  ;;  %v1381_v30 = vmul.f32 %v1794_v43, %v2934_v44 }
 0x308   : > { %v1382_v31 = vmul.f32 %v1796_v9, %v2941_v1 }
 0x309   : > { %1397 = vst.msk [vmem:[%s2951_s20 + $0x70] sm:$0xff] %vm1286_vm1, %v1381_v30 }
 0x30a   : > { %1398 = vst.msk [vmem:[%s2951_s20 + $0x78] sm:$0xff] %vm1286_vm1, %v1382_v31 }
 0x30b PF: > { %s15_s18 = sadd.s32 1, %s1803_s18  }
 0x30c   : > { %p12_p4 = scmp.ge.s32.totalorder %s15_s18, 4  }
 0x30e   :  { %14 = sbr.rel (!%p12_p4) target bundleno = 1 (0x1), region = 76 }

// kernel: daegc_forward.9
= control target key start
LH: loop header
LB: loop body
LE: loop exit
PB: predicated region body
PF: predicated region fallthrough
CT: control target
= control target key end

     0   :  { %s3406_s0 = inlined_call_operand.vmem [shape: f32[256,64], index: 0, kind: input, shape index: {}]   ;;  %s3407_s1 = inlined_call_operand.vmem [shape: f32[256,32], index: 1, kind: input, shape index: {}]   ;;  %s3408_s2 = inlined_call_operand.vmem [shape: bf16[64,256], index: 2, kind: input, shape index: {}]   ;;  %s3409_s3 = inlined_call_operand.vmem [shape: bf16[32,256], index: 3, kind: input, shape index: {}]   ;;  %s3410_s4 = inlined_call_operand.vmem [shape: f32[32,8], index: 4, kind: input, shape index: {}]   ;;  %s3411_s5 = inlined_call_operand.vmem [shape: f32[1,8], index: 5, kind: input, shape index: {}]   ;;  %s3412_s6 = inlined_call_operand.hbm [shape: f32[256,256], index: 6, kind: output, shape index: {0}]   ;;  %s3413_s7 = inlined_call_operand.hbm [shape: f32[256,256], index: 7, kind: output, shape index: {1}]   ;;  %s3414_s8 = inlined_call_operand.vmem [shape: f32[256,8], index: 8, kind: output, shape index: {2}]  }
   0x1   :  { %3416 = sst [smem:[#allocation8_spill]] %s3406_s0 }
   0x2   :  { %3417 = sst [smem:[#allocation9_spill]] %s3407_s1 }
   0x3   :  { %3418 = sst [smem:[#allocation10_spill]] %s3408_s2 }
   0x4   :  { %14 = vsyncpa [#allocation3], 0 }
   0x5   :  { %16 = vsyncpa [#allocation3 + $0x1], 0 }
   0x6   :  { %17 = vsyncpa [#allocation5], 0 }
   0x7   :  { %19 = vsyncpa [#allocation5 + $0x1], 0  ;;  %s2583_s27 = smov 0   ;;  %s2585_s28 = smov 0  }
   0x8   :  { %s2587_s29 = smov 0   ;;  %s2589_s30 = smov 0  }
   0x9 LB: > { %s2604_s9 = sadd.s32 4294967295, %s2531_s30   ;;  %s1853_s10 = sadd.s32 4294967294, %s2531_s30   ;;  %s2531_s30 = sphi %s2589_s30, %s3428_s30   ;;  %s2527_s29 = sphi %s2587_s29, %s3427_s29   ;;  %s2523_s28 = sphi %s2585_s28, %s3426_s28   ;;  %s2519_s27 = sphi %s2583_s27, %s3425_s27  }
   0xa   : > { %s2608_s11 = sadd.s32 1, %s2531_s30   ;;  %s168_s12 = sadd.s32 1, %s2527_s29 }
   0xb   : > { %s165_s13 = ssub.s32 %s2531_s30, %s2608_s11  ;;  %p178_p0 = scmp.ne.s32.totalorder %s2527_s29, %s2523_s28 }
   0xc   : > { %p166_p1 = scmp.eq.s32.totalorder %s165_s13, 0  ;;  %p179_p2 = scmp.eq.s32.totalorder %s2604_s9, 1 }
   0xd   : > { %p184_p3 = scmp.ne.s32.totalorder %s2523_s28, %s2519_s27  ;;  %p185_p4 = scmp.eq.s32.totalorder %s1853_s10, 1 }
   0xe   : > { %s2619_s14 = scalar_select %p166_p1, %s2527_s29, %s168_s12  }
   0xf   : > { %p2621_p5 = por %p179_p2, %p178_p0  ;;  %p2625_p6 = por %p185_p4, %p184_p3 }
  0x10   : > { %p1856_p7 = scmp.ge.s32.totalorder %s2531_s30, 1  ;;  %p285_p8 = scmp.lt.s32.totalorder %s2531_s30, 3 }
  0x12   : > { %p286_p9 = pnand %p1856_p7, %p285_p8 }
  0x13   : > { %s3421_s2 = sld [smem:[#allocation10_spill]] (!%p286_p9)  ;;  %s1859_s19 = sshll.u32 (!%p286_p9), %s2604_s9, 4  ;;  %v2101_v1 = vld [vmem:[%s3409_s3 + $0x4] ss:$8 sps:$4 sm:$0xff] (!%p286_p9)   ;;  %v2533_v2 = vmov (!%p286_p9), 0   ;;  %vm837_vm0 = vcmask (!%p286_p9), 261120  }
  0x14   : > { %289 = sbr.rel (%p286_p9) target bundleno = 573 (0x23d), region = 44  ;;  %894 = vmatprep.mubr.bf16.mxu1 (!%p286_p9), %v2533_v2  ;;  %p335_p10 = scmp.lt.s32.totalorder (!%p286_p9), %s1859_s19, 31  ;;  %500 = vmatprep.mubr.bf16.mxu0 (!%p286_p9), %v2533_v2  ;;  %v2104_v4 = vld [vmem:[%s3409_s3] ss:$8 sps:$4 sm:$0xff] (!%p286_p9)   ;;  %v2107_v6 = vld [vmem:[%s3409_s3 + $0x14] ss:$8 sps:$4 sm:$0xff] (!%p286_p9)  }
  0x15   : > { %862 = vmatprep.subr.bf16.mxu1 (!%p286_p9), %v2101_v1  ;;  %v2110_v8 = vld [vmem:[%s3409_s3 + $0x10] ss:$8 sps:$4 sm:$0xff] (!%p286_p9)   ;;  %s3422_s1 = sld [smem:[#allocation9_spill]] (!%p286_p9)  ;;  %v1263_v10 = vld [vmem:[%s3410_s4] sm:$0xff] (!%p286_p9)  ;;  %v1264_v11 = vld [vmem:[%s3410_s4 + $0x8] sm:$0xff] (!%p286_p9)  ;;  %s3423_s0 = sld [smem:[#allocation8_spill]] (!%p286_p9) }
  0x16   : > { %863 = vmatpush1.bf16.msra.mxu1 (!%p286_p9), %v2104_v4  ;;  %v2040_v14 = vpack.c.bf16 (!%p286_p9), %v1264_v11, %v1263_v10  ;;  %v1265_v31 = vld [vmem:[%s3410_s4 + $0x10] sm:$0xff] (!%p286_p9)  ;;  %v1266_v35 = vld [vmem:[%s3410_s4 + $0x18] sm:$0xff] (!%p286_p9)  ;;  %vm443_vm1 = vcmask (!%p286_p9), 523264   ;;  %vm1579_vm2 = vcmask (!%p286_p9), 64512   ;;  %s3415_s12 = sshll.u32 (!%p286_p9), %s2604_s9, 12  ;;  %s2534_s25 = smov (!%p286_p9), [#allocation2]  }
  0x17   : > { %864 = vmatprep.subr.bf16.mxu1 (!%p286_p9), %v2107_v6  ;;  %v2044_v38 = vpack.c.bf16 (!%p286_p9), %v1266_v35, %v1265_v31  ;;  %s3266_s17 = scalar_lea.hbm (!%p286_p9), %s3412_s6, %s3415_s12 }
  0x19   : > { %v2099_v0 = vld [vmem:[%s3421_s2 + $0x4] ss:$8 sps:$4 sm:$0xff] (!%p286_p9)   ;;  %v2103_v3 = vld [vmem:[%s3421_s2] ss:$8 sps:$4 sm:$0xff] (!%p286_p9)   ;;  %v2105_v5 = vld [vmem:[%s3421_s2 + $0x14] ss:$8 sps:$4 sm:$0xff] (!%p286_p9)  }
  0x1a   : > { %468 = vmatprep.subr.bf16.mxu0 (!%p286_p9), %v2099_v0  ;;  %v2109_v7 = vld [vmem:[%s3421_s2 + $0x10] ss:$8 sps:$4 sm:$0xff] (!%p286_p9)   ;;  %v2111_v9 = vld [vmem:[%s3421_s2 + $0x24] ss:$8 sps:$4 sm:$0xff] (!%p286_p9)   ;;  %865 = vmatpush1.bf16.msra.mxu1 (!%p286_p9), %v2110_v8  ;;  %v2113_v16 = vld [vmem:[%s3421_s2 + $0x20] ss:$8 sps:$4 sm:$0xff] (!%p286_p9)  }
  0x1b   : > { %s3430_s19 = smov (!%p335_p10, %s1859_s19), 31  ;;  %469 = vmatpush1.bf16.msra.mxu0 %v2103_v3  ;;  %2048 = vmatprep.subr.bf16.mxu1 %v2040_v14  ;;  %v2114_v19 = vld [vmem:[%s3421_s2 + $0x34] ss:$8 sps:$4 sm:$0xff]   ;;  %v2116_v25 = vld [vmem:[%s3421_s2 + $0x30] ss:$8 sps:$4 sm:$0xff]  }
  0x1c   : > { %470 = vmatprep.subr.bf16.mxu0 %v2105_v5  ;;  %s2658_s22 = sshll.u32 %s3430_s19, 3 }
  0x1d   : > { %s2667_s10 = scalar_lea.vmem %s3422_s1, %s2658_s22  ;;  %s2697_s26 = scalar_lea.vmem %s3423_s0, %s2658_s22 }
  0x1e   : > { %v2676_v12 = vld [vmem:[%s2667_s10] sm:$0xff]  ;;  %v2679_v13 = vld [vmem:[%s2667_s10 + $0x8] sm:$0xff]  ;;  %v2700_v20 = vld [vmem:[%s2667_s10 + $0x10] sm:$0xff] }
  0x1f   : > { %471 = vmatpush1.bf16.msra.mxu0 %v2109_v7  ;;  %v805_v15 = vpack.c.bf16 %v2679_v13, %v2676_v12  ;;  %v1199_v17 = vmul.f32 %v2676_v12, %v2676_v12  ;;  %v1200_v18 = vmul.f32 %v2679_v13, %v2679_v13  ;;  %v2703_v21 = vld [vmem:[%s2667_s10 + $0x18] sm:$0xff]  ;;  %v1201_v23 = vmul.f32 %v2700_v20, %v2700_v20  ;;  %v355_v26 = vld [vmem:[%s2697_s26] sm:$0xff]  ;;  %v356_v27 = vld [vmem:[%s2697_s26 + $0x8] sm:$0xff] }
  0x20   : > { %472 = vmatprep.subr.bf16.mxu0 %v2111_v9  ;;  %v1202_v24 = vmul.f32 %v2703_v21, %v2703_v21  ;;  %v2720_v30 = vld [vmem:[%s2667_s10 + $0x28] sm:$0xff]  ;;  %v387_v32 = vpack.c.bf16 %v356_v27, %v355_v26  ;;  %v806_v33 = vpack.c.bf16 %v2703_v21, %v2700_v20  ;;  %v2728_v34 = vld [vmem:[%s2667_s10 + $0x20] sm:$0xff]  ;;  %v2739_v40 = vld [vmem:[%s2667_s10 + $0x38] sm:$0xff] }
  0x21   : > { %v1215_v22 = vsel %vm837_vm0, %v1199_v17, 0.0  ;;  %1917 = vmatmul.mubr.msk.bf16.vlgmr.msra.gmra.mrb[0].mxu1 %vm837_vm0, %v805_v15  ;;  %v1218_v28 = vsel %vm837_vm0, %v1200_v18, 0.0  ;;  %v1221_v29 = vsel %vm837_vm0, %v1201_v23, 0.0  ;;  %v1204_v37 = vmul.f32 %v2720_v30, %v2720_v30  ;;  %v357_v43 = vld [vmem:[%s2697_s26 + $0x10] sm:$0xff]  ;;  %v358_v44 = vld [vmem:[%s2697_s26 + $0x18] sm:$0xff]  ;;  %v2755_v47 = vld [vmem:[%s2667_s10 + $0x48] sm:$0xff] }
  0x22   : > { %1216 = vadd.xlane.f32.xlu0 %v1215_v22  ;;  %2050 = vmatpush3.bf16.msra.mxu1 %v2040_v14  ;;  %v1224_v36 = vsel %vm837_vm0, %v1202_v24, 0.0  ;;  %v1203_v39 = vmul.f32 %v2728_v34, %v2728_v34  ;;  %v1206_v42 = vmul.f32 %v2739_v40, %v2739_v40  ;;  %v2752_v46 = vld [vmem:[%s2667_s10 + $0x30] sm:$0xff]  ;;  %v388_v49 = vpack.c.bf16 %v358_v44, %v357_v43  ;;  %v2765_v53 = vld [vmem:[%s2667_s10 + $0x40] sm:$0xff]  ;;  %v2768_v54 = vld [vmem:[%s2667_s10 + $0x58] sm:$0xff] }
  0x23   : > { %473 = vmatpush1.bf16.msra.mxu0 %v2113_v16  ;;  %904 = vmatprep.mubr.bf16.mxu1 %v2533_v2  ;;  %v1230_v41 = vsel %vm837_vm0, %v1204_v37, 0.0  ;;  %v1205_v48 = vmul.f32 %v2752_v46, %v2752_v46  ;;  %v807_v50 = vpack.c.bf16 %v2720_v30, %v2728_v34  ;;  %v1208_v52 = vmul.f32 %v2755_v47, %v2755_v47  ;;  %v359_v59 = vld [vmem:[%s2697_s26 + $0x20] sm:$0xff]  ;;  %v360_v60 = vld [vmem:[%s2697_s26 + $0x28] sm:$0xff]  ;;  %v2783_v61 = vld [vmem:[%s2667_s10 + $0x50] sm:$0xff] }
  0x24   : > { %474 = vmatprep.subr.bf16.mxu0 %v2114_v19  ;;  %1222 = vadd.xlane.f32.xlu1 %v1221_v29  ;;  %v1227_v45 = vsel %vm837_vm0, %v1203_v39, 0.0  ;;  %v1236_v51 = vsel %vm837_vm0, %v1206_v42, 0.0  ;;  %v1207_v56 = vmul.f32 %v2765_v53, %v2765_v53  ;;  %v1210_v58 = vmul.f32 %v2768_v54, %v2768_v54  ;;  %v2786_v62 = vld [vmem:[%s2667_s10 + $0x68] sm:$0xff]  ;;  %v2797_v6 = vld [vmem:[%s2667_s10 + $0x60] sm:$0xff]  ;;  %v2800_v7 = vld [vmem:[%s2667_s10 + $0x78] sm:$0xff] }
  0x25   : > { %2049 = vmatprep.subr.bf16.mxu1 %v2044_v38  ;;  %v1233_v55 = vsel %vm837_vm0, %v1205_v48, 0.0  ;;  %v1242_v57 = vsel %vm837_vm0, %v1208_v52, 0.0  ;;  %v1209_v0 = vmul.f32 %v2783_v61, %v2783_v61  ;;  %v389_v1 = vpack.c.bf16 %v360_v60, %v359_v59  ;;  %v362_v15 = vld [vmem:[%s2697_s26 + $0x38] sm:$0xff]  ;;  %v385_v16 = vld [vmem:[%s2667_s10 + $0x70] sm:$0xff]  ;;  %v364_v26 = vld [vmem:[%s2697_s26 + $0x48] sm:$0xff]  ;;  %s2881_s10 = sand.u32 1, %s2523_s28  }
  0x26   : > { %1219 = vadd.xlane.f32.xlu0 %v1218_v28  ;;  %2051 = vmatpush3.bf16.msra.mxu1 %v2044_v38  ;;  %v1239_v63 = vsel %vm837_vm0, %v1207_v56, 0.0  ;;  %v808_v3 = vpack.c.bf16 %v2739_v40, %v2752_v46  ;;  %v1248_v4 = vsel %vm837_vm0, %v1210_v58, 0.0  ;;  %v1212_v5 = vmul.f32 %v2786_v62, %v2786_v62  ;;  %v365_v29 = vld [vmem:[%s2697_s26 + $0x50] sm:$0xff]  ;;  %v366_v31 = vld [vmem:[%s2697_s26 + $0x58] sm:$0xff]  ;;  %v367_v35 = vld [vmem:[%s2697_s26 + $0x60] sm:$0xff]  ;;  %s1857_s21 = sshll.u32 %s2881_s10, 8 }
  0x27   : > { %475 = vmatpush1.bf16.msra.mxu0 %v2116_v25  ;;  %v1245_v8 = vsel %vm837_vm0, %v1209_v0, 0.0  ;;  %v1211_v9 = vmul.f32 %v2797_v6, %v2797_v6  ;;  %v1214_v11 = vmul.f32 %v2800_v7, %v2800_v7  ;;  %v1213_v18 = vmul.f32 %v385_v16, %v385_v16  ;;  %v363_v25 = vld [vmem:[%s2697_s26 + $0x40] sm:$0xff]  ;;  %v369_v39 = vld [vmem:[%s2697_s26 + $0x70] sm:$0xff]  ;;  %s2896_s23 = scalar_lea.vmem [#allocation4], %s1857_s21  ;;  %s2920_s24 = scalar_lea.vmem [#allocation2], %s1857_s21 }
  0x28   : > { %2041 = vmatprep.subr.bf16.mxu0 %v2040_v14  ;;  %1225 = vadd.xlane.f32.xlu1 %v1224_v36  ;;  %v1254_v10 = vsel %vm837_vm0, %v1212_v5, 0.0  ;;  %v809_v22 = vpack.c.bf16 %v2755_v47, %v2765_v53  ;;  %v391_v27 = vpack.c.bf16 %v364_v26, %v363_v25  ;;  %v810_v28 = vpack.c.bf16 %v2768_v54, %v2783_v61  ;;  %v368_v36 = vld [vmem:[%s2697_s26 + $0x68] sm:$0xff]  ;;  %s1701_s18 = sshll.u32 %s2920_s24, 4  ;;  %s1677_s20 = scalar_lea.sflag [#allocation3], %s2881_s10  ;;  %s3269_s18 = int_to_ptr.vmem [resolvable:$true] %s1701_s18 }
  0x29   : > { %1918 = vmatmul.mubr.msk.bf16.gmra.mrb[4].mxu1 %vm837_vm0, %v806_v33  ;;  %v1251_v17 = vsel %vm837_vm0, %v1211_v9, 0.0  ;;  %v1260_v23 = vsel %vm837_vm0, %v1214_v11, 0.0  ;;  %v1257_v24 = vsel %vm837_vm0, %v1213_v18, 0.0  ;;  %v811_v33 = vpack.c.bf16 %v2786_v62, %v2797_v6  ;;  %s2437_s21 = scalar_lea.vmem %s3269_s18, 4096 }
  0x2a   : > { %1873 = vmatmul.mubr.msk.bf16.vlgmr.msra.gmra.mrb[0].mxu0 %vm443_vm1, %v387_v32  ;;  %914 = vmatprep.mubr.bf16.mxu1 %v2533_v2  ;;  %v392_v32 = vpack.c.bf16 %v366_v31, %v365_v29  ;;  %v393_v37 = vpack.c.bf16 %v368_v36, %v367_v35  ;;  %p2438_p11 = scmp.ne.s32.totalorder %s3269_s18, %s2437_s21 }
  0x2b   : > { %2043 = vmatpush3.bf16.msra.mxu0 %v2040_v14  ;;  %510 = vmatprep.mubr.bf16.mxu0 %v2533_v2  ;;  %v361_v14 = vld [vmem:[%s2697_s26 + $0x30] sm:$0xff] }
  0x2c   : > { %2045 = vmatprep.subr.bf16.mxu0 %v2044_v38  ;;  %1231 = vadd.xlane.f32.xlu1 %v1230_v41  ;;  %v390_v19 = vpack.c.bf16 %v362_v15, %v361_v14  ;;  %v370_v41 = vld [vmem:[%s2697_s26 + $0x78] sm:$0xff]  ;;  %p2439_p12 = pnand %p2438_p11, %p2621_p5  ;;  %s2441_s26 = sshll.u32 %s2534_s25, 4  ;;  %s2442_s26 = int_to_ptr.vmem [resolvable:$false] %s2441_s26 }
  0x2d   : > { %1228 = vadd.xlane.f32.xlu0 %v1227_v45  ;;  %v394_v42 = vpack.c.bf16 %v370_v41, %v369_v39  ;;  %s2443_s0 = scalar_lea.vmem %s2442_s26, 8192  ;;  %p2444_p0 = scmp.lt.s32.totalorder %s3269_s18, %s2442_s26 }
  0x2e   : > { %p2440_p13 = pneg %p2439_p12  ;;  %p2445_p1 = scmp.lt.s32.totalorder %s2443_s0, %s2437_s21 }
  0x2f   : > { %2047 = vmatpush3.bf16.msra.mxu0 %v2044_v38  ;;  %v812_v38 = vpack.c.bf16 %v2800_v7, %v385_v16 }
  0x30   : > { %1237 = vadd.xlane.f32.xlu1 %v1236_v51  ;;  %p2446_p2 = por %p2445_p1, %p2444_p0 }
  0x31   : > { %1919 = vmatmul.mubr.msk.bf16.gmra.mrb[8].mxu1 %vm837_vm0, %v807_v50  ;;  %1234 = vadd.xlane.f32.xlu0 %v1233_v55 }
  0x32   : > { %1874 = vmatmul.mubr.msk.bf16.gmra.mrb[4].mxu0 %vm443_vm1, %v388_v49  ;;  %924 = vmatprep.mubr.bf16.mxu1 %v2533_v2  ;;  %p2447_p3 = pnand %p2446_p2, %p2440_p13 }
  0x33   : > { %520 = vmatprep.mubr.bf16.mxu0 %v2533_v2 }
  0x34   : > { %1243 = vadd.xlane.f32.xlu1 %v1242_v57 }
  0x35   : > { %1240 = vadd.xlane.f32.xlu0 %v1239_v63 }
  0x38   : > { %1249 = vadd.xlane.f32.xlu1 %v1248_v4 }
  0x39   : > { %1920 = vmatmul.mubr.msk.bf16.gmra.mrb[12].mxu1 %vm837_vm0, %v808_v3  ;;  %1246 = vadd.xlane.f32.xlu0 %v1245_v8 }
  0x3a   : > { %1875 = vmatmul.mubr.msk.bf16.gmra.mrb[8].mxu0 %vm443_vm1, %v389_v1  ;;  %934 = vmatprep.mubr.bf16.mxu1 %v2533_v2 }
  0x3b   : > { %530 = vmatprep.mubr.bf16.mxu0 %v2533_v2 }
  0x3c   : > { %1255 = vadd.xlane.f32.xlu1 %v1254_v10 }
  0x3d   : > { %1252 = vadd.xlane.f32.xlu0 %v1251_v17 }
  0x40   : > { %1261 = vadd.xlane.f32.xlu1 %v1260_v23 }
  0x41   : > { %1921 = vmatmul.mubr.msk.bf16.gmra.mrb[16].mxu1 %vm837_vm0, %v809_v22  ;;  %1258 = vadd.xlane.f32.xlu0 %v1257_v24 }
  0x42   : > { %1876 = vmatmul.mubr.msk.bf16.gmra.mrb[12].mxu0 %vm443_vm1, %v390_v19  ;;  %944 = vmatprep.mubr.bf16.mxu1 %v2533_v2 }
  0x43   : > { %540 = vmatprep.mubr.bf16.mxu0 %v2533_v2 }
  0x49   : > { %1922 = vmatmul.mubr.msk.bf16.gmra.mrb[20].mxu1 %vm837_vm0, %v810_v28 }
  0x4a   : > { %1877 = vmatmul.mubr.msk.bf16.gmra.mrb[16].mxu0 %vm443_vm1, %v391_v27  ;;  %954 = vmatprep.mubr.bf16.mxu1 %v2533_v2 }
  0x4b   : > { %550 = vmatprep.mubr.bf16.mxu0 %v2533_v2 }
  0x51   : > { %1923 = vmatmul.mubr.msk.bf16.gmra.mrb[24].mxu1 %vm837_vm0, %v811_v33 }
  0x52   : > { %1878 = vmatmul.mubr.msk.bf16.gmra.mrb[20].mxu0 %vm443_vm1, %v392_v32  ;;  %964 = vmatprep.mubr.bf16.mxu1 %v2533_v2 }
  0x53   : > { %560 = vmatprep.mubr.bf16.mxu0 %v2533_v2 }
  0x59   : > { %1924 = vmatmul.mubr.msk.bf16.gmra.mrb[28].mxu1 %vm837_vm0, %v812_v38 }
  0x5a   : > { %1879 = vmatmul.mubr.msk.bf16.gmra.mrb[24].mxu0 %vm443_vm1, %v393_v37  ;;  %2025 = vmatprep.mubr.msk.f32.mxu1 %vm837_vm0, %v2752_v46 }
  0x5b   : > { %570 = vmatprep.mubr.bf16.mxu0 %v2533_v2 }
  0x61   : > { %2026 = vmatmul.mubr.msk.f32.vlgmr.msra.gmra.mrb[32].mxu1 %vm837_vm0, %v2739_v40 }
  0x62   : > { %1880 = vmatmul.mubr.msk.bf16.gmra.mrb[28].mxu0 %vm443_vm1, %v394_v42  ;;  %2028 = vmatprep.mubr.msk.f32.mxu1 %vm837_vm0, %v2765_v53 }
  0x63   : > { %2016 = vmatprep.mubr.msk.f32.mxu0 %vm837_vm0, %v2676_v12 }
  0x65   : > { %2029 = vmatmul.mubr.msk.f32.gmra.mrb[34].mxu1 %vm837_vm0, %v2755_v47 }
  0x66   : > { %2031 = vmatprep.mubr.msk.f32.mxu1 %vm837_vm0, %v2783_v61 }
  0x69   : > { %2032 = vmatmul.mubr.msk.f32.gmra.mrb[36].mxu1 %vm837_vm0, %v2768_v54 }
  0x6a   : > { %2017 = vmatmul.mubr.msk.f32.vlgmr.msra.gmra.mrb[32].mxu0 %vm837_vm0, %v2679_v13  ;;  %2034 = vmatprep.mubr.msk.f32.mxu1 %vm837_vm0, %v2797_v6 }
  0x6b   : > { %2019 = vmatprep.mubr.msk.f32.mxu0 %vm837_vm0, %v2700_v20 }
  0x6d   : > { %2035 = vmatmul.mubr.msk.f32.gmra.mrb[38].mxu1 %vm837_vm0, %v2786_v62 }
  0x6e   : > { %2020 = vmatmul.mubr.msk.f32.gmra.mrb[34].mxu0 %vm837_vm0, %v2703_v21  ;;  %2037 = vmatprep.mubr.msk.f32.mxu1 %vm837_vm0, %v385_v16 }
  0x6f   : > { %2022 = vmatprep.mubr.msk.f32.mxu0 %vm837_vm0, %v2728_v34 }
  0x71   : > { %2038 = vmatmul.mubr.msk.f32.gmra.mrb[40].mxu1 %vm837_vm0, %v2800_v7 }
  0x72   : > { %2023 = vmatmul.mubr.msk.f32.gmra.mrb[36].mxu0 %vm837_vm0, %v2720_v30 }
  0xf4   : > { %v896_v2 = vpop.f32.mrb[0].mxu1 }
  0xf5   : > { %v1925_v12 = vmul.f32 -1.442695, %v896_v2  ;;  %v898_v13 = vpop.f32.mrb[1].mxu1 }
  0xf6   : > { %v1926_v20 = vmul.f32 -1.442695, %v898_v13  ;;  %v900_v40 = vpop.f32.mrb[2].mxu1 }
  0xf7   : > { %2117 = vpow2.f32 %v1925_v12  ;;  %v1927_v21 = vmul.f32 -1.442695, %v900_v40  ;;  %v902_v43 = vpop.f32.mrb[3].mxu1 }
  0xf8   : > { %2119 = vpow2.f32 %v1926_v20  ;;  %v1928_v44 = vmul.f32 -1.442695, %v902_v43 }
  0xf9   : > { %2121 = vpow2.f32 %v1927_v21 }
  0xfa   : > { %2123 = vpow2.f32 %v1928_v44 }
  0xfc   : > { %v906_v45 = vpop.f32.mrb[4].mxu1 }
  0xfd   : > { %v502_v34 = vpop.f32.mrb[0].mxu0  ;;  %v1929_v47 = vmul.f32 -1.442695, %v906_v45  ;;  %v908_v48 = vpop.f32.mrb[5].mxu1 }
  0xfe   : > { %v1881_v46 = vmul.f32 -1.442695, %v502_v34  ;;  %v504_v30 = vpop.f32.mrb[1].mxu0  ;;  %v1930_v50 = vmul.f32 -1.442695, %v908_v48  ;;  %v910_v52 = vpop.f32.mrb[6].mxu1 }
  0xff   : > { %v1882_v49 = vmul.f32 -1.442695, %v504_v30  ;;  %v506_v51 = vpop.f32.mrb[2].mxu0  ;;  %v912_v55 = vpop.f32.mrb[7].mxu1  ;;  %v1931_v63 = vmul.f32 -1.442695, %v910_v52 }
 0x100   : > { %2125 = vpow2.f32 %v1881_v46  ;;  %v1883_v53 = vmul.f32 -1.442695, %v506_v51  ;;  %v508_v54 = vpop.f32.mrb[3].mxu0  ;;  %v1932_v6 = vmul.f32 -1.442695, %v912_v55 }
 0x101   : > { %2127 = vpow2.f32 %v1929_v47  ;;  %v2118_v56 = vpop.eup %2117  ;;  %v1884_v4 = vmul.f32 -1.442695, %v508_v54 }
 0x102   : > { %2129 = vpow2.f32 %v1882_v49  ;;  %v2120_v57 = vpop.eup %2119  ;;  %v1071_v58 = vadd.f32 1.0, %v2118_v56 }
 0x103   : > { %2131 = vpow2.f32 %v1930_v50  ;;  %v2122_v59 = vpop.eup %2121  ;;  %v1072_v60 = vadd.f32 1.0, %v2120_v57 }
 0x104   : > { %2133 = vpow2.f32 %v1883_v53  ;;  %v2124_v61 = vpop.eup %2123  ;;  %v1073_v62 = vadd.f32 1.0, %v2122_v59  ;;  %v916_v1 = vpop.f32.mrb[8].mxu1 }
 0x105   : > { %2135 = vrcp.f32 %v1071_v58  ;;  %v512_v0 = vpop.f32.mrb[4].mxu0  ;;  %v1074_v3 = vadd.f32 1.0, %v2124_v61  ;;  %v918_v7 = vpop.f32.mrb[9].mxu1  ;;  %v1933_v28 = vmul.f32 -1.442695, %v916_v1 }
 0x106   : > { %2137 = vrcp.f32 %v1072_v60  ;;  %v514_v5 = vpop.f32.mrb[5].mxu0  ;;  %v1885_v9 = vmul.f32 -1.442695, %v512_v0  ;;  %v920_v10 = vpop.f32.mrb[10].mxu1  ;;  %v1934_v38 = vmul.f32 -1.442695, %v918_v7 }
 0x107   : > { %2139 = vrcp.f32 %v1073_v62  ;;  %v516_v8 = vpop.f32.mrb[6].mxu0  ;;  %v2883_v14 = vpop.f32.mrb[11].mxu1  ;;  %v1886_v33 = vmul.f32 -1.442695, %v514_v5  ;;  %v1935_v30 = vmul.f32 -1.442695, %v920_v10 }
 0x108   : > { %2141 = vrcp.f32 %v1074_v3  ;;  %v518_v11 = vpop.f32.mrb[7].mxu0  ;;  %v1887_v2 = vmul.f32 -1.442695, %v516_v8  ;;  %v1936_v55 = vmul.f32 -1.442695, %v2883_v14 }
 0x109   : > { %2143 = vpow2.f32 %v1931_v63  ;;  %v1888_v51 = vmul.f32 -1.442695, %v518_v11 }
 0x10a   : > { %v2126_v15 = vpop.eup %2125  ;;  %2145 = vpow2.f32 %v1884_v4 }
 0x10b   : > { %v2128_v16 = vpop.eup %2127  ;;  %v677_v17 = vadd.f32 1.0, %v2126_v15  ;;  %2147 = vpow2.f32 %v1932_v6 }
 0x10c   : > { %v2130_v18 = vpop.eup %2129  ;;  %v1075_v19 = vadd.f32 1.0, %v2128_v16  ;;  %2149 = vpow2.f32 %v1885_v9  ;;  %v2886_v25 = vpop.f32.mrb[12].mxu1 }
 0x10d   : > { %v2132_v22 = vpop.eup %2131  ;;  %2151 = vrcp.f32 %v677_v17  ;;  %v678_v23 = vadd.f32 1.0, %v2130_v18  ;;  %v522_v24 = vpop.f32.mrb[8].mxu0  ;;  %v1937_v62 = vmul.f32 -1.442695, %v2886_v25 }
 0x10e   : > { %v2134_v26 = vpop.eup %2133  ;;  %2153 = vrcp.f32 %v1075_v19  ;;  %v1076_v27 = vadd.f32 1.0, %v2132_v22  ;;  %v2888_v29 = vpop.f32.mrb[9].mxu0  ;;  %v1889_v59 = vmul.f32 -1.442695, %v522_v24 }
 0x10f   : > { %v2136_v31 = vpop.eup %2135  ;;  %2155 = vrcp.f32 %v678_v23  ;;  %v679_v32 = vadd.f32 1.0, %v2134_v26  ;;  %v2890_v35 = vpop.f32.mrb[13].mxu1  ;;  %v1890_v11 = vmul.f32 -1.442695, %v2888_v29 }
 0x110   : > { %v2892_v36 = vpop.f32.mrb[10].mxu0  ;;  %v2138_v37 = vpop.eup %2137  ;;  %1167 = vst [vmem:[%s2896_s23] sm:$0xff] %v2136_v31  ;;  %2157 = vrcp.f32 %v1076_v27  ;;  %v1938_v18 = vmul.f32 -1.442695, %v2890_v35 }
 0x111   : > { %v2899_v39 = vpop.f32.mrb[14].mxu1  ;;  %v2901_v41 = vpop.f32.mrb[11].mxu0  ;;  %1168 = vst [vmem:[%s2896_s23 + $0x8] sm:$0xff] %v2138_v37  ;;  %2159 = vrcp.f32 %v679_v32  ;;  %v1891_v23 = vmul.f32 -1.442695, %v2892_v36 }
 0x112   : > { %v2140_v42 = vpop.eup %2139  ;;  %v2904_v12 = vpop.f32.mrb[15].mxu1  ;;  %2161 = vpow2.f32 %v1933_v28  ;;  %v1939_v27 = vmul.f32 -1.442695, %v2899_v39 }
 0x113   : > { %v2142_v13 = vpop.eup %2141  ;;  %1169 = vst [vmem:[%s2896_s23 + $0x10] sm:$0xff] %v2140_v42  ;;  %2163 = vpow2.f32 %v1886_v33 }
 0x114   : > { %v2144_v20 = vpop.eup %2143  ;;  %1170 = vst [vmem:[%s2896_s23 + $0x18] sm:$0xff] %v2142_v13  ;;  %2165 = vpow2.f32 %v1934_v38  ;;  %v2910_v45 = vpop.f32.mrb[16].mxu1 }
 0x115   : > { %v2146_v40 = vpop.eup %2145  ;;  %v1077_v21 = vadd.f32 1.0, %v2144_v20  ;;  %2167 = vpow2.f32 %v1887_v2  ;;  %v2908_v34 = vpop.f32.mrb[12].mxu0 }
 0x116   : > { %v2148_v43 = vpop.eup %2147  ;;  %v680_v44 = vadd.f32 1.0, %v2146_v40  ;;  %v2912_v48 = vpop.f32.mrb[13].mxu0 }
 0x117   : > { %v2150_v46 = vpop.eup %2149  ;;  %2169 = vrcp.f32 %v1077_v21  ;;  %v1078_v47 = vadd.f32 1.0, %v2148_v43  ;;  %v2914_v52 = vpop.f32.mrb[17].mxu1  ;;  %v1892_v21 = vmul.f32 -1.442695, %v2901_v41  ;;  %v1941_v41 = vmul.f32 -1.442695, %v2910_v45 }
 0x118   : > { %v2152_v49 = vpop.eup %2151  ;;  %2171 = vrcp.f32 %v680_v44  ;;  %v681_v50 = vadd.f32 1.0, %v2150_v46  ;;  %v2916_v53 = vpop.f32.mrb[14].mxu0 }
 0x119   : > { %v2154_v54 = vpop.eup %2153  ;;  %773 = vst [vmem:[%s2920_s24] sm:$0xff] %v2152_v49  ;;  %2173 = vrcp.f32 %v1078_v47  ;;  %v2924_v56 = vpop.f32.mrb[18].mxu1  ;;  %v1940_v47 = vmul.f32 -1.442695, %v2904_v12 }
 0x11a   : > { %v2926_v57 = vpop.f32.mrb[15].mxu0  ;;  %v2156_v58 = vpop.eup %2155  ;;  %1171 = vst [vmem:[%s2896_s23 + $0x20] sm:$0xff] %v2154_v54  ;;  %2175 = vrcp.f32 %v681_v50 }
 0x11b   : > { %v2929_v60 = vpop.f32.mrb[19].mxu1  ;;  %v2158_v61 = vpop.eup %2157  ;;  %774 = vst [vmem:[%s2920_s24 + $0x8] sm:$0xff] %v2156_v58  ;;  %2177 = vpow2.f32 %v1935_v30 }
 0x11c   : > { %v2160_v63 = vpop.eup %2159  ;;  %1172 = vst [vmem:[%s2896_s23 + $0x28] sm:$0xff] %v2158_v61  ;;  %2179 = vpow2.f32 %v1888_v51  ;;  %v2937_v5 = vpop.f32.mrb[20].mxu1  ;;  %v1893_v51 = vmul.f32 -1.442695, %v2908_v34 }
 0x11d   : > { %v2162_v0 = vpop.eup %2161  ;;  %775 = vst [vmem:[%s2920_s24 + $0x10] sm:$0xff] %v2160_v63  ;;  %2181 = vpow2.f32 %v1936_v55  ;;  %v2935_v4 = vpop.f32.mrb[16].mxu0 }
 0x11e   : > { %v2164_v1 = vpop.eup %2163  ;;  %v1079_v3 = vadd.f32 1.0, %v2162_v0  ;;  %2183 = vpow2.f32 %v1889_v59  ;;  %v2939_v8 = vpop.f32.mrb[17].mxu0 }
 0x11f   : > { %v2166_v6 = vpop.eup %2165  ;;  %v682_v7 = vadd.f32 1.0, %v2164_v1  ;;  %2185 = vpow2.f32 %v1937_v62  ;;  %v2942_v14 = vpop.f32.mrb[21].mxu1 }
 0x120   : > { %v2168_v9 = vpop.eup %2167  ;;  %2187 = vrcp.f32 %v1079_v3  ;;  %v1080_v10 = vadd.f32 1.0, %v2166_v6  ;;  %v2944_v15 = vpop.f32.mrb[18].mxu0 }
 0x121   : > { %v2170_v16 = vpop.eup %2169  ;;  %2189 = vrcp.f32 %v682_v7  ;;  %v683_v17 = vadd.f32 1.0, %v2168_v9  ;;  %v2947_v19 = vpop.f32.mrb[22].mxu1  ;;  %v1894_v7 = vmul.f32 -1.442695, %v2912_v48 }
 0x122   : > { %v2172_v22 = vpop.eup %2171  ;;  %1173 = vst [vmem:[%s2896_s23 + $0x30] sm:$0xff] %v2170_v16  ;;  %2191 = vrcp.f32 %v1080_v10  ;;  %v2951_v24 = vpop.f32.mrb[19].mxu0  ;;  %v1942_v16 = vmul.f32 -1.442695, %v2914_v52  ;;  %v1896_v52 = vmul.f32 -1.442695, %v2926_v57 }
 0x123   : > { %v2953_v25 = vpop.f32.mrb[23].mxu1  ;;  %v2174_v26 = vpop.eup %2173  ;;  %776 = vst [vmem:[%s2920_s24 + $0x18] sm:$0xff] %v2172_v22  ;;  %2193 = vrcp.f32 %v683_v17 }
 0x124   : > { %v2176_v28 = vpop.eup %2175  ;;  %1174 = vst [vmem:[%s2896_s23 + $0x38] sm:$0xff] %v2174_v26  ;;  %2195 = vpow2.f32 %v1890_v11  ;;  %v2961_v35 = vpop.f32.mrb[24].mxu1  ;;  %v1943_v26 = vmul.f32 -1.442695, %v2924_v56 }
 0x125   : > { %v2178_v29 = vpop.eup %2177  ;;  %777 = vst [vmem:[%s2920_s24 + $0x20] sm:$0xff] %v2176_v28  ;;  %2197 = vpow2.f32 %v1938_v18  ;;  %v2959_v33 = vpop.f32.mrb[20].mxu0 }
 0x126   : > { %v2180_v31 = vpop.eup %2179  ;;  %v1081_v32 = vadd.f32 1.0, %v2178_v29  ;;  %2199 = vpow2.f32 %v1891_v23  ;;  %v2963_v38 = vpop.f32.mrb[21].mxu0  ;;  %v1895_v23 = vmul.f32 -1.442695, %v2916_v53 }
 0x127   : > { %v2182_v36 = vpop.eup %2181  ;;  %v684_v37 = vadd.f32 1.0, %v2180_v31  ;;  %2201 = vpow2.f32 %v1939_v27  ;;  %v2965_v2 = vpop.f32.mrb[25].mxu1 }
 0x128   : > { %v2184_v42 = vpop.eup %2183  ;;  %2203 = vrcp.f32 %v1081_v32  ;;  %v1082_v39 = vadd.f32 1.0, %v2182_v36  ;;  %v2967_v13 = vpop.f32.mrb[22].mxu0 }
 0x129   : > { %v2186_v20 = vpop.eup %2185  ;;  %2205 = vrcp.f32 %v684_v37  ;;  %v685_v40 = vadd.f32 1.0, %v2184_v42  ;;  %v2970_v43 = vpop.f32.mrb[26].mxu1 }
 0x12a   : > { %v2188_v44 = vpop.eup %2187  ;;  %2207 = vrcp.f32 %v1082_v39  ;;  %v1083_v46 = vadd.f32 1.0, %v2186_v20  ;;  %v2973_v30 = vpop.f32.mrb[23].mxu0 }
 0x12b   : > { %v2975_v49 = vpop.f32.mrb[27].mxu1  ;;  %v2190_v50 = vpop.eup %2189  ;;  %1175 = vst [vmem:[%s2896_s23 + $0x40] sm:$0xff] %v2188_v44  ;;  %2209 = vrcp.f32 %v685_v40  ;;  %v1944_v44 = vmul.f32 -1.442695, %v2929_v60  ;;  %v1898_v60 = vmul.f32 -1.442695, %v2939_v8 }
 0x12c   : > { %v2192_v54 = vpop.eup %2191  ;;  %778 = vst [vmem:[%s2920_s24 + $0x28] sm:$0xff] %v2190_v50  ;;  %2211 = vrcp.f32 %v1083_v46  ;;  %v2985_v59 = vpop.f32.mrb[28].mxu1 }
 0x12d   : > { %v2194_v55 = vpop.eup %2193  ;;  %1176 = vst [vmem:[%s2896_s23 + $0x48] sm:$0xff] %v2192_v54  ;;  %2213 = vpow2.f32 %v1892_v21  ;;  %v2983_v12 = vpop.f32.mrb[24].mxu0 }
 0x12e   : > { %v2196_v58 = vpop.eup %2195  ;;  %779 = vst [vmem:[%s2920_s24 + $0x30] sm:$0xff] %v2194_v55  ;;  %2215 = vpow2.f32 %v1940_v47  ;;  %v2987_v63 = vpop.f32.mrb[25].mxu0  ;;  %v1945_v55 = vmul.f32 -1.442695, %v2937_v5 }
 0x12f   : > { %v2198_v61 = vpop.eup %2197  ;;  %v686_v62 = vadd.f32 1.0, %v2196_v58  ;;  %2217 = vpow2.f32 %v1893_v51  ;;  %v2989_v45 = vpop.f32.mrb[29].mxu1  ;;  %v1897_v51 = vmul.f32 -1.442695, %v2935_v4 }
 0x130   : > { %v2200_v34 = vpop.eup %2199  ;;  %v1084_v0 = vadd.f32 1.0, %v2198_v61  ;;  %2219 = vpow2.f32 %v1941_v41  ;;  %v2991_v1 = vpop.f32.mrb[26].mxu0 }
 0x131   : > { %v2202_v3 = vpop.eup %2201  ;;  %2221 = vrcp.f32 %v686_v62  ;;  %v687_v6 = vadd.f32 1.0, %v2200_v34  ;;  %v2994_v9 = vpop.f32.mrb[30].mxu1 }
 0x132   : > { %v2204_v10 = vpop.eup %2203  ;;  %2223 = vrcp.f32 %v1084_v0  ;;  %v1085_v11 = vadd.f32 1.0, %v2202_v3  ;;  %v2997_v17 = vpop.f32.mrb[27].mxu0 }
 0x133   : > { %v2999_v18 = vpop.f32.mrb[31].mxu1  ;;  %v2206_v22 = vpop.eup %2205  ;;  %1177 = vst [vmem:[%s2896_s23 + $0x50] sm:$0xff] %v2204_v10  ;;  %2225 = vrcp.f32 %v687_v6 }
 0x134   : > { %v2208_v48 = vpop.eup %2207  ;;  %780 = vst [vmem:[%s2920_s24 + $0x38] sm:$0xff] %v2206_v22  ;;  %2227 = vrcp.f32 %v1085_v11  ;;  %v3010_v31 = vpop.f32.mrb[32].mxu1 }
 0x135   : > { %v2210_v27 = vpop.eup %2209  ;;  %1178 = vst [vmem:[%s2896_s23 + $0x58] sm:$0xff] %v2208_v48  ;;  %2229 = vpow2.f32 %v1894_v7  ;;  %v3008_v29 = vpop.f32.mrb[28].mxu0 }
 0x136   : > { %v2212_v28 = vpop.eup %2211  ;;  %781 = vst [vmem:[%s2920_s24 + $0x40] sm:$0xff] %v2210_v27  ;;  %2231 = vpow2.f32 %v1942_v16  ;;  %v3013_v53 = vpop.f32.mrb[29].mxu0 }
 0x137   : > { %v2214_v32 = vpop.eup %2213  ;;  %1179 = vst [vmem:[%s2896_s23 + $0x60] sm:$0xff] %v2212_v28  ;;  %2233 = vpow2.f32 %v1895_v23  ;;  %v3015_v36 = vpop.f32.mrb[33].mxu1 }
 0x138   : > { %v2216_v56 = vpop.eup %2215  ;;  %v688_v37 = vadd.f32 1.0, %v2214_v32  ;;  %2235 = vpow2.f32 %v1943_v26  ;;  %v3017_v42 = vpop.f32.mrb[30].mxu0  ;;  %v1946_v26 = vmul.f32 -1.442695, %v2942_v14  ;;  %v1900_v14 = vmul.f32 -1.442695, %v2951_v24 }
 0x139   : > { %v2218_v57 = vpop.eup %2217  ;;  %v1086_v39 = vadd.f32 1.0, %v2216_v56  ;;  %2237 = vpow2.f32 %v1896_v52  ;;  %v3019_v20 = vpop.f32.mrb[31].mxu0  ;;  %v1899_v56 = vmul.f32 -1.442695, %v2944_v15 }
 0x13a   : > { %v2220_v40 = vpop.eup %2219  ;;  %2239 = vrcp.f32 %v688_v37  ;;  %v689_v21 = vadd.f32 1.0, %v2218_v57  ;;  %v3022_v46 = vpop.f32.mrb[34].mxu1  ;;  %v1947_v57 = vmul.f32 -1.442695, %v2947_v19 }
 0x13b   : > { %v2222_v47 = vpop.eup %2221  ;;  %2241 = vrcp.f32 %v1086_v39  ;;  %v1087_v50 = vadd.f32 1.0, %v2220_v40  ;;  %v3025_v54 = vpop.f32.mrb[35].mxu1 }
 0x13c   : > { %v2224_v41 = vpop.eup %2223  ;;  %782 = vst [vmem:[%s2920_s24 + $0x48] sm:$0xff] %v2222_v47  ;;  %2243 = vrcp.f32 %v689_v21  ;;  %v3034_v34 = vpop.f32.mrb[36].mxu1 }
 0x13d   : > { %v2226_v58 = vpop.eup %2225  ;;  %1180 = vst [vmem:[%s2896_s23 + $0x68] sm:$0xff] %v2224_v41  ;;  %2245 = vrcp.f32 %v1087_v50  ;;  %v3032_v62 = vpop.f32.mrb[32].mxu0 }
 0x13e   : > { %v2228_v61 = vpop.eup %2227  ;;  %783 = vst [vmem:[%s2920_s24 + $0x50] sm:$0xff] %v2226_v58  ;;  %2247 = vpow2.f32 %v1944_v44  ;;  %v3037_v0 = vpop.f32.mrb[33].mxu0 }
 0x13f   : > { %v2230_v4 = vpop.eup %2229  ;;  %1181 = vst [vmem:[%s2896_s23 + $0x70] sm:$0xff] %v2228_v61  ;;  %2249 = vpow2.f32 %v1897_v51  ;;  %v3039_v3 = vpop.f32.mrb[37].mxu1 }
 0x140   : > { %v2232_v5 = vpop.eup %2231  ;;  %v690_v6 = vadd.f32 1.0, %v2230_v4  ;;  %2251 = vpow2.f32 %v1945_v55  ;;  %v3043_v22 = vpop.f32.mrb[38].mxu1 }
 0x141   : > { %v2234_v7 = vpop.eup %2233  ;;  %v1088_v10 = vadd.f32 1.0, %v2232_v5  ;;  %2253 = vpow2.f32 %v1898_v60  ;;  %v3041_v16 = vpop.f32.mrb[34].mxu0  ;;  %v1948_v60 = vmul.f32 -1.442695, %v2953_v25  ;;  %v1901_v5 = vmul.f32 -1.442695, %v2959_v33 }
 0x142   : > { %v2236_v8 = vpop.eup %2235  ;;  %2255 = vrcp.f32 %v690_v6  ;;  %v691_v11 = vadd.f32 1.0, %v2234_v7  ;;  %v3046_v27 = vpop.f32.mrb[35].mxu0  ;;  %v1949_v7 = vmul.f32 -1.442695, %v2961_v35 }
 0x143   : > { %v2238_v23 = vpop.eup %2237  ;;  %2257 = vrcp.f32 %v1088_v10  ;;  %v1089_v48 = vadd.f32 1.0, %v2236_v8  ;;  %v3048_v52 = vpop.f32.mrb[39].mxu1 }
 0x144   : > { %v2240_v28 = vpop.eup %2239  ;;  %2259 = vrcp.f32 %v691_v11  ;;  %v692_v32 = vadd.f32 1.0, %v2238_v23  ;;  %v3057_v21 = vpop.f32.mrb[40].mxu1  ;;  %v1902_v11 = vmul.f32 -1.442695, %v2963_v38  ;;  %v1950_v23 = vmul.f32 -1.442695, %v2965_v2 }
 0x145   : > { %v2242_v37 = vpop.eup %2241  ;;  %784 = vst [vmem:[%s2920_s24 + $0x58] sm:$0xff] %v2240_v28  ;;  %2261 = vrcp.f32 %v1089_v48  ;;  %v3055_v40 = vpop.f32.mrb[36].mxu0 }
 0x146   : > { %v2244_v39 = vpop.eup %2243  ;;  %1182 = vst [vmem:[%s2896_s23 + $0x78] sm:$0xff] %v2242_v37  ;;  %2263 = vrcp.f32 %v692_v32  ;;  %v3060_v47 = vpop.f32.mrb[37].mxu0 }
 0x147   : > { %v2246_v44 = vpop.eup %2245  ;;  %785 = vst [vmem:[%s2920_s24 + $0x60] sm:$0xff] %v2244_v39  ;;  %2265 = vpow2.f32 %v1946_v26  ;;  %v3062_v15 = vpop.f32.mrb[41].mxu1 }
 0x148   : > { %v2248_v50 = vpop.eup %2247  ;;  %1183 = vst [vmem:[%s2896_s23 + $0x80] sm:$0xff] %v2246_v44  ;;  %2267 = vpow2.f32 %v1899_v56  ;;  %v3069_v10 = vpop.xlane.xlu1 %1222  ;;  %v1951_v44 = vmul.f32 -1.442695, %v2970_v43 }
 0x149   : > { %v2250_v19 = vpop.eup %2249  ;;  %v1090_v51 = vadd.f32 1.0, %v2248_v50  ;;  %2269 = vpow2.f32 %v1947_v57  ;;  %v3075_v33 = vpop.xlane.xlu0 %1216  ;;  %v1903_v57 = vmul.f32 -1.442695, %v2967_v13 }
 0x14a   : > { %v2252_v41 = vpop.eup %2251  ;;  %v693_v24 = vadd.f32 1.0, %v2250_v19  ;;  %2271 = vpow2.f32 %v1900_v14 }
 0x14b   : > { %v2254_v55 = vpop.eup %2253  ;;  %2273 = vrcp.f32 %v1090_v51  ;;  %v1091_v58 = vadd.f32 1.0, %v2252_v41  ;;  %v1904_v51 = vmul.f32 -1.442695, %v2973_v30 }
 0x14c   : > { %v2256_v61 = vpop.eup %2255  ;;  %2275 = vrcp.f32 %v693_v24  ;;  %v694_v4 = vadd.f32 1.0, %v2254_v55  ;;  %v3079_v38 = vpop.xlane.xlu1 %1225  ;;  %v1952_v24 = vmul.f32 -1.442695, %v2975_v49 }
 0x14d   : > { %v2258_v6 = vpop.eup %2257  ;;  %786 = vst [vmem:[%s2920_s24 + $0x68] sm:$0xff] %v2256_v61  ;;  %2277 = vrcp.f32 %v1091_v58  ;;  %v3083_v50 = vpop.xlane.xlu0 %1219 }
 0x14e   : > { %v2260_v8 = vpop.eup %2259  ;;  %1184 = vst [vmem:[%s2896_s23 + $0x88] sm:$0xff] %v2258_v6  ;;  %2279 = vrcp.f32 %v694_v4 }
 0x14f   : > { %v2262_v25 = vpop.eup %2261  ;;  %787 = vst [vmem:[%s2920_s24 + $0x70] sm:$0xff] %v2260_v8  ;;  %2281 = vpow2.f32 %v1948_v60  ;;  %v1905_v8 = vmul.f32 -1.442695, %v2983_v12  ;;  %v3105_v12 = vld [vmem:[%s3411_s5] ss:$0 sm:$0xff] }
 0x150   : > { %v2264_v48 = vpop.eup %2263  ;;  %1185 = vst [vmem:[%s2896_s23 + $0x90] sm:$0xff] %v2262_v25  ;;  %2283 = vpow2.f32 %v1901_v5  ;;  %v3091_v58 = vpop.xlane.xlu1 %1231 }
 0x151   : > { %v2266_v26 = vpop.eup %2265  ;;  %788 = vst [vmem:[%s2920_s24 + $0x78] sm:$0xff] %v2264_v48  ;;  %2285 = vpow2.f32 %v1949_v7  ;;  %v3093_v30 = vpop.xlane.xlu0 %1228 }
 0x152   : > { %v2268_v35 = vpop.eup %2267  ;;  %v1092_v28 = vadd.f32 1.0, %v2266_v26  ;;  %2287 = vpow2.f32 %v1902_v11  ;;  %v1906_v26 = vmul.f32 -1.442695, %v2987_v63 }
 0x153   : > { %v2270_v32 = vpop.eup %2269  ;;  %v695_v56 = vadd.f32 1.0, %v2268_v35  ;;  %2289 = vpow2.f32 %v1950_v23  ;;  %v1953_v23 = vmul.f32 -1.442695, %v2985_v59 }
 0x154   : > { %v2272_v37 = vpop.eup %2271  ;;  %2291 = vrcp.f32 %v1092_v28  ;;  %v1093_v2 = vadd.f32 1.0, %v2270_v32  ;;  %v1238_v35 = vpop.xlane.xlu1 %1237  ;;  %v1954_v32 = vmul.f32 -1.442695, %v2989_v45 }
 0x155   : > { %v2274_v39 = vpop.eup %2273  ;;  %2293 = vrcp.f32 %v695_v56  ;;  %v696_v14 = vadd.f32 1.0, %v2272_v37  ;;  %v1235_v59 = vpop.xlane.xlu0 %1234  ;;  %v1474_v63 = vadd.f32 %v3105_v12, %v1238_v35  ;;  %v1492_v35 = vmul.f32 2.0, %v3022_v46 }
 0x156   : > { %v2276_v19 = vpop.eup %2275  ;;  %1186 = vst [vmem:[%s2896_s23 + $0x98] sm:$0xff] %v2274_v39  ;;  %2295 = vrcp.f32 %v1093_v2  ;;  %v1490_v2 = vmul.f32 2.0, %v3010_v31  ;;  %v1910_v46 = vmul.f32 -1.442695, %v3013_v53 }
 0x157   : > { %v2278_v41 = vpop.eup %2277  ;;  %789 = vst [vmem:[%s2920_s24 + $0x80] sm:$0xff] %v2276_v19  ;;  %2297 = vrcp.f32 %v696_v14  ;;  %v1489_v19 = vmul.f32 2.0, %v3015_v36 }
 0x158   : > { %v2280_v55 = vpop.eup %2279  ;;  %1187 = vst [vmem:[%s2896_s23 + $0xa0] sm:$0xff] %v2278_v41  ;;  %2299 = vpow2.f32 %v1903_v57  ;;  %v1244_v36 = vpop.xlane.xlu1 %1243 }
 0x159   : > { %v2282_v13 = vpop.eup %2281  ;;  %790 = vst [vmem:[%s2920_s24 + $0x88] sm:$0xff] %v2280_v55  ;;  %2301 = vpow2.f32 %v1951_v44  ;;  %v1473_v44 = vadd.f32 %v3105_v12, %v1235_v59 }
 0x15a   : > { %v2284_v43 = vpop.eup %2283  ;;  %v1094_v60 = vadd.f32 1.0, %v2282_v13  ;;  %2303 = vpow2.f32 %v1904_v51  ;;  %v1955_v13 = vmul.f32 -1.442695, %v2994_v9  ;;  %v1909_v9 = vmul.f32 -1.442695, %v3008_v29 }
 0x15b   : > { %v2286_v61 = vpop.eup %2285  ;;  %v697_v4 = vadd.f32 1.0, %v2284_v43  ;;  %2305 = vpow2.f32 %v1952_v24  ;;  %v1907_v24 = vmul.f32 -1.442695, %v2991_v1  ;;  %v1506_v43 = vsub.f32 %v1474_v63, %v1490_v2 }
 0x15c   : > { %v2288_v5 = vpop.eup %2287  ;;  %2307 = vrcp.f32 %v1094_v60  ;;  %v1095_v49 = vadd.f32 1.0, %v2286_v61  ;;  %v1908_v61 = vmul.f32 -1.442695, %v2997_v17  ;;  %v1956_v1 = vmul.f32 -1.442695, %v2999_v18 }
 0x15d   : > { %v2290_v6 = vpop.eup %2289  ;;  %2309 = vrcp.f32 %v697_v4  ;;  %v698_v7 = vadd.f32 1.0, %v2288_v5  ;;  %v1505_v5 = vsub.f32 %v1473_v44, %v1489_v19  ;;  %v3127_v17 = vadd.f32 %v3105_v12, %v3075_v33 }
 0x15e   : > { %v2292_v11 = vpop.eup %2291  ;;  %2311 = vrcp.f32 %v1095_v49  ;;  %v1096_v25 = vadd.f32 1.0, %v2290_v6  ;;  %v1241_v49 = vpop.xlane.xlu0 %1240  ;;  %v3136_v29 = vadd.f32 %v3105_v12, %v3083_v50  ;;  %v1491_v50 = vmul.f32 2.0, %v3025_v54 }
 0x15f   : > { %v2294_v48 = vpop.eup %2293  ;;  %1188 = vst [vmem:[%s2896_s23 + $0xa8] sm:$0xff] %v2292_v11  ;;  %2313 = vrcp.f32 %v698_v7  ;;  %v1522_v11 = vmax.f32 %v1506_v43, 0.0  ;;  %v1521_v33 = vmax.f32 %v1505_v5, 0.0  ;;  %v1484_v2 = vmul.f32 2.0, %v3032_v62 }
 0x160   : > { %v2296_v28 = vpop.eup %2295  ;;  %791 = vst [vmem:[%s2920_s24 + $0x90] sm:$0xff] %v2294_v48  ;;  %2315 = vrcp.f32 %v1096_v25  ;;  %v3132_v25 = vadd.f32 %v3105_v12, %v3079_v38  ;;  %v1475_v38 = vadd.f32 %v3105_v12, %v1241_v49  ;;  %v1911_v62 = vmul.f32 -1.442695, %v3017_v42 }
 0x161   : > { %v2298_v56 = vpop.eup %2297  ;;  %1189 = vst [vmem:[%s2896_s23 + $0xb0] sm:$0xff] %v2296_v28  ;;  %2317 = vpow2.f32 %v1905_v8  ;;  %v3123_v8 = vadd.f32 %v3105_v12, %v3069_v10  ;;  %v1476_v10 = vadd.f32 %v3105_v12, %v1244_v36  ;;  %v1538_v63 = vadd.f32 1.0, %v1522_v11 }
 0x162   : > { %v2300_v37 = vpop.eup %2299  ;;  %792 = vst [vmem:[%s2920_s24 + $0x98] sm:$0xff] %v2298_v56  ;;  %2319 = vpow2.f32 %v1953_v23  ;;  %v1250_v23 = vpop.xlane.xlu1 %1249  ;;  %v1537_v54 = vadd.f32 1.0, %v1521_v33  ;;  %v1912_v42 = vmul.f32 -1.442695, %v3019_v20 }
 0x163   : > { %v2302_v57 = vpop.eup %2301  ;;  %v699_v39 = vadd.f32 1.0, %v2300_v37  ;;  %2321 = vpow2.f32 %v1906_v26  ;;  %v1247_v28 = vpop.xlane.xlu0 %1246  ;;  %v1508_v19 = vsub.f32 %v1476_v10, %v1492_v35 }
 0x164   : > { %v2304_v45 = vpop.eup %2303  ;;  %v1097_v14 = vadd.f32 1.0, %v2302_v57  ;;  %2323 = vpow2.f32 %v1954_v32  ;;  %v3150_v53 = vadd.f32 %v3105_v12, %v1247_v28 }
 0x165   : > { %v2306_v51 = vpop.eup %2305  ;;  %2325 = vrcp.f32 %v699_v39  ;;  %v700_v41 = vadd.f32 1.0, %v2304_v45  ;;  %v1483_v45 = vmul.f32 2.0, %v3037_v0  ;;  %v1524_v5 = vmax.f32 %v1508_v19, 0.0 }
 0x166   : > { %v2308_v55 = vpop.eup %2307  ;;  %2327 = vrcp.f32 %v1097_v14  ;;  %v1098_v31 = vadd.f32 1.0, %v2306_v51  ;;  %v1256_v14 = vpop.xlane.xlu1 %1255  ;;  %v1478_v51 = vadd.f32 %v3105_v12, %v1250_v23 }
 0x167   : > { %v2310_v60 = vpop.eup %2309  ;;  %1190 = vst [vmem:[%s2896_s23 + $0xb8] sm:$0xff] %v2308_v55  ;;  %2329 = vrcp.f32 %v700_v41  ;;  %v1253_v41 = vpop.xlane.xlu0 %1252  ;;  %v1507_v55 = vsub.f32 %v1475_v38, %v1491_v50  ;;  %v3156_v43 = vadd.f32 %v3105_v12, %v1256_v14  ;;  %v1540_v33 = vadd.f32 1.0, %v1524_v5 }
 0x168   : > { %v2312_v4 = vpop.eup %2311  ;;  %793 = vst [vmem:[%s2920_s24 + $0xa0] sm:$0xff] %v2310_v60  ;;  %2331 = vrcp.f32 %v1098_v31  ;;  %v1500_v31 = vsub.f32 %v3136_v29, %v1484_v2  ;;  %v3162_v36 = vadd.f32 %v3105_v12, %v1253_v41 }
 0x169   : > { %v2314_v6 = vpop.eup %2313  ;;  %1191 = vst [vmem:[%s2896_s23 + $0xc0] sm:$0xff] %v2312_v4  ;;  %2333 = vpow2.f32 %v1907_v24 }
 0x16a   : > { %v2316_v7 = vpop.eup %2315  ;;  %794 = vst [vmem:[%s2920_s24 + $0xa8] sm:$0xff] %v2314_v6  ;;  %2335 = vpow2.f32 %v1955_v13  ;;  %v1494_v13 = vmul.f32 2.0, %v3034_v34  ;;  %v1486_v34 = vmul.f32 2.0, %v3041_v16 }
 0x16b   : > { %v2318_v18 = vpop.eup %2317  ;;  %1192 = vst [vmem:[%s2896_s23 + $0xc8] sm:$0xff] %v2316_v7  ;;  %2337 = vpow2.f32 %v1908_v61  ;;  %v1499_v61 = vsub.f32 %v3127_v17, %v1483_v45  ;;  %v1493_v7 = vmul.f32 2.0, %v3039_v3  ;;  %v1516_v17 = vmax.f32 %v1500_v31, 0.0 }
 0x16c   : > { %v2320_v48 = vpop.eup %2319  ;;  %v701_v26 = vadd.f32 1.0, %v2318_v18  ;;  %2339 = vpow2.f32 %v1956_v1  ;;  %v1510_v18 = vsub.f32 %v1478_v51, %v1494_v13  ;;  %v1502_v3 = vsub.f32 %v3132_v25, %v1486_v34  ;;  %v1259_v51 = vpop.xlane.xlu0 %1258 }
 0x16d   : > { %v2322_v32 = vpop.eup %2321  ;;  %v1099_v56 = vadd.f32 1.0, %v2320_v48  ;;  %2341 = vpow2.f32 %v1909_v9  ;;  %v1523_v9 = vmax.f32 %v1507_v55, 0.0  ;;  %v1515_v23 = vmax.f32 %v1499_v61, 0.0 }
 0x16e   : > { %v2324_v59 = vpop.eup %2323  ;;  %2343 = vrcp.f32 %v701_v26  ;;  %v702_v37 = vadd.f32 1.0, %v2322_v32  ;;  %v1485_v48 = vmul.f32 2.0, %v3046_v27  ;;  %v1509_v32 = vsub.f32 %v3150_v53, %v1493_v7 }
 0x16f   : > { %v2326_v57 = vpop.eup %2325  ;;  %2345 = vrcp.f32 %v1099_v56  ;;  %v1100_v39 = vadd.f32 1.0, %v2324_v59  ;;  %v1539_v28 = vadd.f32 1.0, %v1523_v9  ;;  %v1496_v56 = vmul.f32 2.0, %v3043_v22 }
 0x170   : > { %v2328_v44 = vpop.eup %2327  ;;  %795 = vst [vmem:[%s2920_s24 + $0xb0] sm:$0xff] %v2326_v57  ;;  %2347 = vrcp.f32 %v702_v37  ;;  %v1532_v27 = vadd.f32 1.0, %v1516_v17  ;;  %v1526_v50 = vmax.f32 %v1510_v18, 0.0  ;;  %v1495_v59 = vmul.f32 2.0, %v3048_v52 }
 0x171   : > { %v2330_v24 = vpop.eup %2329  ;;  %1193 = vst [vmem:[%s2896_s23 + $0xd0] sm:$0xff] %v2328_v44  ;;  %2349 = vrcp.f32 %v1100_v39  ;;  %v1472_v25 = vadd.f32 %v3105_v12, %v3091_v58  ;;  %v1501_v2 = vsub.f32 %v3123_v8, %v1485_v48  ;;  %v1471_v22 = vadd.f32 %v3105_v12, %v3093_v30  ;;  %v1262_v44 = vpop.xlane.xlu1 %1261 }
 0x172   : > { %v2332_v0 = vpop.eup %2331  ;;  %796 = vst [vmem:[%s2920_s24 + $0xb8] sm:$0xff] %v2330_v24  ;;  %2351 = vrcp.f32 %v1538_v63  ;;  %v1531_v63 = vadd.f32 1.0, %v1515_v23  ;;  %v1518_v39 = vmax.f32 %v1502_v3, 0.0  ;;  %v1525_v45 = vmax.f32 %v1509_v32, 0.0 }
 0x173   : > { %v2334_v60 = vpop.eup %2333  ;;  %1194 = vst [vmem:[%s2896_s23 + $0xd8] sm:$0xff] %v2332_v0  ;;  %2353 = vpow2.f32 %v1910_v46  ;;  %v1488_v46 = vmul.f32 2.0, %v3055_v40  ;;  %v1512_v14 = vsub.f32 %v3156_v43, %v1496_v56  ;;  %v1542_v19 = vadd.f32 1.0, %v1526_v50 }
 0x174   : > { %v2336_v4 = vpop.eup %2335  ;;  %v703_v1 = vadd.f32 1.0, %v2334_v60  ;;  %2355 = vrcp.f32 %v1537_v54  ;;  %v1511_v30 = vsub.f32 %v3162_v36, %v1495_v59  ;;  %v1517_v41 = vmax.f32 %v1501_v2, 0.0 }
 0x175   : > { %v2338_v49 = vpop.eup %2337  ;;  %v1101_v6 = vadd.f32 1.0, %v2336_v4  ;;  %2357 = vpow2.f32 %v1911_v62  ;;  %v1487_v24 = vmul.f32 2.0, %v3060_v47  ;;  %v1482_v0 = vadd.f32 %v3105_v12, %v1262_v44 }
 0x176   : > { %v2340_v11 = vpop.eup %2339  ;;  %2359 = vrcp.f32 %v703_v1  ;;  %v704_v20 = vadd.f32 1.0, %v2338_v49  ;;  %v1498_v31 = vmul.f32 2.0, %v3057_v21  ;;  %v1541_v43 = vadd.f32 1.0, %v1525_v45 }
 0x177   : > { %v2342_v29 = vpop.eup %2341  ;;  %2361 = vrcp.f32 %v1101_v6  ;;  %v1102_v10 = vadd.f32 1.0, %v2340_v11  ;;  %v1528_v60 = vmax.f32 %v1512_v14, 0.0  ;;  %v1497_v47 = vmul.f32 2.0, %v3062_v15 }
 0x178   : > { %v2344_v16 = vpop.eup %2343  ;;  %2363 = vrcp.f32 %v704_v20  ;;  %v705_v26 = vadd.f32 1.0, %v2342_v29  ;;  %v1534_v36 = vadd.f32 1.0, %v1518_v39  ;;  %v1504_v4 = vsub.f32 %v1472_v25, %v1488_v46 }
 0x179   : > { %v2346_v35 = vpop.eup %2345  ;;  %797 = vst [vmem:[%s2920_s24 + $0xc0] sm:$0xff] %v2344_v16  ;;  %2365 = vrcp.f32 %v1102_v10  ;;  %v1527_v1 = vmax.f32 %v1511_v30, 0.0  ;;  %v1533_v21 = vadd.f32 1.0, %v1517_v41  ;;  %v1503_v34 = vsub.f32 %v1471_v22, %v1487_v24 }
 0x17a   : > { %v2348_v38 = vpop.eup %2347  ;;  %1195 = vst [vmem:[%s2896_s23 + $0xe0] sm:$0xff] %v2346_v35  ;;  %2367 = vrcp.f32 %v705_v26  ;;  %v1514_v6 = vsub.f32 %v1482_v0, %v1498_v31  ;;  %v1520_v20 = vmax.f32 %v1504_v4, 0.0 }
 0x17b   : > { %v2350_v37 = vpop.eup %2349  ;;  %798 = vst [vmem:[%s2920_s24 + $0xc8] sm:$0xff] %v2348_v38  ;;  %2369 = vpow2.f32 %v1912_v42  ;;  %v1481_v42 = vadd.f32 %v3105_v12, %v1259_v51  ;;  %v1544_v12 = vadd.f32 1.0, %v1528_v60  ;;  %v1543_v17 = vadd.f32 1.0, %v1527_v1 }
 0x17c   : > { %v3177_v57 = vpop.eup %2351  ;;  %1196 = vst [vmem:[%s2896_s23 + $0xe8] sm:$0xff] %v2350_v37  ;;  %2371 = vrcp.f32 %v1540_v33  ;;  %v1519_v29 = vmax.f32 %v1503_v34, 0.0  ;;  %v1530_v16 = vmax.f32 %v1514_v6, 0.0 }
 0x17d   : > { %v2354_v52 = vpop.eup %2353  ;;  %2373 = vrcp.f32 %v1539_v28  ;;  %v1601_v58 = vsel %vm1579_vm2, %v3177_v57, 0.0  ;;  %v1513_v15 = vsub.f32 %v1481_v42, %v1497_v47  ;;  %v1536_v28 = vadd.f32 1.0, %v1520_v20 }
 0x17e   : > { %v3186_v8 = vpop.eup %2355  ;;  %v706_v54 = vadd.f32 1.0, %v2354_v52  ;;  %2375 = vrcp.f32 %v1532_v27  ;;  %1602 = vadd.xlane.f32.xlu1 %v1601_v58  ;;  %v1535_v56 = vadd.f32 1.0, %v1519_v29  ;;  %v1546_v27 = vadd.f32 1.0, %v1530_v16 }
 0x17f   : > { %v2358_v40 = vpop.eup %2357  ;;  %2377 = vrcp.f32 %v1531_v63  ;;  %v1598_v62 = vsel %vm1579_vm2, %v3186_v8, 0.0  ;;  %v1529_v33 = vmax.f32 %v1513_v15, 0.0 }
 0x180   : > { %v2360_v55 = vpop.eup %2359  ;;  %2379 = vrcp.f32 %v706_v54  ;;  %v707_v53 = vadd.f32 1.0, %v2358_v40  ;;  %1599 = vadd.xlane.f32.xlu0 %v1598_v62 }
 0x181   : > { %v2362_v13 = vpop.eup %2361  ;;  %799 = vst [vmem:[%s2920_s24 + $0xd0] sm:$0xff] %v2360_v55  ;;  %v1545_v59 = vadd.f32 1.0, %v1529_v33 }
 0x182   : > { %v2364_v61 = vpop.eup %2363  ;;  %1197 = vst [vmem:[%s2896_s23 + $0xf0] sm:$0xff] %v2362_v13  ;;  %2381 = vrcp.f32 %v707_v53 }
 0x183   : > { %v2366_v5 = vpop.eup %2365  ;;  %800 = vst [vmem:[%s2920_s24 + $0xd8] sm:$0xff] %v2364_v61  ;;  %2383 = vrcp.f32 %v1542_v19 }
 0x184   : > { %v2368_v49 = vpop.eup %2367  ;;  %1198 = vst [vmem:[%s2896_s23 + $0xf8] sm:$0xff] %v2366_v5  ;;  %2385 = vrcp.f32 %v1541_v43 }
 0x185   : > { %v2370_v9 = vpop.eup %2369  ;;  %801 = vst [vmem:[%s2920_s24 + $0xe0] sm:$0xff] %v2368_v49  ;;  %2387 = vrcp.f32 %v1534_v36 }
 0x186   : > { %v3201_v7 = vpop.eup %2371  ;;  %v708_v11 = vadd.f32 1.0, %v2370_v9  ;;  %2389 = vrcp.f32 %v1533_v21 }
 0x187   : > { %v3203_v18 = vpop.eup %2373  ;;  %v1607_v10 = vsel %vm1579_vm2, %v3201_v7, 0.0 }
 0x188   : > { %v3207_v23 = vpop.eup %2375  ;;  %2391 = vrcp.f32 %v708_v11  ;;  %1608 = vadd.xlane.f32.xlu1 %v1607_v10  ;;  %v1604_v48 = vsel %vm1579_vm2, %v3203_v18, 0.0 }
 0x189   : > { %v3211_v26 = vpop.eup %2377  ;;  %2393 = vrcp.f32 %v1544_v12  ;;  %1605 = vadd.xlane.f32.xlu0 %v1604_v48  ;;  %v1583_v3 = vsel %vm1579_vm2, %v3207_v23, 0.0 }
 0x18a   : > { %v2380_v35 = vpop.eup %2379  ;;  %2395 = vrcp.f32 %v1543_v17  ;;  %v1580_v32 = vsel %vm1579_vm2, %v3211_v26, 0.0 }
 0x18b   : > { %802 = vst [vmem:[%s2920_s24 + $0xe8] sm:$0xff] %v2380_v35  ;;  %2397 = vrcp.f32 %v1536_v28 }
 0x18c   : > { %v2382_v38 = vpop.eup %2381  ;;  %1584 = vadd.xlane.f32.xlu1 %v1583_v3  ;;  %2399 = vrcp.f32 %v1535_v56 }
 0x18d   : > { %v3218_v50 = vpop.eup %2383  ;;  %803 = vst [vmem:[%s2920_s24 + $0xf0] sm:$0xff] %v2382_v38  ;;  %1581 = vadd.xlane.f32.xlu0 %v1580_v32  ;;  %2401 = vrcp.f32 %v1546_v27 }
 0x18e   : > { %v1613_v37 = vsel %vm1579_vm2, %v3218_v50, 0.0  ;;  %v3223_v25 = vpop.eup %2385  ;;  %2403 = vrcp.f32 %v1545_v59 }
 0x18f   : > { %v3225_v63 = vpop.eup %2387  ;;  %v1610_v2 = vsel %vm1579_vm2, %v3223_v25, 0.0 }
 0x190   : > { %1614 = vadd.xlane.f32.xlu1 %v1613_v37  ;;  %v3229_v22 = vpop.eup %2389  ;;  %v1589_v52 = vsel %vm1579_vm2, %v3225_v63, 0.0 }
 0x191   : > { %1611 = vadd.xlane.f32.xlu0 %v1610_v2  ;;  %v1586_v14 = vsel %vm1579_vm2, %v3229_v22, 0.0 }
 0x192   : > { %v2392_v39 = vpop.eup %2391 }
 0x193   : > { %v3231_v46 = vpop.eup %2393  ;;  %804 = vst [vmem:[%s2920_s24 + $0xf8] sm:$0xff] %v2392_v39 }
 0x194   : > { %v3236_v45 = vpop.eup %2395  ;;  %1590 = vadd.xlane.f32.xlu1 %v1589_v52  ;;  %v1619_v58 = vsel %vm1579_vm2, %v3231_v46, 0.0 }
 0x195   : > { %1587 = vadd.xlane.f32.xlu0 %v1586_v14  ;;  %v1616_v44 = vsel %vm1579_vm2, %v3236_v45, 0.0  ;;  %v3244_v54 = vpop.eup %2397 }
 0x196   : > { %v3246_v19 = vpop.eup %2399  ;;  %v1595_v40 = vsel %vm1579_vm2, %v3244_v54, 0.0 }
 0x197   : > { %v3248_v30 = vpop.eup %2401  ;;  %v1592_v41 = vsel %vm1579_vm2, %v3246_v19, 0.0 }
 0x198   : > { %1620 = vadd.xlane.f32.xlu1 %v1619_v58  ;;  %v3250_v51 = vpop.eup %2403  ;;  %v1625_v24 = vsel %vm1579_vm2, %v3248_v30, 0.0 }
 0x199   : > { %1617 = vadd.xlane.f32.xlu0 %v1616_v44  ;;  %v1622_v62 = vsel %vm1579_vm2, %v3250_v51, 0.0 }
 0x19c   : > { %1596 = vadd.xlane.f32.xlu1 %v1595_v40 }
 0x19d   : > { %1593 = vadd.xlane.f32.xlu0 %v1592_v41 }
 0x1a0   : > { %1626 = vadd.xlane.f32.xlu1 %v1625_v24 }
 0x1a1   : > { %1623 = vadd.xlane.f32.xlu0 %v1622_v62 }
 0x1a2   : > { %2450 = shalt.err (!%p2447_p3)
}
 0x1a3   : > { %s2451_s24 = scalar_lea.hbm %s3266_s17, 4096  ;;  %s2455_s25 = scalar_lea.hbm %s3412_s6, 8192 }
 0x1a4   : > { %p2452_p4 = scmp.ne.s32.totalorder %s3266_s17, %s2451_s24  ;;  %p2456_p9 = scmp.lt.u32.totalorder %s3266_s17, %s3412_s6 }
 0x1a5   : > { %p2457_p10 = scmp.lt.u32.totalorder %s2455_s25, %s2451_s24  ;;  %p2459_p12 = scmp.lt.u32.totalorder %s2451_s24, %s3266_s17 }
 0x1a6   : > { %p2453_p7 = pnand %p2452_p4, %p2621_p5 }
 0x1a7   : > { %p2458_p11 = por %p2457_p10, %p2456_p9 }
 0x1a8   : > { %p2454_p8 = pneg %p2453_p7 }
 0x1a9   : > { %p2460_p13 = por %p2459_p12, %p2458_p11 }
 0x1ab   : > { %p2461_p0 = pnand %p2460_p13, %p2454_p8 }
 0x1ad   : > { %2464 = shalt.err (!%p2461_p0)
}
 0x1ae   : > { %s2535_s0 = smov 256   ;;  %s2536_s21 = smov 16  }
 0x1af   : > { %2052 = dma.vmem_to_hbm [thread:$0]  (%p2621_p5), %s3269_s18, 4096, %s3266_s17, %s1677_s20, %s2535_s0, %s2535_s0, %s2536_s21  }
 0x1b0   : > { %s3424_s12 = sshll.u32 %s2604_s9, 12  ;;  %s1718_s25 = sshll.u32 %s2896_s23, 4  ;;  %s3306_s25 = int_to_ptr.vmem [resolvable:$true] %s1718_s25 }
 0x1b1   : > { %s3303_s19 = scalar_lea.hbm %s3413_s7, %s3424_s12  ;;  %s1682_s26 = scalar_lea.sflag [#allocation5], %s2881_s10 }
 0x1b2   : > { %s2465_s1 = scalar_lea.vmem %s3306_s25, 4096  ;;  %s2537_s2 = smov [#allocation4]  }
 0x1b3   : > { %p2466_p1 = scmp.ne.s32.totalorder %s3306_s25, %s2465_s1  ;;  %s2469_s17 = sshll.u32 %s2537_s2, 4  ;;  %s2470_s17 = int_to_ptr.vmem [resolvable:$false] %s2469_s17 }
 0x1b4   : > { %s2471_s9 = scalar_lea.vmem %s2470_s17, 8192  ;;  %p2472_p4 = scmp.lt.s32.totalorder %s3306_s25, %s2470_s17 }
 0x1b5   : > { %p2467_p2 = pnand %p2466_p1, %p2621_p5  ;;  %p2473_p7 = scmp.lt.s32.totalorder %s2471_s9, %s2465_s1 }
 0x1b7   : > { %p2468_p3 = pneg %p2467_p2  ;;  %p2474_p8 = por %p2473_p7, %p2472_p4 }
 0x1b9   : > { %p2475_p9 = pnand %p2474_p8, %p2468_p3 }
 0x1bb   : > { %2478 = shalt.err (!%p2475_p9)
}
 0x1bc   : > { %s2479_s23 = scalar_lea.hbm %s3303_s19, 4096  ;;  %s2483_s2 = scalar_lea.hbm %s3413_s7, 8192 }
 0x1bd   : > { %p2480_p10 = scmp.ne.s32.totalorder %s3303_s19, %s2479_s23  ;;  %p2484_p13 = scmp.lt.u32.totalorder %s3303_s19, %s3413_s7 }
 0x1be   : > { %p2485_p0 = scmp.lt.u32.totalorder %s2483_s2, %s2479_s23  ;;  %p2487_p2 = scmp.lt.u32.totalorder %s2479_s23, %s3303_s19 }
 0x1bf   : > { %p2481_p11 = pnand %p2480_p10, %p2621_p5 }
 0x1c0   : > { %p2486_p1 = por %p2485_p0, %p2484_p13 }
 0x1c1   : > { %p2482_p12 = pneg %p2481_p11 }
 0x1c2   : > { %p2488_p3 = por %p2487_p2, %p2486_p1 }
 0x1c4   : > { %p2489_p4 = pnand %p2488_p3, %p2482_p12 }
 0x1c6   : > { %2492 = shalt.err (!%p2489_p4)
}
 0x1c7   : > { %2053 = dma.vmem_to_hbm [thread:$0]  (%p2621_p5), %s3306_s25, 4096, %s3303_s19, %s1682_s26, %s2535_s0, %s2535_s0, %s2536_s21  }
 0x1c8   : > { %s3339_s17 = scalar_lea.vmem %s3414_s8, %s2658_s22 }
 0x20b   : > { %v1603_v55 = vpop.xlane.xlu1 %1602 }
 0x20c   : > { %2405 = vrcp.f32 %v1603_v55 }
 0x20d   : > { %v1600_v53 = vpop.xlane.xlu0 %1599 }
 0x20e   : > { %2407 = vrcp.f32 %v1600_v53 }
 0x215   : > { %v1609_v0 = vpop.xlane.xlu1 %1608 }
 0x216   : > { %v2406_v31 = vpop.eup %2405  ;;  %2409 = vrcp.f32 %v1609_v0  ;;  %v1606_v13 = vpop.xlane.xlu0 %1605 }
 0x217   : > { %v1643_v43 = vmul.f32 %v2406_v31, %v3177_v57  ;;  %2411 = vrcp.f32 %v1606_v13 }
 0x218   : > { %v2408_v60 = vpop.eup %2407 }
 0x219   : > { %1667 = vst.msk [vmem:[%s3339_s17 + $0x38] sm:$0xff] %vm1579_vm2, %v1643_v43  ;;  %v1641_v42 = vmul.f32 %v2408_v60, %v3186_v8  ;;  %v1585_v47 = vpop.xlane.xlu1 %1584 }
 0x21a   : > { %2413 = vrcp.f32 %v1585_v47  ;;  %v1582_v61 = vpop.xlane.xlu0 %1581 }
 0x21b   : > { %1666 = vst.msk [vmem:[%s3339_s17 + $0x30] sm:$0xff] %vm1579_vm2, %v1641_v42  ;;  %2415 = vrcp.f32 %v1582_v61 }
 0x21d   : > { %v1615_v36 = vpop.xlane.xlu1 %1614 }
 0x21e   : > { %2417 = vrcp.f32 %v1615_v36  ;;  %v1612_v4 = vpop.xlane.xlu0 %1611 }
 0x21f   : > { %2419 = vrcp.f32 %v1612_v4 }
 0x220   : > { %v2410_v1 = vpop.eup %2409 }
 0x221   : > { %v2412_v57 = vpop.eup %2411  ;;  %v1647_v5 = vmul.f32 %v2410_v1, %v3201_v7  ;;  %v1591_v21 = vpop.xlane.xlu1 %1590 }
 0x222   : > { %v1645_v8 = vmul.f32 %v2412_v57, %v3203_v18  ;;  %2421 = vrcp.f32 %v1591_v21  ;;  %v1588_v34 = vpop.xlane.xlu0 %1587 }
 0x223   : > { %1669 = vst.msk [vmem:[%s3339_s17 + $0x48] sm:$0xff] %vm1579_vm2, %v1647_v5  ;;  %2423 = vrcp.f32 %v1588_v34 }
 0x224   : > { %v2414_v49 = vpop.eup %2413  ;;  %1668 = vst.msk [vmem:[%s3339_s17 + $0x40] sm:$0xff] %vm1579_vm2, %v1645_v8 }
 0x225   : > { %v2416_v6 = vpop.eup %2415  ;;  %v1631_v9 = vmul.f32 %v2414_v49, %v3207_v23  ;;  %v1621_v12 = vpop.xlane.xlu1 %1620 }
 0x226   : > { %v1629_v15 = vmul.f32 %v2416_v6, %v3211_v26  ;;  %2425 = vrcp.f32 %v1621_v12  ;;  %v1618_v7 = vpop.xlane.xlu0 %1617 }
 0x227   : > { %1661 = vst.msk [vmem:[%s3339_s17 + $0x8] sm:$0xff] %vm1579_vm2, %v1631_v9  ;;  %2427 = vrcp.f32 %v1618_v7 }
 0x228   : > { %v2418_v11 = vpop.eup %2417  ;;  %1660 = vst.msk [vmem:[%s3339_s17] sm:$0xff] %vm1579_vm2, %v1629_v15 }
 0x229   : > { %v2420_v20 = vpop.eup %2419  ;;  %v1651_v17 = vmul.f32 %v2418_v11, %v3218_v50  ;;  %v1597_v18 = vpop.xlane.xlu1 %1596 }
 0x22a   : > { %v1649_v29 = vmul.f32 %v2420_v20, %v3223_v25  ;;  %2429 = vrcp.f32 %v1597_v18  ;;  %v1594_v10 = vpop.xlane.xlu0 %1593 }
 0x22b   : > { %1671 = vst.msk [vmem:[%s3339_s17 + $0x58] sm:$0xff] %vm1579_vm2, %v1651_v17  ;;  %2431 = vrcp.f32 %v1594_v10 }
 0x22c   : > { %v2422_v23 = vpop.eup %2421  ;;  %1670 = vst.msk [vmem:[%s3339_s17 + $0x50] sm:$0xff] %vm1579_vm2, %v1649_v29 }
 0x22d   : > { %v2424_v48 = vpop.eup %2423  ;;  %v1635_v16 = vmul.f32 %v2422_v23, %v3225_v63  ;;  %v1627_v26 = vpop.xlane.xlu1 %1626 }
 0x22e   : > { %v1633_v33 = vmul.f32 %v2424_v48, %v3229_v22  ;;  %2433 = vrcp.f32 %v1627_v26  ;;  %v1624_v3 = vpop.xlane.xlu0 %1623 }
 0x22f   : > { %1663 = vst.msk [vmem:[%s3339_s17 + $0x18] sm:$0xff] %vm1579_vm2, %v1635_v16  ;;  %2435 = vrcp.f32 %v1624_v3 }
 0x230   : > { %v2426_v35 = vpop.eup %2425  ;;  %1662 = vst.msk [vmem:[%s3339_s17 + $0x10] sm:$0xff] %vm1579_vm2, %v1633_v33 }
 0x231   : > { %v2428_v28 = vpop.eup %2427  ;;  %v1655_v32 = vmul.f32 %v2426_v35, %v3231_v46 }
 0x232   : > { %v1653_v56 = vmul.f32 %v2428_v28, %v3236_v45 }
 0x233   : > { %1673 = vst.msk [vmem:[%s3339_s17 + $0x68] sm:$0xff] %vm1579_vm2, %v1655_v32 }
 0x234   : > { %v2430_v38 = vpop.eup %2429  ;;  %1672 = vst.msk [vmem:[%s3339_s17 + $0x60] sm:$0xff] %vm1579_vm2, %v1653_v56 }
 0x235   : > { %v2432_v27 = vpop.eup %2431  ;;  %v1639_v50 = vmul.f32 %v2430_v38, %v3244_v54 }
 0x236   : > { %v1637_v59 = vmul.f32 %v2432_v27, %v3246_v19 }
 0x237   : > { %1665 = vst.msk [vmem:[%s3339_s17 + $0x28] sm:$0xff] %vm1579_vm2, %v1639_v50 }
 0x238   : > { %v2434_v37 = vpop.eup %2433  ;;  %1664 = vst.msk [vmem:[%s3339_s17 + $0x20] sm:$0xff] %vm1579_vm2, %v1637_v59 }
 0x239   : > { %v2436_v25 = vpop.eup %2435  ;;  %v1659_v63 = vmul.f32 %v2434_v37, %v3248_v30 }
 0x23a   : > { %v1657_v2 = vmul.f32 %v2436_v25, %v3250_v51 }
 0x23b   : > { %1675 = vst.msk [vmem:[%s3339_s17 + $0x78] sm:$0xff] %vm1579_vm2, %v1659_v63 }
 0x23c   : > { %1674 = vst.msk [vmem:[%s3339_s17 + $0x70] sm:$0xff] %vm1579_vm2, %v1657_v2 }
 0x23d PF: > { %p2063_p5 = scmp.ge.s32.totalorder %s2531_s30, 2  ;;  %s1737_s15 = sand.u32 1, %s2519_s27  }
 0x23e   : > { %s1738_s22 = scalar_lea.sflag [#allocation3], %s1737_s15 }
 0x23f   : > { %p2057_p7 = pnand %p2063_p5, %p2625_p6 }
 0x241   : > { %2510 = dma.done.wait (!%p2057_p7), %s1738_s22, 4096  }
 0x242   : > { %2512 = vsyncadd (!%p2057_p7), %s1738_s22, 4294963200  ;;  %s1747_s10 = scalar_lea.sflag [#allocation5], %s1737_s15 }
 0x243   : > { %2514 = dma.done.wait (!%p2057_p7), %s1747_s10, 4096  }
 0x244   : > { %2516 = vsyncadd (!%p2057_p7), %s1747_s10, 4294963200  ;;  %p22_p8 = scmp.ge.s32.totalorder %s2608_s11, 4   ;;  %s3425_s27 = smov %s2523_s28 }
 0x245   : > { %s3426_s28 = smov %s2527_s29  ;;  %s3427_s29 = smov %s2619_s14 }
 0x246   : > { %s3428_s30 = smov %s2608_s11  ;;  %24 = sbr.rel (!%p22_p8) target bundleno = 9 (0x9), region = 111 }
 0x24d   :  { %1760 = vsyncpa [#allocation3], 1 }
 0x24e   :  { %1762 = vsyncpa [#allocation3 + $0x1], 1 }
 0x24f   :  { %1763 = vsyncpa [#allocation5], 1 }
 0x250   :  { %1765 = vsyncpa [#allocation5 + $0x1], 1 }

</bundles_post_ra>
